<compile_context>
chip_gen: v6e
topology: v6e:2x2x1
jax: 0.10.0
libtpu: 0.0.40
codegen_flags: <defaults>
</compile_context>

<pallas_src>
import functools
import math

import jax
import jax.numpy as jnp
from jax.experimental import pallas as pl
from jax.experimental.pallas import tpu as pltpu

_NEG_INF = -1e9


# ----------------------------- Fused Pallas kernel ---------------------------


def _decoder_layer_kernel(x_ref, mem_ref, tmask_ref, smask_ref,
                          w_self_ref, b_self_ref, w_src_ref, b_src_ref,
                          w1_ref, b1_ref, w2_ref, b2_ref,
                          ln_g_ref, ln_b_ref, o_ref, *, num_heads, eps):
    f32 = jnp.float32
    x = x_ref[...].astype(f32)          # (S, D)
    mem = mem_ref[...].astype(f32)      # (M, D)
    S, D = x.shape
    dk = D // num_heads
    inv_sqrt_dk = 1.0 / math.sqrt(dk)

    def layer_norm(v, idx):
        # torch semantics: unbiased std, eps added to std (not variance)
        g = ln_g_ref[idx].astype(f32)   # (1, D)
        b = ln_b_ref[idx].astype(f32)   # (1, D)
        mean = jnp.mean(v, axis=-1, keepdims=True)
        diff = v - mean
        var_unbiased = jnp.sum(diff * diff, axis=-1, keepdims=True) * (1.0 / (D - 1))
        std = jnp.sqrt(var_unbiased)
        inv = pl.reciprocal(std + eps, approx=True)       # EUP, not VALU divide
        return g * (diff * inv) + b

    def mha(q_in, kv_in, w_ref, b_ref, mask2d):
        # q_in: (Sq, D); kv_in: (Sk, D); mask2d broadcastable to (Sq, Sk)
        wq = w_ref[0].astype(f32)
        wk = w_ref[1].astype(f32)
        wv = w_ref[2].astype(f32)
        wo = w_ref[3].astype(f32)
        q = jnp.dot(q_in, wq, preferred_element_type=f32) + b_ref[0].astype(f32)
        k = jnp.dot(kv_in, wk, preferred_element_type=f32) + b_ref[1].astype(f32)
        v = jnp.dot(kv_in, wv, preferred_element_type=f32) + b_ref[2].astype(f32)

        heads = []
        for hi in range(num_heads):       # static unroll over heads
            lo = hi * dk
            qh = q[:, lo:lo + dk]         # (Sq, dk)
            kh = k[:, lo:lo + dk]         # (Sk, dk)
            vh = v[:, lo:lo + dk]         # (Sk, dk)
            s = jnp.dot(qh, kh.T, preferred_element_type=f32) * inv_sqrt_dk  # (Sq, Sk)
            s = jnp.where(mask2d == 0.0, _NEG_INF, s)
            smax = jnp.max(s, axis=-1, keepdims=True)
            e = jnp.exp(s - smax)
            denom = jnp.sum(e, axis=-1, keepdims=True)
            p = e * pl.reciprocal(denom, approx=True)
            heads.append(jnp.dot(p, vh, preferred_element_type=f32))         # (Sq, dk)
        ctx = jnp.concatenate(heads, axis=-1)                                # (Sq, D)
        return jnp.dot(ctx, wo, preferred_element_type=f32) + b_ref[3].astype(f32)

    tmask = tmask_ref[...].astype(f32)   # (S, S)
    smask = smask_ref[...].astype(f32)   # (1, M) -> broadcasts over query rows

    # --- sublayer[0]: self-attention + LN + residual ---
    a1 = mha(x, x, w_self_ref, b_self_ref, tmask)
    x1 = x + layer_norm(a1, 0)

    # --- sublayer[1]: source (cross) attention + LN + residual ---
    a2 = mha(x1, mem, w_src_ref, b_src_ref, smask)
    x2 = x1 + layer_norm(a2, 1)

    # --- sublayer[2]: position-wise feed forward + LN + residual ---
    h = jnp.maximum(
        jnp.dot(x2, w1_ref[...].astype(f32), preferred_element_type=f32)
        + b1_ref[...].astype(f32), 0.0)
    f = (jnp.dot(h, w2_ref[...].astype(f32), preferred_element_type=f32)
         + b2_ref[...].astype(f32))
    o_ref[...] = (x2 + layer_norm(f, 2)).astype(o_ref.dtype)


# ---------------------------------- Wrapper -----------------------------------


def decoder_layer_forward(x, memory, tgt_mask, src_mask, params, *, num_heads, eps=1e-6):
    """x: (B, S, D); memory: (B, M, D); tgt_mask: (B, S, S); src_mask: (B, 1, M)."""
    B, S, D = x.shape
    M = memory.shape[1]
    Dff = params["w1"].shape[1]

    kernel = functools.partial(_decoder_layer_kernel, num_heads=num_heads, eps=eps)
    const2 = lambda b: (0, 0)
    const3 = lambda b: (0, 0, 0)

    return pl.pallas_call(
        kernel,
        out_shape=jax.ShapeDtypeStruct((B, S, D), x.dtype),
        grid=(B,),
        in_specs=[
            pl.BlockSpec((None, S, D), lambda b: (b, 0, 0)),   # x (per batch, squeezed)
            pl.BlockSpec((None, M, D), lambda b: (b, 0, 0)),   # memory
            pl.BlockSpec((None, S, S), lambda b: (b, 0, 0)),   # tgt_mask
            pl.BlockSpec((None, 1, M), lambda b: (b, 0, 0)),   # src_mask
            pl.BlockSpec((4, D, D), const3),                   # self-attn W  (VMEM-resident)
            pl.BlockSpec((4, 1, D), const3),                   # self-attn b
            pl.BlockSpec((4, D, D), const3),                   # src-attn W
            pl.BlockSpec((4, 1, D), const3),                   # src-attn b
            pl.BlockSpec((D, Dff), const2),                    # FFN W1
            pl.BlockSpec((1, Dff), const2),                    # FFN b1
            pl.BlockSpec((Dff, D), const2),                    # FFN W2
            pl.BlockSpec((1, D), const2),                      # FFN b2
            pl.BlockSpec((3, 1, D), const3),                   # LN gammas
            pl.BlockSpec((3, 1, D), const3),                   # LN betas
        ],
        out_specs=pl.BlockSpec((None, S, D), lambda b: (b, 0, 0)),
        compiler_params=pltpu.CompilerParams(
            dimension_semantics=("parallel",),        # batch steps shard across megacore TCs
            vmem_limit_bytes=32 * 1024 * 1024,        # explicit budget (fits v7x 64 MiB)
        ),
    )(x, memory, tgt_mask, src_mask,
      params["w_self"], params["b_self"], params["w_src"], params["b_src"],
      params["w1"], params["b1"], params["w2"], params["b2"],
      params["ln_gamma"], params["ln_beta"])


# ----------------------------- Reference (pure JAX) ----------------------------


def _reference_decoder_layer(x, memory, tgt_mask, src_mask, p, *, num_heads, eps=1e-6):
    D = x.shape[-1]

    def ln(v, g, b):
        mean = v.mean(-1, keepdims=True)
        var = ((v - mean) ** 2).sum(-1, keepdims=True) / (D - 1)
        return g * (v - mean) / (jnp.sqrt(var) + eps) + b

    def mha(q_in, kv_in, w, b, mask):
        B, Sq, _ = q_in.shape
        Sk = kv_in.shape[1]
        dk = D // num_heads
        q = q_in @ w[0] + b[0]
        k = kv_in @ w[1] + b[1]
        v = kv_in @ w[2] + b[2]
        q = q.reshape(B, Sq, num_heads, dk).transpose(0, 2, 1, 3)
        k = k.reshape(B, Sk, num_heads, dk).transpose(0, 2, 1, 3)
        v = v.reshape(B, Sk, num_heads, dk).transpose(0, 2, 1, 3)
        s = q @ jnp.swapaxes(k, -1, -2) / math.sqrt(dk)
        s = jnp.where(mask[:, None] == 0, _NEG_INF, s)
        att = jax.nn.softmax(s, axis=-1)
        ctx = (att @ v).transpose(0, 2, 1, 3).reshape(B, Sq, D)
        return ctx @ w[3] + b[3]

    a1 = mha(x, x, p["w_self"], p["b_self"], tgt_mask)
    x1 = x + ln(a1, p["ln_gamma"][0], p["ln_beta"][0])
    a2 = mha(x1, memory, p["w_src"], p["b_src"], src_mask)
    x2 = x1 + ln(a2, p["ln_gamma"][1], p["ln_beta"][1])
    f = jnp.maximum(x2 @ p["w1"] + p["b1"], 0.0) @ p["w2"] + p["b2"]
    return x2 + ln(f, p["ln_gamma"][2], p["ln_beta"][2])


# ------------------------------------ Main -------------------------------------


if __name__ == "__main__":
    B, S, M = 2, 8, 8          # batch, target seq, source (memory) seq
    D, DFF, H = 128, 512, 4    # d_model (lane-dense), d_ff, heads
    f32 = jnp.float32

    key = jax.random.PRNGKey(0)
    ks = jax.random.split(key, 11)
    scale = 0.05

    x = jax.random.normal(ks[0], (B, S, D), dtype=f32)
    memory = jax.random.normal(ks[1], (B, M, D), dtype=f32)

    # masks: causal target mask, source mask with the tail of batch 1 masked out
    tgt_mask = jnp.tile(jnp.tril(jnp.ones((S, S), dtype=f32))[None], (B, 1, 1))
    src_mask = jnp.ones((B, 1, M), dtype=f32).at[1, 0, M - 2:].set(0.0)

    params = {
        "w_self": scale * jax.random.normal(ks[2], (4, D, D), dtype=f32),   # Wq,Wk,Wv,Wo
        "b_self": scale * jax.random.normal(ks[3], (4, 1, D), dtype=f32),
        "w_src":  scale * jax.random.normal(ks[4], (4, D, D), dtype=f32),
        "b_src":  scale * jax.random.normal(ks[5], (4, 1, D), dtype=f32),
        "w1":     scale * jax.random.normal(ks[6], (D, DFF), dtype=f32),
        "b1":     scale * jax.random.normal(ks[7], (1, DFF), dtype=f32),
        "w2":     scale * jax.random.normal(ks[8], (DFF, D), dtype=f32),
        "b2":     scale * jax.random.normal(ks[9], (1, D), dtype=f32),
        "ln_gamma": jnp.ones((3, 1, D), dtype=f32),    # LayerNorm.__init__: gamma=1
        "ln_beta":  jnp.zeros((3, 1, D), dtype=f32),   # LayerNorm.__init__: beta=0
    }

    out = decoder_layer_forward(x, memory, tgt_mask, src_mask, params,
                                num_heads=H, eps=1e-6)
    out = jax.block_until_ready(out)

    ref = _reference_decoder_layer(x, memory, tgt_mask, src_mask, params,
                                   num_heads=H, eps=1e-6)
    assert out.shape == (B, S, D)
    max_err = float(jnp.max(jnp.abs(out - ref)))
    # tolerance accounts for pl.reciprocal(approx=True) in LN/softmax normalization
    assert jnp.allclose(out, ref, atol=1e-2, rtol=1e-2), f"max abs err = {max_err}"

    print("KERNEL_OK")
</pallas_src>

<mosaic_0001>
module attributes {stable_mosaic.version = 11 : i64} {
  func.func @_decoder_layer_kernel(%arg0: i32, %arg1: memref<1x8x128xf32, #tpu.memory_space<vmem>>, %arg2: memref<1x8x128xf32, #tpu.memory_space<vmem>>, %arg3: memref<1x8x8xf32, #tpu.memory_space<vmem>>, %arg4: memref<1x1x8xf32, #tpu.memory_space<vmem>>, %arg5: memref<4x128x128xf32, #tpu.memory_space<vmem>>, %arg6: memref<4x1x128xf32, #tpu.memory_space<vmem>>, %arg7: memref<4x128x128xf32, #tpu.memory_space<vmem>>, %arg8: memref<4x1x128xf32, #tpu.memory_space<vmem>>, %arg9: memref<128x512xf32, #tpu.memory_space<vmem>>, %arg10: memref<1x512xf32, #tpu.memory_space<vmem>>, %arg11: memref<512x128xf32, #tpu.memory_space<vmem>>, %arg12: memref<1x128xf32, #tpu.memory_space<vmem>>, %arg13: memref<3x1x128xf32, #tpu.memory_space<vmem>>, %arg14: memref<3x1x128xf32, #tpu.memory_space<vmem>>, %arg15: memref<1x8x128xf32, #tpu.memory_space<vmem>>) attributes {dimension_semantics = [#tpu.dimension_semantics<parallel>], iteration_bounds = array<i64: 2>, scalar_prefetch = 0 : i64, scratch_operands = 0 : i64, tpu.core_type = #tpu.core_type<tc>, window_params = [{transform_indices = @transform_0, window_bounds = array<i64: 1, 8, 128>}, {transform_indices = @transform_1, window_bounds = array<i64: 1, 8, 128>}, {transform_indices = @transform_2, window_bounds = array<i64: 1, 8, 8>}, {transform_indices = @transform_3, window_bounds = array<i64: 1, 1, 8>}, {pipeline_mode = #tpu.pipeline_mode<synchronous>, transform_indices = @transform_4, window_bounds = array<i64: 4, 128, 128>}, {pipeline_mode = #tpu.pipeline_mode<synchronous>, transform_indices = @transform_5, window_bounds = array<i64: 4, 1, 128>}, {pipeline_mode = #tpu.pipeline_mode<synchronous>, transform_indices = @transform_6, window_bounds = array<i64: 4, 128, 128>}, {pipeline_mode = #tpu.pipeline_mode<synchronous>, transform_indices = @transform_7, window_bounds = array<i64: 4, 1, 128>}, {pipeline_mode = #tpu.pipeline_mode<synchronous>, transform_indices = @transform_8, window_bounds = array<i64: 128, 512>}, {pipeline_mode = #tpu.pipeline_mode<synchronous>, transform_indices = @transform_9, window_bounds = array<i64: 1, 512>}, {pipeline_mode = #tpu.pipeline_mode<synchronous>, transform_indices = @transform_10, window_bounds = array<i64: 512, 128>}, {pipeline_mode = #tpu.pipeline_mode<synchronous>, transform_indices = @transform_11, window_bounds = array<i64: 1, 128>}, {pipeline_mode = #tpu.pipeline_mode<synchronous>, transform_indices = @transform_12, window_bounds = array<i64: 3, 1, 128>}, {pipeline_mode = #tpu.pipeline_mode<synchronous>, transform_indices = @transform_13, window_bounds = array<i64: 3, 1, 128>}, {transform_indices = @transform_14, window_bounds = array<i64: 1, 8, 128>}]} {
    %c0 = arith.constant 0 : index
    %c0_0 = arith.constant 0 : index
    %c0_1 = arith.constant 0 : index
    %0 = vector.load %arg1[%c0, %c0_0, %c0_1] : memref<1x8x128xf32, #tpu.memory_space<vmem>>, vector<1x8x128xf32>
    %1 = vector.shape_cast %0 : vector<1x8x128xf32> to vector<8x128xf32>
    %c0_2 = arith.constant 0 : index
    %c0_3 = arith.constant 0 : index
    %c0_4 = arith.constant 0 : index
    %2 = vector.load %arg2[%c0_2, %c0_3, %c0_4] : memref<1x8x128xf32, #tpu.memory_space<vmem>>, vector<1x8x128xf32>
    %3 = vector.shape_cast %2 : vector<1x8x128xf32> to vector<8x128xf32>
    %c0_5 = arith.constant 0 : index
    %c0_6 = arith.constant 0 : index
    %c0_7 = arith.constant 0 : index
    %4 = vector.load %arg3[%c0_5, %c0_6, %c0_7] : memref<1x8x8xf32, #tpu.memory_space<vmem>>, vector<1x8x8xf32>
    %5 = vector.shape_cast %4 : vector<1x8x8xf32> to vector<8x8xf32>
    %c0_8 = arith.constant 0 : index
    %c0_9 = arith.constant 0 : index
    %c0_10 = arith.constant 0 : index
    %6 = vector.load %arg4[%c0_8, %c0_9, %c0_10] : memref<1x1x8xf32, #tpu.memory_space<vmem>>, vector<1x1x8xf32>
    %7 = vector.shape_cast %6 : vector<1x1x8xf32> to vector<1x8xf32>
    %c0_11 = arith.constant 0 : index
    %c0_12 = arith.constant 0 : index
    %c0_13 = arith.constant 0 : index
    %8 = vector.load %arg5[%c0_11, %c0_12, %c0_13] : memref<4x128x128xf32, #tpu.memory_space<vmem>>, vector<1x128x128xf32>
    %9 = vector.shape_cast %8 : vector<1x128x128xf32> to vector<128x128xf32>
    %c1 = arith.constant 1 : index
    %c0_14 = arith.constant 0 : index
    %c0_15 = arith.constant 0 : index
    %10 = vector.load %arg5[%c1, %c0_14, %c0_15] : memref<4x128x128xf32, #tpu.memory_space<vmem>>, vector<1x128x128xf32>
    %11 = vector.shape_cast %10 : vector<1x128x128xf32> to vector<128x128xf32>
    %c2 = arith.constant 2 : index
    %c0_16 = arith.constant 0 : index
    %c0_17 = arith.constant 0 : index
    %12 = vector.load %arg5[%c2, %c0_16, %c0_17] : memref<4x128x128xf32, #tpu.memory_space<vmem>>, vector<1x128x128xf32>
    %13 = vector.shape_cast %12 : vector<1x128x128xf32> to vector<128x128xf32>
    %c3 = arith.constant 3 : index
    %c0_18 = arith.constant 0 : index
    %c0_19 = arith.constant 0 : index
    %14 = vector.load %arg5[%c3, %c0_18, %c0_19] : memref<4x128x128xf32, #tpu.memory_space<vmem>>, vector<1x128x128xf32>
    %15 = vector.shape_cast %14 : vector<1x128x128xf32> to vector<128x128xf32>
    %cst = arith.constant dense<0.000000e+00> : vector<8x128xf32>
    %16 = tpu.matmul %1, %9, %cst {dimension_numbers = #tpu.dot_dimension_numbers<[1], [0], [0], [1], [0, 0, 1, 1], [], []>} : vector<8x128xf32>, vector<128x128xf32>, vector<8x128xf32> -> vector<8x128xf32>
    %c0_20 = arith.constant 0 : index
    %c0_21 = arith.constant 0 : index
    %c0_22 = arith.constant 0 : index
    %17 = vector.load %arg6[%c0_20, %c0_21, %c0_22] : memref<4x1x128xf32, #tpu.memory_space<vmem>>, vector<1x1x128xf32>
    %18 = vector.shape_cast %17 : vector<1x1x128xf32> to vector<1x128xf32>
    %19 = vector.broadcast %18 : vector<1x128xf32> to vector<8x128xf32>
    %20 = arith.addf %16, %19 : vector<8x128xf32>
    %cst_23 = arith.constant dense<0.000000e+00> : vector<8x128xf32>
    %21 = tpu.matmul %1, %11, %cst_23 {dimension_numbers = #tpu.dot_dimension_numbers<[1], [0], [0], [1], [0, 0, 1, 1], [], []>} : vector<8x128xf32>, vector<128x128xf32>, vector<8x128xf32> -> vector<8x128xf32>
    %c1_24 = arith.constant 1 : index
    %c0_25 = arith.constant 0 : index
    %c0_26 = arith.constant 0 : index
    %22 = vector.load %arg6[%c1_24, %c0_25, %c0_26] : memref<4x1x128xf32, #tpu.memory_space<vmem>>, vector<1x1x128xf32>
    %23 = vector.shape_cast %22 : vector<1x1x128xf32> to vector<1x128xf32>
    %24 = vector.broadcast %23 : vector<1x128xf32> to vector<8x128xf32>
    %25 = arith.addf %21, %24 : vector<8x128xf32>
    %cst_27 = arith.constant dense<0.000000e+00> : vector<8x128xf32>
    %26 = tpu.matmul %1, %13, %cst_27 {dimension_numbers = #tpu.dot_dimension_numbers<[1], [0], [0], [1], [0, 0, 1, 1], [], []>} : vector<8x128xf32>, vector<128x128xf32>, vector<8x128xf32> -> vector<8x128xf32>
    %c2_28 = arith.constant 2 : index
    %c0_29 = arith.constant 0 : index
    %c0_30 = arith.constant 0 : index
    %27 = vector.load %arg6[%c2_28, %c0_29, %c0_30] : memref<4x1x128xf32, #tpu.memory_space<vmem>>, vector<1x1x128xf32>
    %28 = vector.shape_cast %27 : vector<1x1x128xf32> to vector<1x128xf32>
    %29 = vector.broadcast %28 : vector<1x128xf32> to vector<8x128xf32>
    %30 = arith.addf %26, %29 : vector<8x128xf32>
    %31 = vector.extract_strided_slice %20 {offsets = [0, 0], sizes = [8, 32], strides = [1, 1]} : vector<8x128xf32> to vector<8x32xf32>
    %32 = vector.extract_strided_slice %25 {offsets = [0, 0], sizes = [8, 32], strides = [1, 1]} : vector<8x128xf32> to vector<8x32xf32>
    %33 = vector.extract_strided_slice %30 {offsets = [0, 0], sizes = [8, 32], strides = [1, 1]} : vector<8x128xf32> to vector<8x32xf32>
    %34 = tpu.transpose %32, [1, 0] : vector<8x32xf32> -> vector<32x8xf32>
    %cst_31 = arith.constant dense<0.000000e+00> : vector<8x8xf32>
    %35 = tpu.matmul %31, %34, %cst_31 {dimension_numbers = #tpu.dot_dimension_numbers<[1], [0], [0], [1], [0, 0, 1, 1], [], []>} : vector<8x32xf32>, vector<32x8xf32>, vector<8x8xf32> -> vector<8x8xf32>
    %cst_32 = arith.constant 0.176776692 : f32
    %36 = vector.broadcast %cst_32 : f32 to vector<8x8xf32>
    %37 = arith.mulf %35, %36 : vector<8x8xf32>
    %cst_33 = arith.constant 0.000000e+00 : f32
    %38 = vector.broadcast %cst_33 : f32 to vector<8x8xf32>
    %39 = arith.cmpf oeq, %5, %38 : vector<8x8xf32>
    %cst_34 = arith.constant -1.000000e+09 : f32
    %40 = vector.broadcast %cst_34 : f32 to vector<8x8xf32>
    %41 = arith.select %39, %40, %37 : vector<8x8xi1>, vector<8x8xf32>
    %cst_35 = arith.constant dense<0xFF800000> : vector<8xf32>
    %42 = vector.multi_reduction <maximumf>, %41, %cst_35 [1] : vector<8x8xf32> to vector<8xf32>
    %43 = vector.shape_cast %42 : vector<8xf32> to vector<8x1xf32>
    %44 = vector.broadcast %43 : vector<8x1xf32> to vector<8x8xf32>
    %45 = arith.subf %41, %44 : vector<8x8xf32>
    %46 = math.exp %45 : vector<8x8xf32>
    %cst_36 = arith.constant dense<0.000000e+00> : vector<8xf32>
    %47 = vector.multi_reduction <add>, %46, %cst_36 [1] : vector<8x8xf32> to vector<8xf32>
    %48 = vector.shape_cast %47 : vector<8xf32> to vector<8x1xf32>
    %49 = tpu.reciprocal %48 {approx = true} : vector<8x1xf32> -> vector<8x1xf32>
    %50 = vector.broadcast %49 : vector<8x1xf32> to vector<8x8xf32>
    %51 = arith.mulf %46, %50 : vector<8x8xf32>
    %cst_37 = arith.constant dense<0.000000e+00> : vector<8x32xf32>
    %52 = tpu.matmul %51, %33, %cst_37 {dimension_numbers = #tpu.dot_dimension_numbers<[1], [0], [0], [1], [0, 0, 1, 1], [], []>} : vector<8x8xf32>, vector<8x32xf32>, vector<8x32xf32> -> vector<8x32xf32>
    %53 = vector.extract_strided_slice %20 {offsets = [0, 32], sizes = [8, 32], strides = [1, 1]} : vector<8x128xf32> to vector<8x32xf32>
    %54 = vector.extract_strided_slice %25 {offsets = [0, 32], sizes = [8, 32], strides = [1, 1]} : vector<8x128xf32> to vector<8x32xf32>
    %55 = vector.extract_strided_slice %30 {offsets = [0, 32], sizes = [8, 32], strides = [1, 1]} : vector<8x128xf32> to vector<8x32xf32>
    %56 = tpu.transpose %54, [1, 0] : vector<8x32xf32> -> vector<32x8xf32>
    %cst_38 = arith.constant dense<0.000000e+00> : vector<8x8xf32>
    %57 = tpu.matmul %53, %56, %cst_38 {dimension_numbers = #tpu.dot_dimension_numbers<[1], [0], [0], [1], [0, 0, 1, 1], [], []>} : vector<8x32xf32>, vector<32x8xf32>, vector<8x8xf32> -> vector<8x8xf32>
    %cst_39 = arith.constant 0.176776692 : f32
    %58 = vector.broadcast %cst_39 : f32 to vector<8x8xf32>
    %59 = arith.mulf %57, %58 : vector<8x8xf32>
    %cst_40 = arith.constant 0.000000e+00 : f32
    %60 = vector.broadcast %cst_40 : f32 to vector<8x8xf32>
    %61 = arith.cmpf oeq, %5, %60 : vector<8x8xf32>
    %cst_41 = arith.constant -1.000000e+09 : f32
    %62 = vector.broadcast %cst_41 : f32 to vector<8x8xf32>
    %63 = arith.select %61, %62, %59 : vector<8x8xi1>, vector<8x8xf32>
    %cst_42 = arith.constant dense<0xFF800000> : vector<8xf32>
    %64 = vector.multi_reduction <maximumf>, %63, %cst_42 [1] : vector<8x8xf32> to vector<8xf32>
    %65 = vector.shape_cast %64 : vector<8xf32> to vector<8x1xf32>
    %66 = vector.broadcast %65 : vector<8x1xf32> to vector<8x8xf32>
    %67 = arith.subf %63, %66 : vector<8x8xf32>
    %68 = math.exp %67 : vector<8x8xf32>
    %cst_43 = arith.constant dense<0.000000e+00> : vector<8xf32>
    %69 = vector.multi_reduction <add>, %68, %cst_43 [1] : vector<8x8xf32> to vector<8xf32>
    %70 = vector.shape_cast %69 : vector<8xf32> to vector<8x1xf32>
    %71 = tpu.reciprocal %70 {approx = true} : vector<8x1xf32> -> vector<8x1xf32>
    %72 = vector.broadcast %71 : vector<8x1xf32> to vector<8x8xf32>
    %73 = arith.mulf %68, %72 : vector<8x8xf32>
    %cst_44 = arith.constant dense<0.000000e+00> : vector<8x32xf32>
    %74 = tpu.matmul %73, %55, %cst_44 {dimension_numbers = #tpu.dot_dimension_numbers<[1], [0], [0], [1], [0, 0, 1, 1], [], []>} : vector<8x8xf32>, vector<8x32xf32>, vector<8x32xf32> -> vector<8x32xf32>
    %75 = vector.extract_strided_slice %20 {offsets = [0, 64], sizes = [8, 32], strides = [1, 1]} : vector<8x128xf32> to vector<8x32xf32>
    %76 = vector.extract_strided_slice %25 {offsets = [0, 64], sizes = [8, 32], strides = [1, 1]} : vector<8x128xf32> to vector<8x32xf32>
    %77 = vector.extract_strided_slice %30 {offsets = [0, 64], sizes = [8, 32], strides = [1, 1]} : vector<8x128xf32> to vector<8x32xf32>
    %78 = tpu.transpose %76, [1, 0] : vector<8x32xf32> -> vector<32x8xf32>
    %cst_45 = arith.constant dense<0.000000e+00> : vector<8x8xf32>
    %79 = tpu.matmul %75, %78, %cst_45 {dimension_numbers = #tpu.dot_dimension_numbers<[1], [0], [0], [1], [0, 0, 1, 1], [], []>} : vector<8x32xf32>, vector<32x8xf32>, vector<8x8xf32> -> vector<8x8xf32>
    %cst_46 = arith.constant 0.176776692 : f32
    %80 = vector.broadcast %cst_46 : f32 to vector<8x8xf32>
    %81 = arith.mulf %79, %80 : vector<8x8xf32>
    %cst_47 = arith.constant 0.000000e+00 : f32
    %82 = vector.broadcast %cst_47 : f32 to vector<8x8xf32>
    %83 = arith.cmpf oeq, %5, %82 : vector<8x8xf32>
    %cst_48 = arith.constant -1.000000e+09 : f32
    %84 = vector.broadcast %cst_48 : f32 to vector<8x8xf32>
    %85 = arith.select %83, %84, %81 : vector<8x8xi1>, vector<8x8xf32>
    %cst_49 = arith.constant dense<0xFF800000> : vector<8xf32>
    %86 = vector.multi_reduction <maximumf>, %85, %cst_49 [1] : vector<8x8xf32> to vector<8xf32>
    %87 = vector.shape_cast %86 : vector<8xf32> to vector<8x1xf32>
    %88 = vector.broadcast %87 : vector<8x1xf32> to vector<8x8xf32>
    %89 = arith.subf %85, %88 : vector<8x8xf32>
    %90 = math.exp %89 : vector<8x8xf32>
    %cst_50 = arith.constant dense<0.000000e+00> : vector<8xf32>
    %91 = vector.multi_reduction <add>, %90, %cst_50 [1] : vector<8x8xf32> to vector<8xf32>
    %92 = vector.shape_cast %91 : vector<8xf32> to vector<8x1xf32>
    %93 = tpu.reciprocal %92 {approx = true} : vector<8x1xf32> -> vector<8x1xf32>
    %94 = vector.broadcast %93 : vector<8x1xf32> to vector<8x8xf32>
    %95 = arith.mulf %90, %94 : vector<8x8xf32>
    %cst_51 = arith.constant dense<0.000000e+00> : vector<8x32xf32>
    %96 = tpu.matmul %95, %77, %cst_51 {dimension_numbers = #tpu.dot_dimension_numbers<[1], [0], [0], [1], [0, 0, 1, 1], [], []>} : vector<8x8xf32>, vector<8x32xf32>, vector<8x32xf32> -> vector<8x32xf32>
    %97 = vector.extract_strided_slice %20 {offsets = [0, 96], sizes = [8, 32], strides = [1, 1]} : vector<8x128xf32> to vector<8x32xf32>
    %98 = vector.extract_strided_slice %25 {offsets = [0, 96], sizes = [8, 32], strides = [1, 1]} : vector<8x128xf32> to vector<8x32xf32>
    %99 = vector.extract_strided_slice %30 {offsets = [0, 96], sizes = [8, 32], strides = [1, 1]} : vector<8x128xf32> to vector<8x32xf32>
    %100 = tpu.transpose %98, [1, 0] : vector<8x32xf32> -> vector<32x8xf32>
    %cst_52 = arith.constant dense<0.000000e+00> : vector<8x8xf32>
    %101 = tpu.matmul %97, %100, %cst_52 {dimension_numbers = #tpu.dot_dimension_numbers<[1], [0], [0], [1], [0, 0, 1, 1], [], []>} : vector<8x32xf32>, vector<32x8xf32>, vector<8x8xf32> -> vector<8x8xf32>
    %cst_53 = arith.constant 0.176776692 : f32
    %102 = vector.broadcast %cst_53 : f32 to vector<8x8xf32>
    %103 = arith.mulf %101, %102 : vector<8x8xf32>
    %cst_54 = arith.constant 0.000000e+00 : f32
    %104 = vector.broadcast %cst_54 : f32 to vector<8x8xf32>
    %105 = arith.cmpf oeq, %5, %104 : vector<8x8xf32>
    %cst_55 = arith.constant -1.000000e+09 : f32
    %106 = vector.broadcast %cst_55 : f32 to vector<8x8xf32>
    %107 = arith.select %105, %106, %103 : vector<8x8xi1>, vector<8x8xf32>
    %cst_56 = arith.constant dense<0xFF800000> : vector<8xf32>
    %108 = vector.multi_reduction <maximumf>, %107, %cst_56 [1] : vector<8x8xf32> to vector<8xf32>
    %109 = vector.shape_cast %108 : vector<8xf32> to vector<8x1xf32>
    %110 = vector.broadcast %109 : vector<8x1xf32> to vector<8x8xf32>
    %111 = arith.subf %107, %110 : vector<8x8xf32>
    %112 = math.exp %111 : vector<8x8xf32>
    %cst_57 = arith.constant dense<0.000000e+00> : vector<8xf32>
    %113 = vector.multi_reduction <add>, %112, %cst_57 [1] : vector<8x8xf32> to vector<8xf32>
    %114 = vector.shape_cast %113 : vector<8xf32> to vector<8x1xf32>
    %115 = tpu.reciprocal %114 {approx = true} : vector<8x1xf32> -> vector<8x1xf32>
    %116 = vector.broadcast %115 : vector<8x1xf32> to vector<8x8xf32>
    %117 = arith.mulf %112, %116 : vector<8x8xf32>
    %cst_58 = arith.constant dense<0.000000e+00> : vector<8x32xf32>
    %118 = tpu.matmul %117, %99, %cst_58 {dimension_numbers = #tpu.dot_dimension_numbers<[1], [0], [0], [1], [0, 0, 1, 1], [], []>} : vector<8x8xf32>, vector<8x32xf32>, vector<8x32xf32> -> vector<8x32xf32>
    %119 = tpu.concatenate %52, %74, %96, %118 in 1 : vector<8x32xf32>, vector<8x32xf32>, vector<8x32xf32>, vector<8x32xf32> -> vector<8x128xf32>
    %cst_59 = arith.constant dense<0.000000e+00> : vector<8x128xf32>
    %120 = tpu.matmul %119, %15, %cst_59 {dimension_numbers = #tpu.dot_dimension_numbers<[1], [0], [0], [1], [0, 0, 1, 1], [], []>} : vector<8x128xf32>, vector<128x128xf32>, vector<8x128xf32> -> vector<8x128xf32>
    %c3_60 = arith.constant 3 : index
    %c0_61 = arith.constant 0 : index
    %c0_62 = arith.constant 0 : index
    %121 = vector.load %arg6[%c3_60, %c0_61, %c0_62] : memref<4x1x128xf32, #tpu.memory_space<vmem>>, vector<1x1x128xf32>
    %122 = vector.shape_cast %121 : vector<1x1x128xf32> to vector<1x128xf32>
    %123 = vector.broadcast %122 : vector<1x128xf32> to vector<8x128xf32>
    %124 = arith.addf %120, %123 : vector<8x128xf32>
    %c0_63 = arith.constant 0 : index
    %c0_64 = arith.constant 0 : index
    %c0_65 = arith.constant 0 : index
    %125 = vector.load %arg13[%c0_63, %c0_64, %c0_65] : memref<3x1x128xf32, #tpu.memory_space<vmem>>, vector<1x1x128xf32>
    %126 = vector.shape_cast %125 : vector<1x1x128xf32> to vector<1x128xf32>
    %c0_66 = arith.constant 0 : index
    %c0_67 = arith.constant 0 : index
    %c0_68 = arith.constant 0 : index
    %127 = vector.load %arg14[%c0_66, %c0_67, %c0_68] : memref<3x1x128xf32, #tpu.memory_space<vmem>>, vector<1x1x128xf32>
    %128 = vector.shape_cast %127 : vector<1x1x128xf32> to vector<1x128xf32>
    %cst_69 = arith.constant dense<0.000000e+00> : vector<8xf32>
    %129 = vector.multi_reduction <add>, %124, %cst_69 [1] : vector<8x128xf32> to vector<8xf32>
    %130 = vector.shape_cast %129 : vector<8xf32> to vector<8x1xf32>
    %cst_70 = arith.constant 1.280000e+02 : f32
    %131 = vector.broadcast %cst_70 : f32 to vector<8x1xf32>
    %132 = arith.divf %130, %131 : vector<8x1xf32>
    %133 = vector.broadcast %132 : vector<8x1xf32> to vector<8x128xf32>
    %134 = arith.subf %124, %133 : vector<8x128xf32>
    %135 = arith.mulf %134, %134 : vector<8x128xf32>
    %cst_71 = arith.constant dense<0.000000e+00> : vector<8xf32>
    %136 = vector.multi_reduction <add>, %135, %cst_71 [1] : vector<8x128xf32> to vector<8xf32>
    %137 = vector.shape_cast %136 : vector<8xf32> to vector<8x1xf32>
    %cst_72 = arith.constant 0.00787401571 : f32
    %138 = vector.broadcast %cst_72 : f32 to vector<8x1xf32>
    %139 = arith.mulf %137, %138 : vector<8x1xf32>
    %140 = math.sqrt %139 : vector<8x1xf32>
    %cst_73 = arith.constant 9.99999997E-7 : f32
    %141 = vector.broadcast %cst_73 : f32 to vector<8x1xf32>
    %142 = arith.addf %140, %141 : vector<8x1xf32>
    %143 = tpu.reciprocal %142 {approx = true} : vector<8x1xf32> -> vector<8x1xf32>
    %144 = vector.broadcast %143 : vector<8x1xf32> to vector<8x128xf32>
    %145 = arith.mulf %134, %144 : vector<8x128xf32>
    %146 = vector.broadcast %126 : vector<1x128xf32> to vector<8x128xf32>
    %147 = arith.mulf %146, %145 : vector<8x128xf32>
    %148 = vector.broadcast %128 : vector<1x128xf32> to vector<8x128xf32>
    %149 = arith.addf %147, %148 : vector<8x128xf32>
    %150 = arith.addf %1, %149 : vector<8x128xf32>
    %c0_74 = arith.constant 0 : index
    %c0_75 = arith.constant 0 : index
    %c0_76 = arith.constant 0 : index
    %151 = vector.load %arg7[%c0_74, %c0_75, %c0_76] : memref<4x128x128xf32, #tpu.memory_space<vmem>>, vector<1x128x128xf32>
    %152 = vector.shape_cast %151 : vector<1x128x128xf32> to vector<128x128xf32>
    %c1_77 = arith.constant 1 : index
    %c0_78 = arith.constant 0 : index
    %c0_79 = arith.constant 0 : index
    %153 = vector.load %arg7[%c1_77, %c0_78, %c0_79] : memref<4x128x128xf32, #tpu.memory_space<vmem>>, vector<1x128x128xf32>
    %154 = vector.shape_cast %153 : vector<1x128x128xf32> to vector<128x128xf32>
    %c2_80 = arith.constant 2 : index
    %c0_81 = arith.constant 0 : index
    %c0_82 = arith.constant 0 : index
    %155 = vector.load %arg7[%c2_80, %c0_81, %c0_82] : memref<4x128x128xf32, #tpu.memory_space<vmem>>, vector<1x128x128xf32>
    %156 = vector.shape_cast %155 : vector<1x128x128xf32> to vector<128x128xf32>
    %c3_83 = arith.constant 3 : index
    %c0_84 = arith.constant 0 : index
    %c0_85 = arith.constant 0 : index
    %157 = vector.load %arg7[%c3_83, %c0_84, %c0_85] : memref<4x128x128xf32, #tpu.memory_space<vmem>>, vector<1x128x128xf32>
    %158 = vector.shape_cast %157 : vector<1x128x128xf32> to vector<128x128xf32>
    %cst_86 = arith.constant dense<0.000000e+00> : vector<8x128xf32>
    %159 = tpu.matmul %150, %152, %cst_86 {dimension_numbers = #tpu.dot_dimension_numbers<[1], [0], [0], [1], [0, 0, 1, 1], [], []>} : vector<8x128xf32>, vector<128x128xf32>, vector<8x128xf32> -> vector<8x128xf32>
    %c0_87 = arith.constant 0 : index
    %c0_88 = arith.constant 0 : index
    %c0_89 = arith.constant 0 : index
    %160 = vector.load %arg8[%c0_87, %c0_88, %c0_89] : memref<4x1x128xf32, #tpu.memory_space<vmem>>, vector<1x1x128xf32>
    %161 = vector.shape_cast %160 : vector<1x1x128xf32> to vector<1x128xf32>
    %162 = vector.broadcast %161 : vector<1x128xf32> to vector<8x128xf32>
    %163 = arith.addf %159, %162 : vector<8x128xf32>
    %cst_90 = arith.constant dense<0.000000e+00> : vector<8x128xf32>
    %164 = tpu.matmul %3, %154, %cst_90 {dimension_numbers = #tpu.dot_dimension_numbers<[1], [0], [0], [1], [0, 0, 1, 1], [], []>} : vector<8x128xf32>, vector<128x128xf32>, vector<8x128xf32> -> vector<8x128xf32>
    %c1_91 = arith.constant 1 : index
    %c0_92 = arith.constant 0 : index
    %c0_93 = arith.constant 0 : index
    %165 = vector.load %arg8[%c1_91, %c0_92, %c0_93] : memref<4x1x128xf32, #tpu.memory_space<vmem>>, vector<1x1x128xf32>
    %166 = vector.shape_cast %165 : vector<1x1x128xf32> to vector<1x128xf32>
    %167 = vector.broadcast %166 : vector<1x128xf32> to vector<8x128xf32>
    %168 = arith.addf %164, %167 : vector<8x128xf32>
    %cst_94 = arith.constant dense<0.000000e+00> : vector<8x128xf32>
    %169 = tpu.matmul %3, %156, %cst_94 {dimension_numbers = #tpu.dot_dimension_numbers<[1], [0], [0], [1], [0, 0, 1, 1], [], []>} : vector<8x128xf32>, vector<128x128xf32>, vector<8x128xf32> -> vector<8x128xf32>
    %c2_95 = arith.constant 2 : index
    %c0_96 = arith.constant 0 : index
    %c0_97 = arith.constant 0 : index
    %170 = vector.load %arg8[%c2_95, %c0_96, %c0_97] : memref<4x1x128xf32, #tpu.memory_space<vmem>>, vector<1x1x128xf32>
    %171 = vector.shape_cast %170 : vector<1x1x128xf32> to vector<1x128xf32>
    %172 = vector.broadcast %171 : vector<1x128xf32> to vector<8x128xf32>
    %173 = arith.addf %169, %172 : vector<8x128xf32>
    %174 = vector.extract_strided_slice %163 {offsets = [0, 0], sizes = [8, 32], strides = [1, 1]} : vector<8x128xf32> to vector<8x32xf32>
    %175 = vector.extract_strided_slice %168 {offsets = [0, 0], sizes = [8, 32], strides = [1, 1]} : vector<8x128xf32> to vector<8x32xf32>
    %176 = vector.extract_strided_slice %173 {offsets = [0, 0], sizes = [8, 32], strides = [1, 1]} : vector<8x128xf32> to vector<8x32xf32>
    %177 = tpu.transpose %175, [1, 0] : vector<8x32xf32> -> vector<32x8xf32>
    %cst_98 = arith.constant dense<0.000000e+00> : vector<8x8xf32>
    %178 = tpu.matmul %174, %177, %cst_98 {dimension_numbers = #tpu.dot_dimension_numbers<[1], [0], [0], [1], [0, 0, 1, 1], [], []>} : vector<8x32xf32>, vector<32x8xf32>, vector<8x8xf32> -> vector<8x8xf32>
    %cst_99 = arith.constant 0.176776692 : f32
    %179 = vector.broadcast %cst_99 : f32 to vector<8x8xf32>
    %180 = arith.mulf %178, %179 : vector<8x8xf32>
    %cst_100 = arith.constant 0.000000e+00 : f32
    %181 = vector.broadcast %cst_100 : f32 to vector<1x8xf32>
    %182 = arith.cmpf oeq, %7, %181 : vector<1x8xf32>
    %cst_101 = arith.constant -1.000000e+09 : f32
    %183 = vector.shape_cast %182 : vector<1x8xi1> to vector<1x8xi1>
    %184 = vector.broadcast %183 : vector<1x8xi1> to vector<8x8xi1>
    %185 = vector.broadcast %cst_101 : f32 to vector<8x8xf32>
    %186 = arith.select %184, %185, %180 : vector<8x8xi1>, vector<8x8xf32>
    %cst_102 = arith.constant dense<0xFF800000> : vector<8xf32>
    %187 = vector.multi_reduction <maximumf>, %186, %cst_102 [1] : vector<8x8xf32> to vector<8xf32>
    %188 = vector.shape_cast %187 : vector<8xf32> to vector<8x1xf32>
    %189 = vector.broadcast %188 : vector<8x1xf32> to vector<8x8xf32>
    %190 = arith.subf %186, %189 : vector<8x8xf32>
    %191 = math.exp %190 : vector<8x8xf32>
    %cst_103 = arith.constant dense<0.000000e+00> : vector<8xf32>
    %192 = vector.multi_reduction <add>, %191, %cst_103 [1] : vector<8x8xf32> to vector<8xf32>
    %193 = vector.shape_cast %192 : vector<8xf32> to vector<8x1xf32>
    %194 = tpu.reciprocal %193 {approx = true} : vector<8x1xf32> -> vector<8x1xf32>
    %195 = vector.broadcast %194 : vector<8x1xf32> to vector<8x8xf32>
    %196 = arith.mulf %191, %195 : vector<8x8xf32>
    %cst_104 = arith.constant dense<0.000000e+00> : vector<8x32xf32>
    %197 = tpu.matmul %196, %176, %cst_104 {dimension_numbers = #tpu.dot_dimension_numbers<[1], [0], [0], [1], [0, 0, 1, 1], [], []>} : vector<8x8xf32>, vector<8x32xf32>, vector<8x32xf32> -> vector<8x32xf32>
    %198 = vector.extract_strided_slice %163 {offsets = [0, 32], sizes = [8, 32], strides = [1, 1]} : vector<8x128xf32> to vector<8x32xf32>
    %199 = vector.extract_strided_slice %168 {offsets = [0, 32], sizes = [8, 32], strides = [1, 1]} : vector<8x128xf32> to vector<8x32xf32>
    %200 = vector.extract_strided_slice %173 {offsets = [0, 32], sizes = [8, 32], strides = [1, 1]} : vector<8x128xf32> to vector<8x32xf32>
    %201 = tpu.transpose %199, [1, 0] : vector<8x32xf32> -> vector<32x8xf32>
    %cst_105 = arith.constant dense<0.000000e+00> : vector<8x8xf32>
    %202 = tpu.matmul %198, %201, %cst_105 {dimension_numbers = #tpu.dot_dimension_numbers<[1], [0], [0], [1], [0, 0, 1, 1], [], []>} : vector<8x32xf32>, vector<32x8xf32>, vector<8x8xf32> -> vector<8x8xf32>
    %cst_106 = arith.constant 0.176776692 : f32
    %203 = vector.broadcast %cst_106 : f32 to vector<8x8xf32>
    %204 = arith.mulf %202, %203 : vector<8x8xf32>
    %cst_107 = arith.constant 0.000000e+00 : f32
    %205 = vector.broadcast %cst_107 : f32 to vector<1x8xf32>
    %206 = arith.cmpf oeq, %7, %205 : vector<1x8xf32>
    %cst_108 = arith.constant -1.000000e+09 : f32
    %207 = vector.shape_cast %206 : vector<1x8xi1> to vector<1x8xi1>
    %208 = vector.broadcast %207 : vector<1x8xi1> to vector<8x8xi1>
    %209 = vector.broadcast %cst_108 : f32 to vector<8x8xf32>
    %210 = arith.select %208, %209, %204 : vector<8x8xi1>, vector<8x8xf32>
    %cst_109 = arith.constant dense<0xFF800000> : vector<8xf32>
    %211 = vector.multi_reduction <maximumf>, %210, %cst_109 [1] : vector<8x8xf32> to vector<8xf32>
    %212 = vector.shape_cast %211 : vector<8xf32> to vector<8x1xf32>
    %213 = vector.broadcast %212 : vector<8x1xf32> to vector<8x8xf32>
    %214 = arith.subf %210, %213 : vector<8x8xf32>
    %215 = math.exp %214 : vector<8x8xf32>
    %cst_110 = arith.constant dense<0.000000e+00> : vector<8xf32>
    %216 = vector.multi_reduction <add>, %215, %cst_110 [1] : vector<8x8xf32> to vector<8xf32>
    %217 = vector.shape_cast %216 : vector<8xf32> to vector<8x1xf32>
    %218 = tpu.reciprocal %217 {approx = true} : vector<8x1xf32> -> vector<8x1xf32>
    %219 = vector.broadcast %218 : vector<8x1xf32> to vector<8x8xf32>
    %220 = arith.mulf %215, %219 : vector<8x8xf32>
    %cst_111 = arith.constant dense<0.000000e+00> : vector<8x32xf32>
    %221 = tpu.matmul %220, %200, %cst_111 {dimension_numbers = #tpu.dot_dimension_numbers<[1], [0], [0], [1], [0, 0, 1, 1], [], []>} : vector<8x8xf32>, vector<8x32xf32>, vector<8x32xf32> -> vector<8x32xf32>
    %222 = vector.extract_strided_slice %163 {offsets = [0, 64], sizes = [8, 32], strides = [1, 1]} : vector<8x128xf32> to vector<8x32xf32>
    %223 = vector.extract_strided_slice %168 {offsets = [0, 64], sizes = [8, 32], strides = [1, 1]} : vector<8x128xf32> to vector<8x32xf32>
    %224 = vector.extract_strided_slice %173 {offsets = [0, 64], sizes = [8, 32], strides = [1, 1]} : vector<8x128xf32> to vector<8x32xf32>
    %225 = tpu.transpose %223, [1, 0] : vector<8x32xf32> -> vector<32x8xf32>
    %cst_112 = arith.constant dense<0.000000e+00> : vector<8x8xf32>
    %226 = tpu.matmul %222, %225, %cst_112 {dimension_numbers = #tpu.dot_dimension_numbers<[1], [0], [0], [1], [0, 0, 1, 1], [], []>} : vector<8x32xf32>, vector<32x8xf32>, vector<8x8xf32> -> vector<8x8xf32>
    %cst_113 = arith.constant 0.176776692 : f32
    %227 = vector.broadcast %cst_113 : f32 to vector<8x8xf32>
    %228 = arith.mulf %226, %227 : vector<8x8xf32>
    %cst_114 = arith.constant 0.000000e+00 : f32
    %229 = vector.broadcast %cst_114 : f32 to vector<1x8xf32>
    %230 = arith.cmpf oeq, %7, %229 : vector<1x8xf32>
    %cst_115 = arith.constant -1.000000e+09 : f32
    %231 = vector.shape_cast %230 : vector<1x8xi1> to vector<1x8xi1>
    %232 = vector.broadcast %231 : vector<1x8xi1> to vector<8x8xi1>
    %233 = vector.broadcast %cst_115 : f32 to vector<8x8xf32>
    %234 = arith.select %232, %233, %228 : vector<8x8xi1>, vector<8x8xf32>
    %cst_116 = arith.constant dense<0xFF800000> : vector<8xf32>
    %235 = vector.multi_reduction <maximumf>, %234, %cst_116 [1] : vector<8x8xf32> to vector<8xf32>
    %236 = vector.shape_cast %235 : vector<8xf32> to vector<8x1xf32>
    %237 = vector.broadcast %236 : vector<8x1xf32> to vector<8x8xf32>
    %238 = arith.subf %234, %237 : vector<8x8xf32>
    %239 = math.exp %238 : vector<8x8xf32>
    %cst_117 = arith.constant dense<0.000000e+00> : vector<8xf32>
    %240 = vector.multi_reduction <add>, %239, %cst_117 [1] : vector<8x8xf32> to vector<8xf32>
    %241 = vector.shape_cast %240 : vector<8xf32> to vector<8x1xf32>
    %242 = tpu.reciprocal %241 {approx = true} : vector<8x1xf32> -> vector<8x1xf32>
    %243 = vector.broadcast %242 : vector<8x1xf32> to vector<8x8xf32>
    %244 = arith.mulf %239, %243 : vector<8x8xf32>
    %cst_118 = arith.constant dense<0.000000e+00> : vector<8x32xf32>
    %245 = tpu.matmul %244, %224, %cst_118 {dimension_numbers = #tpu.dot_dimension_numbers<[1], [0], [0], [1], [0, 0, 1, 1], [], []>} : vector<8x8xf32>, vector<8x32xf32>, vector<8x32xf32> -> vector<8x32xf32>
    %246 = vector.extract_strided_slice %163 {offsets = [0, 96], sizes = [8, 32], strides = [1, 1]} : vector<8x128xf32> to vector<8x32xf32>
    %247 = vector.extract_strided_slice %168 {offsets = [0, 96], sizes = [8, 32], strides = [1, 1]} : vector<8x128xf32> to vector<8x32xf32>
    %248 = vector.extract_strided_slice %173 {offsets = [0, 96], sizes = [8, 32], strides = [1, 1]} : vector<8x128xf32> to vector<8x32xf32>
    %249 = tpu.transpose %247, [1, 0] : vector<8x32xf32> -> vector<32x8xf32>
    %cst_119 = arith.constant dense<0.000000e+00> : vector<8x8xf32>
    %250 = tpu.matmul %246, %249, %cst_119 {dimension_numbers = #tpu.dot_dimension_numbers<[1], [0], [0], [1], [0, 0, 1, 1], [], []>} : vector<8x32xf32>, vector<32x8xf32>, vector<8x8xf32> -> vector<8x8xf32>
    %cst_120 = arith.constant 0.176776692 : f32
    %251 = vector.broadcast %cst_120 : f32 to vector<8x8xf32>
    %252 = arith.mulf %250, %251 : vector<8x8xf32>
    %cst_121 = arith.constant 0.000000e+00 : f32
    %253 = vector.broadcast %cst_121 : f32 to vector<1x8xf32>
    %254 = arith.cmpf oeq, %7, %253 : vector<1x8xf32>
    %cst_122 = arith.constant -1.000000e+09 : f32
    %255 = vector.shape_cast %254 : vector<1x8xi1> to vector<1x8xi1>
    %256 = vector.broadcast %255 : vector<1x8xi1> to vector<8x8xi1>
    %257 = vector.broadcast %cst_122 : f32 to vector<8x8xf32>
    %258 = arith.select %256, %257, %252 : vector<8x8xi1>, vector<8x8xf32>
    %cst_123 = arith.constant dense<0xFF800000> : vector<8xf32>
    %259 = vector.multi_reduction <maximumf>, %258, %cst_123 [1] : vector<8x8xf32> to vector<8xf32>
    %260 = vector.shape_cast %259 : vector<8xf32> to vector<8x1xf32>
    %261 = vector.broadcast %260 : vector<8x1xf32> to vector<8x8xf32>
    %262 = arith.subf %258, %261 : vector<8x8xf32>
    %263 = math.exp %262 : vector<8x8xf32>
    %cst_124 = arith.constant dense<0.000000e+00> : vector<8xf32>
    %264 = vector.multi_reduction <add>, %263, %cst_124 [1] : vector<8x8xf32> to vector<8xf32>
    %265 = vector.shape_cast %264 : vector<8xf32> to vector<8x1xf32>
    %266 = tpu.reciprocal %265 {approx = true} : vector<8x1xf32> -> vector<8x1xf32>
    %267 = vector.broadcast %266 : vector<8x1xf32> to vector<8x8xf32>
    %268 = arith.mulf %263, %267 : vector<8x8xf32>
    %cst_125 = arith.constant dense<0.000000e+00> : vector<8x32xf32>
    %269 = tpu.matmul %268, %248, %cst_125 {dimension_numbers = #tpu.dot_dimension_numbers<[1], [0], [0], [1], [0, 0, 1, 1], [], []>} : vector<8x8xf32>, vector<8x32xf32>, vector<8x32xf32> -> vector<8x32xf32>
    %270 = tpu.concatenate %197, %221, %245, %269 in 1 : vector<8x32xf32>, vector<8x32xf32>, vector<8x32xf32>, vector<8x32xf32> -> vector<8x128xf32>
    %cst_126 = arith.constant dense<0.000000e+00> : vector<8x128xf32>
    %271 = tpu.matmul %270, %158, %cst_126 {dimension_numbers = #tpu.dot_dimension_numbers<[1], [0], [0], [1], [0, 0, 1, 1], [], []>} : vector<8x128xf32>, vector<128x128xf32>, vector<8x128xf32> -> vector<8x128xf32>
    %c3_127 = arith.constant 3 : index
    %c0_128 = arith.constant 0 : index
    %c0_129 = arith.constant 0 : index
    %272 = vector.load %arg8[%c3_127, %c0_128, %c0_129] : memref<4x1x128xf32, #tpu.memory_space<vmem>>, vector<1x1x128xf32>
    %273 = vector.shape_cast %272 : vector<1x1x128xf32> to vector<1x128xf32>
    %274 = vector.broadcast %273 : vector<1x128xf32> to vector<8x128xf32>
    %275 = arith.addf %271, %274 : vector<8x128xf32>
    %c1_130 = arith.constant 1 : index
    %c0_131 = arith.constant 0 : index
    %c0_132 = arith.constant 0 : index
    %276 = vector.load %arg13[%c1_130, %c0_131, %c0_132] : memref<3x1x128xf32, #tpu.memory_space<vmem>>, vector<1x1x128xf32>
    %277 = vector.shape_cast %276 : vector<1x1x128xf32> to vector<1x128xf32>
    %c1_133 = arith.constant 1 : index
    %c0_134 = arith.constant 0 : index
    %c0_135 = arith.constant 0 : index
    %278 = vector.load %arg14[%c1_133, %c0_134, %c0_135] : memref<3x1x128xf32, #tpu.memory_space<vmem>>, vector<1x1x128xf32>
    %279 = vector.shape_cast %278 : vector<1x1x128xf32> to vector<1x128xf32>
    %cst_136 = arith.constant dense<0.000000e+00> : vector<8xf32>
    %280 = vector.multi_reduction <add>, %275, %cst_136 [1] : vector<8x128xf32> to vector<8xf32>
    %281 = vector.shape_cast %280 : vector<8xf32> to vector<8x1xf32>
    %cst_137 = arith.constant 1.280000e+02 : f32
    %282 = vector.broadcast %cst_137 : f32 to vector<8x1xf32>
    %283 = arith.divf %281, %282 : vector<8x1xf32>
    %284 = vector.broadcast %283 : vector<8x1xf32> to vector<8x128xf32>
    %285 = arith.subf %275, %284 : vector<8x128xf32>
    %286 = arith.mulf %285, %285 : vector<8x128xf32>
    %cst_138 = arith.constant dense<0.000000e+00> : vector<8xf32>
    %287 = vector.multi_reduction <add>, %286, %cst_138 [1] : vector<8x128xf32> to vector<8xf32>
    %288 = vector.shape_cast %287 : vector<8xf32> to vector<8x1xf32>
    %cst_139 = arith.constant 0.00787401571 : f32
    %289 = vector.broadcast %cst_139 : f32 to vector<8x1xf32>
    %290 = arith.mulf %288, %289 : vector<8x1xf32>
    %291 = math.sqrt %290 : vector<8x1xf32>
    %cst_140 = arith.constant 9.99999997E-7 : f32
    %292 = vector.broadcast %cst_140 : f32 to vector<8x1xf32>
    %293 = arith.addf %291, %292 : vector<8x1xf32>
    %294 = tpu.reciprocal %293 {approx = true} : vector<8x1xf32> -> vector<8x1xf32>
    %295 = vector.broadcast %294 : vector<8x1xf32> to vector<8x128xf32>
    %296 = arith.mulf %285, %295 : vector<8x128xf32>
    %297 = vector.broadcast %277 : vector<1x128xf32> to vector<8x128xf32>
    %298 = arith.mulf %297, %296 : vector<8x128xf32>
    %299 = vector.broadcast %279 : vector<1x128xf32> to vector<8x128xf32>
    %300 = arith.addf %298, %299 : vector<8x128xf32>
    %301 = arith.addf %150, %300 : vector<8x128xf32>
    %c0_141 = arith.constant 0 : index
    %c0_142 = arith.constant 0 : index
    %302 = vector.load %arg9[%c0_141, %c0_142] : memref<128x512xf32, #tpu.memory_space<vmem>>, vector<128x512xf32>
    %cst_143 = arith.constant dense<0.000000e+00> : vector<8x512xf32>
    %303 = tpu.matmul %301, %302, %cst_143 {dimension_numbers = #tpu.dot_dimension_numbers<[1], [0], [0], [1], [0, 0, 1, 1], [], []>} : vector<8x128xf32>, vector<128x512xf32>, vector<8x512xf32> -> vector<8x512xf32>
    %c0_144 = arith.constant 0 : index
    %c0_145 = arith.constant 0 : index
    %304 = vector.load %arg10[%c0_144, %c0_145] : memref<1x512xf32, #tpu.memory_space<vmem>>, vector<1x512xf32>
    %305 = vector.broadcast %304 : vector<1x512xf32> to vector<8x512xf32>
    %306 = arith.addf %303, %305 : vector<8x512xf32>
    %cst_146 = arith.constant 0.000000e+00 : f32
    %307 = vector.broadcast %cst_146 : f32 to vector<8x512xf32>
    %308 = arith.maximumf %306, %307 : vector<8x512xf32>
    %c0_147 = arith.constant 0 : index
    %c0_148 = arith.constant 0 : index
    %309 = vector.load %arg11[%c0_147, %c0_148] : memref<512x128xf32, #tpu.memory_space<vmem>>, vector<512x128xf32>
    %cst_149 = arith.constant dense<0.000000e+00> : vector<8x128xf32>
    %310 = tpu.matmul %308, %309, %cst_149 {dimension_numbers = #tpu.dot_dimension_numbers<[1], [0], [0], [1], [0, 0, 1, 1], [], []>} : vector<8x512xf32>, vector<512x128xf32>, vector<8x128xf32> -> vector<8x128xf32>
    %c0_150 = arith.constant 0 : index
    %c0_151 = arith.constant 0 : index
    %311 = vector.load %arg12[%c0_150, %c0_151] : memref<1x128xf32, #tpu.memory_space<vmem>>, vector<1x128xf32>
    %312 = vector.broadcast %311 : vector<1x128xf32> to vector<8x128xf32>
    %313 = arith.addf %310, %312 : vector<8x128xf32>
    %c2_152 = arith.constant 2 : index
    %c0_153 = arith.constant 0 : index
    %c0_154 = arith.constant 0 : index
    %314 = vector.load %arg13[%c2_152, %c0_153, %c0_154] : memref<3x1x128xf32, #tpu.memory_space<vmem>>, vector<1x1x128xf32>
    %315 = vector.shape_cast %314 : vector<1x1x128xf32> to vector<1x128xf32>
    %c2_155 = arith.constant 2 : index
    %c0_156 = arith.constant 0 : index
    %c0_157 = arith.constant 0 : index
    %316 = vector.load %arg14[%c2_155, %c0_156, %c0_157] : memref<3x1x128xf32, #tpu.memory_space<vmem>>, vector<1x1x128xf32>
    %317 = vector.shape_cast %316 : vector<1x1x128xf32> to vector<1x128xf32>
    %cst_158 = arith.constant dense<0.000000e+00> : vector<8xf32>
    %318 = vector.multi_reduction <add>, %313, %cst_158 [1] : vector<8x128xf32> to vector<8xf32>
    %319 = vector.shape_cast %318 : vector<8xf32> to vector<8x1xf32>
    %cst_159 = arith.constant 1.280000e+02 : f32
    %320 = vector.broadcast %cst_159 : f32 to vector<8x1xf32>
    %321 = arith.divf %319, %320 : vector<8x1xf32>
    %322 = vector.broadcast %321 : vector<8x1xf32> to vector<8x128xf32>
    %323 = arith.subf %313, %322 : vector<8x128xf32>
    %324 = arith.mulf %323, %323 : vector<8x128xf32>
    %cst_160 = arith.constant dense<0.000000e+00> : vector<8xf32>
    %325 = vector.multi_reduction <add>, %324, %cst_160 [1] : vector<8x128xf32> to vector<8xf32>
    %326 = vector.shape_cast %325 : vector<8xf32> to vector<8x1xf32>
    %cst_161 = arith.constant 0.00787401571 : f32
    %327 = vector.broadcast %cst_161 : f32 to vector<8x1xf32>
    %328 = arith.mulf %326, %327 : vector<8x1xf32>
    %329 = math.sqrt %328 : vector<8x1xf32>
    %cst_162 = arith.constant 9.99999997E-7 : f32
    %330 = vector.broadcast %cst_162 : f32 to vector<8x1xf32>
    %331 = arith.addf %329, %330 : vector<8x1xf32>
    %332 = tpu.reciprocal %331 {approx = true} : vector<8x1xf32> -> vector<8x1xf32>
    %333 = vector.broadcast %332 : vector<8x1xf32> to vector<8x128xf32>
    %334 = arith.mulf %323, %333 : vector<8x128xf32>
    %335 = vector.broadcast %315 : vector<1x128xf32> to vector<8x128xf32>
    %336 = arith.mulf %335, %334 : vector<8x128xf32>
    %337 = vector.broadcast %317 : vector<1x128xf32> to vector<8x128xf32>
    %338 = arith.addf %336, %337 : vector<8x128xf32>
    %339 = arith.addf %301, %338 : vector<8x128xf32>
    %c0_163 = arith.constant 0 : index
    %c0_164 = arith.constant 0 : index
    %c0_165 = arith.constant 0 : index
    %340 = vector.load %arg15[%c0_163, %c0_164, %c0_165] : memref<1x8x128xf32, #tpu.memory_space<vmem>>, vector<1x8x128xf32>
    %341 = vector.shape_cast %340 : vector<1x8x128xf32> to vector<8x128xf32>
    %342 = vector.shape_cast %339 : vector<8x128xf32> to vector<1x8x128xf32>
    tpu.vector_store %arg15[%c0_163, %c0_164, %c0_165], %342 {strides = array<i32>} : memref<1x8x128xf32, #tpu.memory_space<vmem>>, vector<1x8x128xf32>,
    return
  }
  func.func @transform_0(%arg0: i32) -> (i32, i32, i32) {
    %c0_i32 = arith.constant 0 : i32
    %c0_i32_0 = arith.constant 0 : i32
    %c0_i32_1 = arith.constant 0 : i32
    return %arg0, %c0_i32, %c0_i32_0 : i32, i32, i32
  }
  func.func @transform_1(%arg0: i32) -> (i32, i32, i32) {
    %c0_i32 = arith.constant 0 : i32
    %c0_i32_0 = arith.constant 0 : i32
    %c0_i32_1 = arith.constant 0 : i32
    return %arg0, %c0_i32, %c0_i32_0 : i32, i32, i32
  }
  func.func @transform_2(%arg0: i32) -> (i32, i32, i32) {
    %c0_i32 = arith.constant 0 : i32
    %c0_i32_0 = arith.constant 0 : i32
    %c0_i32_1 = arith.constant 0 : i32
    return %arg0, %c0_i32, %c0_i32_0 : i32, i32, i32
  }
  func.func @transform_3(%arg0: i32) -> (i32, i32, i32) {
    %c0_i32 = arith.constant 0 : i32
    %c0_i32_0 = arith.constant 0 : i32
    %c0_i32_1 = arith.constant 0 : i32
    return %arg0, %c0_i32, %c0_i32_0 : i32, i32, i32
  }
  func.func @transform_4(%arg0: i32) -> (i32, i32, i32) {
    %c0_i32 = arith.constant 0 : i32
    %c0_i32_0 = arith.constant 0 : i32
    %c0_i32_1 = arith.constant 0 : i32
    %c0_i32_2 = arith.constant 0 : i32
    return %c0_i32, %c0_i32_0, %c0_i32_1 : i32, i32, i32
  }
  func.func @transform_5(%arg0: i32) -> (i32, i32, i32) {
    %c0_i32 = arith.constant 0 : i32
    %c0_i32_0 = arith.constant 0 : i32
    %c0_i32_1 = arith.constant 0 : i32
    %c0_i32_2 = arith.constant 0 : i32
    return %c0_i32, %c0_i32_0, %c0_i32_1 : i32, i32, i32
  }
  func.func @transform_6(%arg0: i32) -> (i32, i32, i32) {
    %c0_i32 = arith.constant 0 : i32
    %c0_i32_0 = arith.constant 0 : i32
    %c0_i32_1 = arith.constant 0 : i32
    %c0_i32_2 = arith.constant 0 : i32
    return %c0_i32, %c0_i32_0, %c0_i32_1 : i32, i32, i32
  }
  func.func @transform_7(%arg0: i32) -> (i32, i32, i32) {
    %c0_i32 = arith.constant 0 : i32
    %c0_i32_0 = arith.constant 0 : i32
    %c0_i32_1 = arith.constant 0 : i32
    %c0_i32_2 = arith.constant 0 : i32
    return %c0_i32, %c0_i32_0, %c0_i32_1 : i32, i32, i32
  }
  func.func @transform_8(%arg0: i32) -> (i32, i32) {
    %c0_i32 = arith.constant 0 : i32
    %c0_i32_0 = arith.constant 0 : i32
    %c0_i32_1 = arith.constant 0 : i32
    return %c0_i32, %c0_i32_0 : i32, i32
  }
  func.func @transform_9(%arg0: i32) -> (i32, i32) {
    %c0_i32 = arith.constant 0 : i32
    %c0_i32_0 = arith.constant 0 : i32
    %c0_i32_1 = arith.constant 0 : i32
    return %c0_i32, %c0_i32_0 : i32, i32
  }
  func.func @transform_10(%arg0: i32) -> (i32, i32) {
    %c0_i32 = arith.constant 0 : i32
    %c0_i32_0 = arith.constant 0 : i32
    %c0_i32_1 = arith.constant 0 : i32
    return %c0_i32, %c0_i32_0 : i32, i32
  }
  func.func @transform_11(%arg0: i32) -> (i32, i32) {
    %c0_i32 = arith.constant 0 : i32
    %c0_i32_0 = arith.constant 0 : i32
    %c0_i32_1 = arith.constant 0 : i32
    return %c0_i32, %c0_i32_0 : i32, i32
  }
  func.func @transform_12(%arg0: i32) -> (i32, i32, i32) {
    %c0_i32 = arith.constant 0 : i32
    %c0_i32_0 = arith.constant 0 : i32
    %c0_i32_1 = arith.constant 0 : i32
    %c0_i32_2 = arith.constant 0 : i32
    return %c0_i32, %c0_i32_0, %c0_i32_1 : i32, i32, i32
  }
  func.func @transform_13(%arg0: i32) -> (i32, i32, i32) {
    %c0_i32 = arith.constant 0 : i32
    %c0_i32_0 = arith.constant 0 : i32
    %c0_i32_1 = arith.constant 0 : i32
    %c0_i32_2 = arith.constant 0 : i32
    return %c0_i32, %c0_i32_0, %c0_i32_1 : i32, i32, i32
  }
  func.func @transform_14(%arg0: i32) -> (i32, i32, i32) {
    %c0_i32 = arith.constant 0 : i32
    %c0_i32_0 = arith.constant 0 : i32
    %c0_i32_1 = arith.constant 0 : i32
    return %arg0, %c0_i32, %c0_i32_0 : i32, i32, i32
  }
}

</mosaic_0001>

<bundles_post_ra>
// kernel: tpu_custom_call.1
= control target key start
LH: loop header
LB: loop body
LE: loop exit
PB: predicated region body
PF: predicated region fallthrough
CT: control target
= control target key end

     0   :  { %s5474_s0 = inlined_call_operand.hbm [shape: f32[2,8,128], index: 0, kind: input, shape index: {}]   ;;  %s5475_s1 = inlined_call_operand.hbm [shape: f32[2,8,128], index: 1, kind: input, shape index: {}]   ;;  %s5476_s2 = inlined_call_operand.hbm [shape: f32[2,8,8], index: 2, kind: input, shape index: {}]   ;;  %s5477_s3 = inlined_call_operand.hbm [shape: f32[2,1,8], index: 3, kind: input, shape index: {}]   ;;  %s5478_s4 = inlined_call_operand.hbm [shape: f32[4,128,128], index: 4, kind: input, shape index: {}]   ;;  %s5479_s5 = inlined_call_operand.vmem [shape: f32[4,1,128], index: 5, kind: input, shape index: {}]   ;;  %s5480_s6 = inlined_call_operand.hbm [shape: f32[4,128,128], index: 6, kind: input, shape index: {}]   ;;  %s5481_s7 = inlined_call_operand.vmem [shape: f32[4,1,128], index: 7, kind: input, shape index: {}]   ;;  %s5482_s8 = inlined_call_operand.hbm [shape: f32[128,512], index: 8, kind: input, shape index: {}]   ;;  %s5483_s9 = inlined_call_operand.vmem [shape: f32[1,512], index: 9, kind: input, shape index: {}]   ;;  %s5484_s10 = inlined_call_operand.hbm [shape: f32[512,128], index: 10, kind: input, shape index: {}]   ;;  %s5485_s11 = inlined_call_operand.vmem [shape: f32[1,128], index: 11, kind: input, shape index: {}]   ;;  %s5486_s12 = inlined_call_operand.vmem [shape: f32[3,1,128], index: 12, kind: input, shape index: {}]   ;;  %s5487_s13 = inlined_call_operand.vmem [shape: f32[3,1,128], index: 13, kind: input, shape index: {}]   ;;  %s5488_s14 = inlined_call_operand.hbm [shape: f32[2,8,128], index: 14, kind: output, shape index: {}]  }
   0x1   :  { %5510 = sst [smem:[#allocation30_spill]] %s5475_s1 }
   0x2   :  { %5511 = sst [smem:[#allocation31_spill]] %s5478_s4 }
   0x3   :  { %5512 = sst [smem:[#allocation32_spill]] %s5480_s6 }
   0x4   :  { %5513 = sst [smem:[#allocation33_spill]] %s5481_s7 }
   0x5   :  { %5514 = sst [smem:[#allocation34_spill]] %s5482_s8 }
   0x6   :  { %5515 = sst [smem:[#allocation35_spill]] %s5483_s9 }
   0x7   :  { %5516 = sst [smem:[#allocation36_spill]] %s5485_s11 }
   0x8   :  { %5517 = sst [smem:[#allocation37_spill]] %s5486_s12 }
   0x9   :  { %5518 = sst [smem:[#allocation38_spill]] %s5487_s13 }
   0xa   :  { %5519 = sst [smem:[#allocation39_spill]] %s5488_s14 }
   0xb   :  { %19 = vsyncpa [#allocation3], 0 }
   0xc   :  { %21 = vsyncpa [#allocation3 + $0x1], 0 }
   0xd   :  { %22 = vsyncpa [#allocation6], 0 }
   0xe   :  { %24 = vsyncpa [#allocation6 + $0x1], 0 }
   0xf   :  { %25 = vsyncpa [#allocation9], 0 }
  0x10   :  { %27 = vsyncpa [#allocation9 + $0x1], 0 }
  0x11   :  { %28 = vsyncpa [#allocation12], 0 }
  0x12   :  { %29 = vsyncpa [#allocation15], 0 }
  0x13   :  { %30 = vsyncpa [#allocation4], 0 }
  0x14   :  { %32 = vsyncpa [#allocation4 + $0x1], 0  ;;  %s4741_s29 = smov 0   ;;  %s4743_s30 = smov 0  }
  0x15   :  { %s4745_s15 = smov 0   ;;  %s4747_s16 = smov 0  }
  0x16 LB: > { %5520 = sst [smem:[#allocation24_spill]] %s4633_s29  ;;  %s4762_s17 = sadd.s32 4294967295, %s4645_s16   ;;  %s4645_s16 = sphi %s4747_s16, %s5563_s16   ;;  %s4641_s15 = sphi %s4745_s15, %s5565_s15   ;;  %s4637_s30 = sphi %s4743_s30, %s5567_s30   ;;  %s4633_s29 = sphi %s4741_s29, %s5566_s29  }
  0x17   : > { %5521 = sst [smem:[#allocation25_spill]] %s4641_s15  ;;  %s3515_s18 = sadd.s32 4294967294, %s4645_s16  }
  0x18   : > { %p58_p0 = scmp.ne.s32.totalorder %s4637_s30, %s4633_s29  ;;  %p5499_p1 = scmp.eq.s32.totalorder %s4762_s17, 0 }
  0x19   : > { %p370_p2 = scmp.eq.s32.totalorder %s4762_s17, 1  ;;  %p376_p3 = scmp.eq.s32.totalorder %s3515_s18, 1 }
  0x1a   : > { %p4771_p4 = por %p5499_p1, %p58_p0  ;;  %p3516_p5 = scmp.ge.s32.totalorder %s4645_s16, 1 }
  0x1b   : > { %p4776_p6 = por %p376_p3, %p58_p0  ;;  %p383_p7 = scmp.lt.s32.totalorder %s4645_s16, 3 }
  0x1c   : > { %s5522_s19 = scalar_select %p4771_p4, 1, 0 }
  0x1d   : > { %s5523_s20 = scalar_select %p4776_p6, 1, 0 }
  0x1e   : > { %p4781_p8 = pnand %p3516_p5, %p383_p7  ;;  %s4647_s22 = smov [#allocation10]  }
  0x1f   : > { %5524 = sst [smem:[#allocation26_spill]] %s5523_s20  ;;  %s395_s23 = sshll.u32 %s4647_s22, 4  ;;  %s396_s23 = int_to_ptr.vmem [resolvable:$true] %s395_s23 }
  0x20   : > { %s5525_s21 = scalar_select %p4781_p8, 1, 0 }
  0x21   : > { %p4215_p9 = pneg %p4781_p8  ;;  %s4648_s25 = smov [#allocation11]  }
  0x22   : > { %s411_s26 = sshll.u32 %s4648_s25, 4  ;;  %s4356_s27 = scalar_lea.vmem %s396_s23, 8192  ;;  %s412_s26 = int_to_ptr.vmem [resolvable:$true] %s411_s26 }
  0x23   : > { %p4790_p11 = pnand %p4215_p9, %p5499_p1  ;;  %p4357_p13 = scmp.ne.s32.totalorder %s396_s23, %s4356_s27 }
  0x24   : > { %p4364_p5 = scmp.lt.s32.totalorder %s396_s23, %s396_s23  ;;  %p4365_p7 = scmp.lt.s32.totalorder %s4356_s27, %s4356_s27 }
  0x25   : > { %s5526_s24 = scalar_select %p4790_p11, 1, 0 }
  0x26   : > { %p5500_p12 = pneg %p4790_p11  ;;  %p4366_p10 = por %p4365_p7, %p4364_p5 }
  0x28   : > { %p4359_p0 = pnand %p4357_p13, %p5500_p12 }
  0x2a   : > { %p4360_p3 = pneg %p4359_p0 }
  0x2c   : > { %p4367_p9 = pnand %p4366_p10, %p4360_p3 }
  0x2e   : > { %4370 = shalt.err (!%p4367_p9)
}
  0x2f   : > { %s5491_s28 = smov 128   ;;  %s5492_s18 = smov 8  }
  0x30   : > { %s5527_s4 = sld [smem:[#allocation31_spill]]  ;;  %s4382_s20 = scalar_lea.vmem %s412_s26, 8192 }
  0x31   : > { %p4383_p13 = scmp.ne.s32.totalorder %s412_s26, %s4382_s20  ;;  %p4390_p10 = scmp.lt.s32.totalorder %s412_s26, %s412_s26 }
  0x32   : > { %p4391_p3 = scmp.lt.s32.totalorder %s4382_s20, %s4382_s20 }
  0x33   : > { %p4385_p0 = pnand %p4383_p13, %p5500_p12 }
  0x34   : > { %p4392_p7 = por %p4391_p3, %p4390_p10 }
  0x35   : > { %p4386_p5 = pneg %p4385_p0 }
  0x36   : > { %4218 = dma.hbm_to_vmem [thread:$0]  (!%p4790_p11), %s5527_s4, 8192, %s396_s23, [#allocation9], %s5491_s28, %s5491_s28, %s5492_s18  }
  0x37   : > { %p4393_p9 = pnand %p4392_p7, %p4386_p5 }
  0x39   : > { %4396 = shalt.err (!%p4393_p9)
}
  0x3a   : > { %s5528_s6 = sld [smem:[#allocation32_spill]]  ;;  %s4819_s20 = sadd.s32 1, %s4645_s16  }
  0x3b   : > { %5529 = sst [smem:[#allocation27_spill]] %s4819_s20  ;;  %s45_s23 = sadd.s32 1, %s4641_s15 }
  0x3c   : > { %s42_s22 = ssub.s32 %s4645_s16, %s4819_s20  ;;  %p52_p13 = scmp.ne.s32.totalorder %s4641_s15, %s4637_s30 }
  0x3d   : > { %p43_p0 = scmp.eq.s32.totalorder %s42_s22, 0  ;;  %p53_p5 = scmp.eq.s32.totalorder %s4645_s16, 0 }
  0x3e   : > { %p4829_p10 = por %p370_p2, %p52_p13  ;;  %p4249_p3 = scmp.lt.s32.totalorder %s4645_s16, 2 }
  0x3f   : > { %s4835_s25 = scalar_select %p43_p0, %s4641_s15, %s45_s23  }
  0x40   : > { %4221 = dma.hbm_to_vmem [thread:$0]  (!%p4790_p11), %s5528_s6, 8192, %s412_s26, [#allocation12], %s5491_s28, %s5491_s28, %s5492_s18  }
  0x41   : > { %s5530_s29 = scalar_select %p4829_p10, 1, 0 }
  0x42   : > { %5532 = sst [smem:[#allocation29_spill]] %s4835_s25  ;;  %p54_p7 = por %p53_p5, %p52_p13 }
  0x43   : > { %5531 = sst [smem:[#allocation28_spill]] %s5530_s29  ;;  %s4838_s27 = sand.u32 1, %s4641_s15  }
  0x44   : > { %s4841_s26 = sshll.u32 %s4838_s27, 3  ;;  %s4844_s28 = sshll.u32 %s4645_s16, 7 }
  0x45   : > { %p4846_p9 = pnand %p4249_p3, %p54_p7  ;;  %s5501_s18 = sand.u32 1, %s4645_s16  }
  0x46   : > { %s5534_s1 = sld [smem:[#allocation30_spill]]  ;;  %s488_s25 = scalar_lea.vmem [#allocation5], %s4841_s26 }
  0x47   : > { %s495_s15 = sshll.u32 %s488_s25, 4  ;;  %s4860_s20 = scalar_lea.sflag [#allocation6], %s5501_s18  ;;  %s496_s15 = int_to_ptr.vmem [resolvable:$true] %s495_s15 }
  0x48   : > { %p4866_p13 = pneg %p4846_p9 }
  0x4c   : > { %s4855_s23 = scalar_lea.hbm %s5534_s1, %s4844_s28  ;;  %s4402_s11 = scalar_lea.hbm %s5534_s1, 256 }
  0x4d   : > { %s4397_s14 = scalar_lea.hbm %s4855_s23, 128  ;;  %p4403_p3 = scmp.lt.s32.totalorder %s4855_s23, %s5534_s1 }
  0x4e   : > { %p4398_p2 = scmp.ne.s32.totalorder %s4855_s23, %s4397_s14  ;;  %p4404_p7 = scmp.lt.s32.totalorder %s4402_s11, %s4397_s14 }
  0x50   : > { %p4400_p0 = pnand %p4866_p13, %p4398_p2  ;;  %p4405_p1 = por %p4404_p7, %p4403_p3 }
  0x52   : > { %p4401_p5 = pneg %p4400_p0 }
  0x54   : > { %p4406_p12 = pnand %p4405_p1, %p4401_p5 }
  0x56   : > { %4409 = shalt.err (!%p4406_p12)
}
  0x57   : > { %s4410_s18 = scalar_lea.vmem %s496_s15, 128  ;;  %s4651_s7 = smov [#allocation5]  }
  0x58   : > { %p4411_p6 = scmp.ne.s32.totalorder %s496_s15, %s4410_s18  ;;  %s4415_s13 = sshll.u32 %s4651_s7, 4  ;;  %s4416_s13 = int_to_ptr.vmem [resolvable:$false] %s4415_s13 }
  0x59   : > { %s4417_s12 = scalar_lea.vmem %s4416_s13, 256  ;;  %p4418_p2 = scmp.lt.s32.totalorder %s496_s15, %s4416_s13 }
  0x5a   : > { %p4413_p10 = pnand %p4411_p6, %p4866_p13  ;;  %p4419_p0 = scmp.lt.s32.totalorder %s4417_s12, %s4410_s18 }
  0x5c   : > { %p4414_p4 = pneg %p4413_p10  ;;  %p4420_p8 = por %p4419_p0, %p4418_p2 }
  0x5e   : > { %p4421_p11 = pnand %p4420_p8, %p4414_p4 }
  0x60   : > { %4424 = shalt.err (!%p4421_p11)
}
  0x61   : > { %4234 = dma.hbm_to_vmem [thread:$0]  (!%p4846_p9), %s4855_s23, 128, %s496_s15, %s4860_s20  }
  0x62   : > { %s4652_s9 = smov [#allocation13]   ;;  %p5536_p6 = scmp.ne.s32.totalorder %s5526_s24, 0 }
  0x63   : > { %s427_s11 = sshll.u32 %s4652_s9, 4  ;;  %s428_s11 = int_to_ptr.vmem [resolvable:$true] %s427_s11 }
  0x64   : > { %s4436_s14 = scalar_lea.vmem %s428_s11, 8192  ;;  %p5537_p12 = pneg %p5536_p6 }
  0x65   : > { %p4437_p1 = scmp.ne.s32.totalorder %s428_s11, %s4436_s14  ;;  %p4444_p3 = scmp.lt.s32.totalorder %s428_s11, %s428_s11 }
  0x66   : > { %p4445_p7 = scmp.lt.s32.totalorder %s4436_s14, %s4436_s14 }
  0x67   : > { %p4439_p10 = pnand %p4437_p1, %p5537_p12 }
  0x68   : > { %p4446_p2 = por %p4445_p7, %p4444_p3 }
  0x69   : > { %p4440_p5 = pneg %p4439_p10 }
  0x6b   : > { %p4447_p4 = pnand %p4446_p2, %p4440_p5 }
  0x6d   : > { %4450 = shalt.err (!%p4447_p4)
}
  0x6e   : > { %s4653_s7 = smov 512   ;;  %s4654_s12 = smov 32  }
  0x6f   : > { %s5538_s8 = sld [smem:[#allocation34_spill]]  ;;  %s4655_s18 = smov [#allocation14]  }
  0x70   : > { %s443_s23 = sshll.u32 %s4655_s18, 4  ;;  %s4897_s25 = scalar_lea.hbm %s5474_s0, %s4844_s28  ;;  %s444_s23 = int_to_ptr.vmem [resolvable:$true] %s443_s23 }
  0x71   : > { %s4462_s9 = scalar_lea.vmem %s444_s23, 8192  ;;  %p5539_p11 = pmov %p5537_p12 }
  0x72   : > { %p4463_p8 = scmp.ne.s32.totalorder %s444_s23, %s4462_s9  ;;  %p4470_p12 = scmp.lt.s32.totalorder %s444_s23, %s444_s23 }
  0x73   : > { %p4471_p10 = scmp.lt.s32.totalorder %s4462_s9, %s4462_s9 }
  0x74   : > { %p4465_p0 = pnand %p4463_p8, %p5539_p11 }
  0x75   : > { %4224 = dma.hbm_to_vmem [thread:$0]  (!%p5536_p6), %s5538_s8, 8192, %s428_s11, [#allocation12], %s4653_s7, %s4653_s7, %s4654_s12  }
  0x76   : > { %p4466_p1 = pneg %p4465_p0  ;;  %p4472_p5 = por %p4471_p10, %p4470_p12 }
  0x78   : > { %p4473_p3 = pnand %p4472_p5, %p4466_p1 }
  0x7a   : > { %4476 = shalt.err (!%p4473_p3)
}
  0x7b   : > { %s5540_s11 = smov 8   ;;  %s5541_s14 = smov 128  }
  0x7c   : > { %4227 = dma.hbm_to_vmem [thread:$0]  (!%p5536_p6), %s5484_s10, 8192, %s444_s23, [#allocation15], %s5541_s14, %s5541_s14, %s5540_s11  }
  0x7d   : > { %s470_s13 = scalar_lea.vmem [#allocation2], %s4841_s26  ;;  %s4915_s24 = scalar_lea.hbm %s5476_s2, %s4844_s28 }
  0x7e   : > { %s477_s15 = sshll.u32 %s470_s13, 4  ;;  %s467_s6 = scalar_lea.sflag [#allocation3], %s4838_s27  ;;  %s478_s15 = int_to_ptr.vmem [resolvable:$true] %s477_s15 }
  0x7f   : > { %s4477_s9 = scalar_lea.hbm %s4897_s25, 128  ;;  %s4482_s1 = scalar_lea.hbm %s5474_s0, 256 }
  0x80   : > { %p4478_p7 = scmp.ne.s32.totalorder %s4897_s25, %s4477_s9  ;;  %p4483_p6 = scmp.lt.s32.totalorder %s4897_s25, %s5474_s0 }
  0x81   : > { %p4484_p8 = scmp.lt.s32.totalorder %s4482_s1, %s4477_s9 }
  0x82   : > { %p4480_p2 = pnand %p4478_p7, %p4866_p13 }
  0x83   : > { %p4485_p11 = por %p4484_p8, %p4483_p6 }
  0x84   : > { %p4481_p4 = pneg %p4480_p2 }
  0x86   : > { %p4486_p0 = pnand %p4485_p11, %p4481_p4 }
  0x88   : > { %4489 = shalt.err (!%p4486_p0)
}
  0x89   : > { %s4490_s28 = scalar_lea.vmem %s478_s15, 128  ;;  %s4656_s11 = smov [#allocation2]  }
  0x8a   : > { %p4491_p1 = scmp.ne.s32.totalorder %s478_s15, %s4490_s28  ;;  %s4495_s14 = sshll.u32 %s4656_s11, 4  ;;  %s4496_s14 = int_to_ptr.vmem [resolvable:$false] %s4495_s14 }
  0x8b   : > { %s4497_s13 = scalar_lea.vmem %s4496_s14, 256  ;;  %p4498_p5 = scmp.lt.s32.totalorder %s478_s15, %s4496_s14 }
  0x8c   : > { %p4493_p12 = pnand %p4491_p1, %p4866_p13  ;;  %p4499_p3 = scmp.lt.s32.totalorder %s4497_s13, %s4490_s28 }
  0x8e   : > { %p4494_p10 = pneg %p4493_p12  ;;  %p4500_p7 = por %p4499_p3, %p4498_p5 }
  0x90   : > { %p4501_p2 = pnand %p4500_p7, %p4494_p10 }
  0x92   : > { %4504 = shalt.err (!%p4501_p2)
}
  0x93   : > { %4231 = dma.hbm_to_vmem [thread:$0]  (!%p4846_p9), %s4897_s25, 128, %s478_s15, %s467_s6  }
  0x94   : > { %s506_s1 = scalar_lea.vmem [#allocation7], %s4841_s26  ;;  %s3528_s18 = sshll.u32 %s4645_s16, 4 }
  0x95   : > { %s513_s8 = sshll.u32 %s506_s1, 4  ;;  %s4505_s4 = scalar_lea.hbm %s4915_s24, 128  ;;  %s514_s8 = int_to_ptr.vmem [resolvable:$true] %s513_s8 }
  0x96   : > { %p4506_p4 = scmp.ne.s32.totalorder %s4915_s24, %s4505_s4  ;;  %s4510_s12 = scalar_lea.hbm %s5476_s2, 256 }
  0x97   : > { %p4511_p11 = scmp.lt.s32.totalorder %s4915_s24, %s5476_s2  ;;  %p4512_p0 = scmp.lt.s32.totalorder %s4510_s12, %s4505_s4 }
  0x98   : > { %p4508_p6 = pnand %p4506_p4, %p4866_p13 }
  0x99   : > { %p4513_p1 = por %p4512_p0, %p4511_p11 }
  0x9a   : > { %p4509_p8 = pneg %p4508_p6 }
  0x9c   : > { %p4514_p12 = pnand %p4513_p1, %p4509_p8 }
  0x9e   : > { %4517 = shalt.err (!%p4514_p12)
}
  0x9f   : > { %s4518_s26 = scalar_lea.vmem %s514_s8, 128  ;;  %s4657_s25 = smov [#allocation7]  }
  0xa0   : > { %p4519_p10 = scmp.ne.s32.totalorder %s514_s8, %s4518_s26  ;;  %s4523_s15 = sshll.u32 %s4657_s25, 4  ;;  %s4524_s15 = int_to_ptr.vmem [resolvable:$false] %s4523_s15 }
  0xa1   : > { %s4525_s6 = scalar_lea.vmem %s4524_s15, 256  ;;  %p4526_p7 = scmp.lt.s32.totalorder %s514_s8, %s4524_s15 }
  0xa2   : > { %p4521_p5 = pnand %p4519_p10, %p4866_p13  ;;  %p4527_p2 = scmp.lt.s32.totalorder %s4525_s6, %s4518_s26 }
  0xa4   : > { %p4522_p3 = pneg %p4521_p5  ;;  %p4528_p4 = por %p4527_p2, %p4526_p7 }
  0xa6   : > { %p4529_p6 = pnand %p4528_p4, %p4522_p3 }
  0xa8   : > { %4532 = shalt.err (!%p4529_p6)
}
  0xa9   : > { %4237 = dma.hbm_to_vmem [thread:$0]  (!%p4846_p9), %s4915_s24, 128, %s514_s8, %s4860_s20  }
  0xaa   : > { %s4956_s13 = scalar_lea.hbm %s5477_s3, %s3528_s18  ;;  %s523_s1 = scalar_lea.vmem [#allocation8], %s4838_s27 }
  0xab   : > { %s530_s4 = sshll.u32 %s523_s1, 4  ;;  %s5542_s9 = sand.u32 1, %s4645_s16   ;;  %s531_s4 = int_to_ptr.vmem [resolvable:$true] %s530_s4 }
  0xac   : > { %s521_s7 = scalar_lea.sflag [#allocation9], %s5542_s9  ;;  %s4533_s12 = scalar_lea.hbm %s4956_s13, 16 }
  0xad   : > { %p4534_p8 = scmp.ne.s32.totalorder %s4956_s13, %s4533_s12  ;;  %s4538_s24 = scalar_lea.hbm %s5477_s3, 32 }
  0xae   : > { %p4539_p1 = scmp.lt.s32.totalorder %s4956_s13, %s5477_s3  ;;  %p4540_p12 = scmp.lt.s32.totalorder %s4538_s24, %s4533_s12 }
  0xaf   : > { %p4536_p11 = pnand %p4534_p8, %p4866_p13 }
  0xb0   : > { %p4541_p10 = por %p4540_p12, %p4539_p1 }
  0xb1   : > { %p4537_p0 = pneg %p4536_p11 }
  0xb3   : > { %p4542_p5 = pnand %p4541_p10, %p4537_p0 }
  0xb5   : > { %4545 = shalt.err (!%p4542_p5)
}
  0xb6   : > { %s4546_s27 = scalar_lea.vmem %s531_s4, 16  ;;  %s4658_s28 = smov [#allocation8]  }
  0xb7   : > { %p4547_p3 = scmp.ne.s32.totalorder %s531_s4, %s4546_s27  ;;  %s4551_s26 = sshll.u32 %s4658_s28, 4  ;;  %s4552_s26 = int_to_ptr.vmem [resolvable:$false] %s4551_s26 }
  0xb8   : > { %s4553_s25 = scalar_lea.vmem %s4552_s26, 32  ;;  %p4554_p4 = scmp.lt.s32.totalorder %s531_s4, %s4552_s26 }
  0xb9   : > { %p4549_p7 = pnand %p4547_p3, %p4866_p13  ;;  %p4555_p6 = scmp.lt.s32.totalorder %s4553_s25, %s4546_s27 }
  0xbb   : > { %p4550_p2 = pneg %p4549_p7  ;;  %p4556_p8 = por %p4555_p6, %p4554_p4 }
  0xbd   : > { %p4557_p11 = pnand %p4556_p8, %p4550_p2 }
  0xbf   : > { %4560 = shalt.err (!%p4557_p11)
}
  0xc0   : > { %4240 = dma.hbm_to_vmem [thread:$0]  (!%p4846_p9), %s4956_s13, 16, %s531_s4, %s521_s7  }
  0xc1   : > { %p5543_p0 = scmp.ne.s32.totalorder %s5525_s21, 0 }
  0xc2   : > { %s4980_s29 = sand.u32 (!%p5543_p0), 1, %s4637_s30   ;;  %p5544_p13 = scmp.ne.s32.totalorder (!%p5543_p0), %s5522_s19, 0 }
  0xc3   : > { %539 = sbr.rel (%p5543_p0) target bundleno = 7132 (0x1bdc), region = 76  ;;  %s4983_s15 = sshll.u32 (!%p5543_p0), %s4980_s29, 3 }
  0xc4   : > { %s542_s6 = scalar_lea.sflag (!%p5543_p0), [#allocation3], %s4980_s29  ;;  %s545_s11 = scalar_lea.vmem (!%p5543_p0), [#allocation2], %s4983_s15 }
  0xc8   : > { %4604 = dma.done.wait (%p5544_p13), %s542_s6, 128  }
  0xc9   : > { %4606 = vsyncadd (%p5544_p13), %s542_s6, 4294967168  ;;  %s550_s21 = sand.u32 1, %s4762_s17   ;;  %s554_s14 = scalar_lea.vmem [#allocation5], %s4983_s15 }
  0xca   : > { %s551_s22 = scalar_lea.sflag [#allocation6], %s550_s21 }
  0xcb   : > { %4608 = dma.done.wait (%p5544_p13), %s551_s22, 256  }
  0xcc   : > { %4610 = vsyncadd (%p5544_p13), %s551_s22, 4294967040  ;;  %s563_s13 = scalar_lea.vmem [#allocation7], %s4983_s15  ;;  %s569_s1 = scalar_lea.sflag [#allocation9], %s550_s21 }
  0xcd   : > { %s571_s4 = scalar_lea.vmem [#allocation8], %s4980_s29 }
  0xce   : > { %4612 = dma.done.wait (%p5544_p13), %s569_s1, 16  }
  0xcf   : > { %4614 = vsyncadd (%p5544_p13), %s569_s1, 4294967280  ;;  %p5545_p9 = scmp.eq.s32.totalorder %s4762_s17, 0 }
  0xd1   : > { %4616 = dma.done.wait (%p5545_p9), [#allocation9], 8192   ;;  %p5546_p1 = pmov %p5545_p9 }
  0xd3   : > { %4618 = vsyncadd (%p5546_p1), [#allocation9], 4294959104  ;;  %p5547_p12 = pmov %p5546_p1 }
  0xd4   : > { %p5548_p10 = pmov %p5546_p1 }
  0xd5   : > { %4620 = dma.done.wait (%p5547_p12), [#allocation12], 16384  }
  0xd6   : > { %4622 = vsyncadd (%p5548_p10), [#allocation12], 4294950912  ;;  %p5549_p5 = pmov %p5546_p1 }
  0xd7   : > { %p5550_p3 = pmov %p5546_p1 }
  0xd8   : > { %4624 = dma.done.wait (%p5549_p5), [#allocation15], 8192  }
  0xd9   : > { %4626 = vsyncadd (%p5550_p3), [#allocation15], 4294959104  ;;  %v4659_v0 = vmov 0.0   ;;  %vm4660_vm0 = vmmov 0   ;;  %v682_v1 = vld [vmem:[#allocation10 + $0xf8] sm:$0xff]  ;;  %v681_v3 = vld [vmem:[#allocation10 + $0xf0] sm:$0xff] }
  0xda   : > { %3864 = vmatprep.subr.mxu1 %v4659_v0  ;;  %3829 = vmatprep.subr.mxu0 %v4659_v0  ;;  %v665_v2 = vld [vmem:[#allocation10 + $0x78] sm:$0xff]  ;;  %v664_v4 = vld [vmem:[#allocation10 + $0x70] sm:$0xff]  ;;  %v680_v5 = vld [vmem:[#allocation10 + $0xe8] sm:$0xff]  ;;  %vm950_vm1 = vcmask 261120   ;;  %s4661_s23 = smov 96   ;;  %vm1030_vm3 = vcmask 64512  }
  0xdb   : > { %3896 = vmatprep.mubr.msk.f32.mxu1 %vm4660_vm0, %v4659_v0  ;;  %3861 = vmatprep.mubr.msk.f32.mxu0 %vm4660_vm0, %v4659_v0  ;;  %v663_v6 = vld [vmem:[#allocation10 + $0x68] sm:$0xff]  ;;  %v679_v7 = vld [vmem:[#allocation10 + $0xe0] sm:$0xff]  ;;  %v678_v9 = vld [vmem:[#allocation10 + $0xd8] sm:$0xff]  ;;  %s4662_s8 = smov 64   ;;  %s4663_s18 = smov 32   ;;  %vm1630_vm4 = vcmask 523264  }
  0xdc   : > { %3865 = vmatpush3.msra.mxu1 %v682_v1  ;;  %3830 = vmatpush3.msra.mxu0 %v665_v2  ;;  %v662_v8 = vld [vmem:[#allocation10 + $0x60] sm:$0xff]  ;;  %v661_v10 = vld [vmem:[#allocation10 + $0x58] sm:$0xff]  ;;  %v677_v11 = vld [vmem:[#allocation10 + $0xd0] sm:$0xff]  ;;  %vm1632_vm5 = vcmask 785408   ;;  %s5551_s6 = sld [smem:[#allocation37_spill]]  ;;  %s3588_s12 = sshll.u32 %s4762_s17, 7 }
  0xdd   : > { %3866 = vmatprep.subr.mxu1 %v4659_v0  ;;  %3831 = vmatprep.subr.mxu0 %v4659_v0  ;;  %v660_v12 = vld [vmem:[#allocation10 + $0x50] sm:$0xff]  ;;  %v676_v13 = vld [vmem:[#allocation10 + $0xc8] sm:$0xff]  ;;  %v675_v15 = vld [vmem:[#allocation10 + $0xc0] sm:$0xff]  ;;  %s5552_s22 = sld [smem:[#allocation38_spill]]  ;;  %s3331_s27 = scalar_lea.sflag [#allocation4], %s4980_s29 }
  0xde   : > { %3867 = vmatpush3.msra.mxu1 %v681_v3  ;;  %3832 = vmatpush3.msra.mxu0 %v664_v4  ;;  %v659_v14 = vld [vmem:[#allocation10 + $0x48] sm:$0xff]  ;;  %v658_v16 = vld [vmem:[#allocation10 + $0x40] sm:$0xff]  ;;  %v674_v17 = vld [vmem:[#allocation10 + $0xb8] sm:$0xff]  ;;  %s5553_s1 = sld [smem:[#allocation33_spill]] }
  0xdf   : > { %3868 = vmatprep.subr.mxu1 %v4659_v0  ;;  %3833 = vmatprep.subr.mxu0 %v4659_v0  ;;  %v657_v18 = vld [vmem:[#allocation10 + $0x38] sm:$0xff]  ;;  %v673_v19 = vld [vmem:[#allocation10 + $0xb0] sm:$0xff]  ;;  %v672_v21 = vld [vmem:[#allocation10 + $0xa8] sm:$0xff]  ;;  %s5554_s26 = sld [smem:[#allocation35_spill]] }
  0xe0   : > { %3869 = vmatpush3.msra.mxu1 %v680_v5  ;;  %3834 = vmatpush3.msra.mxu0 %v663_v6  ;;  %v656_v20 = vld [vmem:[#allocation10 + $0x30] sm:$0xff]  ;;  %v655_v22 = vld [vmem:[#allocation10 + $0x28] sm:$0xff]  ;;  %v671_v23 = vld [vmem:[#allocation10 + $0xa0] sm:$0xff]  ;;  %s5555_s21 = sld [smem:[#allocation36_spill]] }
  0xe1   : > { %3870 = vmatprep.subr.mxu1 %v4659_v0  ;;  %3835 = vmatprep.subr.mxu0 %v4659_v0  ;;  %v654_v24 = vld [vmem:[#allocation10 + $0x20] sm:$0xff]  ;;  %v670_v25 = vld [vmem:[#allocation10 + $0x98] sm:$0xff]  ;;  %v669_v27 = vld [vmem:[#allocation10 + $0x90] sm:$0xff]  ;;  %s5556_s19 = sld [smem:[#allocation28_spill]] }
  0xe2   : > { %3871 = vmatpush3.msra.mxu1 %v679_v7  ;;  %3836 = vmatpush3.msra.mxu0 %v662_v8  ;;  %v653_v26 = vld [vmem:[#allocation10 + $0x18] sm:$0xff]  ;;  %v652_v28 = vld [vmem:[#allocation10 + $0x10] sm:$0xff]  ;;  %v668_v29 = vld [vmem:[#allocation10 + $0x88] sm:$0xff] }
  0xe3   : > { %3872 = vmatprep.subr.mxu1 %v4659_v0  ;;  %3837 = vmatprep.subr.mxu0 %v4659_v0  ;;  %v651_v30 = vld [vmem:[#allocation10 + $0x8] sm:$0xff]  ;;  %v667_v31 = vld [vmem:[#allocation10 + $0x80] sm:$0xff]  ;;  %v699_v42 = vld [vmem:[#allocation10 + $0x178] sm:$0xff] }
  0xe4   : > { %3873 = vmatpush3.msra.mxu1 %v678_v9  ;;  %3838 = vmatpush3.msra.mxu0 %v661_v10  ;;  %v650_v32 = vld [vmem:[#allocation10] sm:$0xff]  ;;  %v5051_v33 = vld [vmem:[%s545_s11] sm:$0xff] }
  0xe5   : > { %3874 = vmatprep.subr.mxu1 %v4659_v0  ;;  %3839 = vmatprep.subr.mxu0 %v4659_v0  ;;  %v3540_v34 = vld [vmem:[%s5479_s5 + $0x1] ss:$0 sm:$0xff]  ;;  %v3538_v35 = vld [vmem:[%s5479_s5] ss:$0 sm:$0xff]  ;;  %v698_v43 = vld [vmem:[#allocation10 + $0x170] sm:$0xff] }
  0xe6   : > { %3875 = vmatpush3.msra.mxu1 %v677_v11  ;;  %3840 = vmatpush3.msra.mxu0 %v660_v12  ;;  %v697_v44 = vld [vmem:[#allocation10 + $0x168] sm:$0xff]  ;;  %v696_v45 = vld [vmem:[#allocation10 + $0x160] sm:$0xff]  ;;  %v695_v46 = vld [vmem:[#allocation10 + $0x158] sm:$0xff] }
  0xe7   : > { %3876 = vmatprep.subr.mxu1 %v4659_v0  ;;  %3841 = vmatprep.subr.mxu0 %v4659_v0  ;;  %v694_v47 = vld [vmem:[#allocation10 + $0x150] sm:$0xff]  ;;  %v693_v48 = vld [vmem:[#allocation10 + $0x148] sm:$0xff]  ;;  %v692_v49 = vld [vmem:[#allocation10 + $0x140] sm:$0xff]  ;;  %p5558_p2 = scmp.ne.s32.totalorder %s5556_s19, 0 }
  0xe8   : > { %3877 = vmatpush3.msra.mxu1 %v676_v13  ;;  %3842 = vmatpush3.msra.mxu0 %v659_v14  ;;  %v691_v50 = vld [vmem:[#allocation10 + $0x138] sm:$0xff]  ;;  %v690_v51 = vld [vmem:[#allocation10 + $0x130] sm:$0xff]  ;;  %v689_v52 = vld [vmem:[#allocation10 + $0x128] sm:$0xff] }
  0xe9   : > { %3878 = vmatprep.subr.mxu1 %v4659_v0  ;;  %3843 = vmatprep.subr.mxu0 %v4659_v0  ;;  %v688_v53 = vld [vmem:[#allocation10 + $0x120] sm:$0xff]  ;;  %v687_v54 = vld [vmem:[#allocation10 + $0x118] sm:$0xff]  ;;  %v686_v55 = vld [vmem:[#allocation10 + $0x110] sm:$0xff] }
  0xea   : > { %3879 = vmatpush3.msra.mxu1 %v675_v15  ;;  %3844 = vmatpush3.msra.mxu0 %v658_v16  ;;  %v685_v56 = vld [vmem:[#allocation10 + $0x108] sm:$0xff]  ;;  %v684_v57 = vld [vmem:[#allocation10 + $0x100] sm:$0xff]  ;;  %v3542_v6 = vld [vmem:[%s5479_s5 + $0x2] ss:$0 sm:$0xff] }
  0xeb   : > { %3880 = vmatprep.subr.mxu1 %v4659_v0  ;;  %3845 = vmatprep.subr.mxu0 %v4659_v0  ;;  %v5105_v58 = vld [vmem:[%s563_s13] sm:$0xff] }
  0xec   : > { %3881 = vmatpush3.msra.mxu1 %v674_v17  ;;  %3846 = vmatpush3.msra.mxu0 %v657_v18  ;;  %vm1028_vm2 = vcmp.eq.f32.partialorder %v5105_v58, 0.0 }
  0xed   : > { %3882 = vmatprep.subr.mxu1 %v4659_v0  ;;  %3847 = vmatprep.subr.mxu0 %v4659_v0 }
  0xee   : > { %3883 = vmatpush3.msra.mxu1 %v673_v19  ;;  %3848 = vmatpush3.msra.mxu0 %v656_v20 }
  0xef   : > { %3884 = vmatprep.subr.mxu1 %v4659_v0  ;;  %3849 = vmatprep.subr.mxu0 %v4659_v0 }
  0xf0   : > { %3885 = vmatpush3.msra.mxu1 %v672_v21  ;;  %3850 = vmatpush3.msra.mxu0 %v655_v22 }
  0xf1   : > { %3886 = vmatprep.subr.mxu1 %v4659_v0  ;;  %3851 = vmatprep.subr.mxu0 %v4659_v0 }
  0xf2   : > { %3887 = vmatpush3.msra.mxu1 %v671_v23  ;;  %3852 = vmatpush3.msra.mxu0 %v654_v24 }
  0xf3   : > { %3888 = vmatprep.subr.mxu1 %v4659_v0  ;;  %3853 = vmatprep.subr.mxu0 %v4659_v0 }
  0xf4   : > { %3889 = vmatpush3.msra.mxu1 %v670_v25  ;;  %3854 = vmatpush3.msra.mxu0 %v653_v26 }
  0xf5   : > { %3890 = vmatprep.subr.mxu1 %v4659_v0  ;;  %3855 = vmatprep.subr.mxu0 %v4659_v0 }
  0xf6   : > { %3891 = vmatpush3.msra.mxu1 %v669_v27  ;;  %3856 = vmatpush3.msra.mxu0 %v652_v28 }
  0xf7   : > { %3892 = vmatprep.subr.mxu1 %v4659_v0  ;;  %3857 = vmatprep.subr.mxu0 %v4659_v0 }
  0xf8   : > { %3893 = vmatpush3.msra.mxu1 %v668_v29  ;;  %3858 = vmatpush3.msra.mxu0 %v651_v30 }
  0xf9   : > { %3894 = vmatprep.subr.mxu1 %v4659_v0  ;;  %3859 = vmatprep.subr.mxu0 %v4659_v0 }
  0xfa   : > { %3895 = vmatpush3.msra.mxu1 %v667_v31  ;;  %3860 = vmatpush3.msra.mxu0 %v650_v32 }
  0xfb   : > { %3897 = vmatmul.mubr.f32.vlgmr.msra.gmra.mxu1 %v5051_v33  ;;  %3862 = vmatmul.mubr.f32.vlgmr.msra.gmra.mxu0 %v5051_v33 }
  0xfc   : > { %3934 = vmatprep.subr.mxu1 %v4659_v0  ;;  %3936 = vmatprep.mubr.msk.f32.mxu1 %vm4660_vm0, %v4659_v0 }
  0xfd   : > { %3899 = vmatprep.subr.mxu0 %v4659_v0  ;;  %3931 = vmatprep.mubr.msk.f32.mxu0 %vm4660_vm0, %v4659_v0 }
  0xfe   : > { %3900 = vmatpush3.msra.mxu0 %v699_v42 }
  0xff   : > { %3901 = vmatprep.subr.mxu0 %v4659_v0 }
 0x100   : > { %3902 = vmatpush3.msra.mxu0 %v698_v43 }
 0x101   : > { %3903 = vmatprep.subr.mxu0 %v4659_v0 }
 0x102   : > { %3904 = vmatpush3.msra.mxu0 %v697_v44 }
 0x103   : > { %3905 = vmatprep.subr.mxu0 %v4659_v0 }
 0x104   : > { %3906 = vmatpush3.msra.mxu0 %v696_v45 }
 0x105   : > { %3907 = vmatprep.subr.mxu0 %v4659_v0 }
 0x106   : > { %3908 = vmatpush3.msra.mxu0 %v695_v46 }
 0x107   : > { %3909 = vmatprep.subr.mxu0 %v4659_v0 }
 0x108   : > { %3910 = vmatpush3.msra.mxu0 %v694_v47 }
 0x109   : > { %3911 = vmatprep.subr.mxu0 %v4659_v0 }
 0x10a   : > { %3912 = vmatpush3.msra.mxu0 %v693_v48 }
 0x10b   : > { %3913 = vmatprep.subr.mxu0 %v4659_v0 }
 0x10c   : > { %3914 = vmatpush3.msra.mxu0 %v692_v49 }
 0x10d   : > { %3915 = vmatprep.subr.mxu0 %v4659_v0 }
 0x10e   : > { %3916 = vmatpush3.msra.mxu0 %v691_v50 }
 0x10f   : > { %3917 = vmatprep.subr.mxu0 %v4659_v0 }
 0x110   : > { %3918 = vmatpush3.msra.mxu0 %v690_v51 }
 0x111   : > { %3919 = vmatprep.subr.mxu0 %v4659_v0 }
 0x112   : > { %3920 = vmatpush3.msra.mxu0 %v689_v52 }
 0x113   : > { %3921 = vmatprep.subr.mxu0 %v4659_v0 }
 0x114   : > { %3922 = vmatpush3.msra.mxu0 %v688_v53 }
 0x115   : > { %3923 = vmatprep.subr.mxu0 %v4659_v0 }
 0x116   : > { %3924 = vmatpush3.msra.mxu0 %v687_v54 }
 0x117   : > { %3925 = vmatprep.subr.mxu0 %v4659_v0 }
 0x118   : > { %3926 = vmatpush3.msra.mxu0 %v686_v55 }
 0x119   : > { %3927 = vmatprep.subr.mxu0 %v4659_v0 }
 0x11a   : > { %3928 = vmatpush3.msra.mxu0 %v685_v56 }
 0x11b   : > { %3929 = vmatprep.subr.mxu0 %v4659_v0 }
 0x11c   : > { %3930 = vmatpush3.msra.mxu0 %v684_v57 }
 0x11d   : > { %3932 = vmatmul.mubr.f32.vlgmr.msra.gmra.mxu0 %v5051_v33  ;;  %3974 = vmatprep.subr.mxu0 %v4659_v0 }
 0x11e   : > { %4006 = vmatprep.mubr.msk.f32.mxu0 %vm4660_vm0, %v4659_v0 }
 0x1bb   : > { %v868_v36 = vpop.f32.mrf.mxu1  ;;  %v790_v37 = vpop.f32.mrf.mxu0 }
 0x1bc   : > { %v5069_v38 = vadd.f32 %v3540_v34, %v868_v36  ;;  %v5071_v39 = vadd.f32 %v3538_v35, %v790_v37 }
 0x1bd   : > { %v3898_v40 = vpop.f32.mrf.mxu1  ;;  %v3863_v41 = vpop.f32.mrf.mxu0 }
 0x1be   : > { %1117 = vrot.lane.b32.xlu1 %v5069_v38, %s4661_s23  ;;  %3935 = vmatpush3.xpose.msk.msra.mxu1 %vm950_vm1, %v5069_v38 }
 0x1bf   : > { %3939 = vmatprep.subr.mxu1 %v4659_v0 }
 0x1c1   : > { %3937 = vmatmul.mubr.msk.f32.vlgmr.msra.gmra.mxu1 %vm950_vm1, %v5071_v39 }
 0x1c2   : > { %1115 = vrot.lane.b32.xlu1 %v5071_v39, %s4661_s23  ;;  %3941 = vmatprep.mubr.msk.f32.mxu1 %vm4660_vm0, %v4659_v0 }
 0x1dd   : > { %v946_v7 = vpop.f32.mrf.mxu0 }
 0x1de   : > { %v5115_v8 = vadd.f32 %v3542_v6, %v946_v7  ;;  %v715_v6 = vld [vmem:[#allocation10 + $0x1f0] sm:$0xff]  ;;  %v714_v7 = vld [vmem:[#allocation10 + $0x1e8] sm:$0xff] }
 0x1df   : > { %v3933_v9 = vpop.f32.mrf.mxu0 }
 0x1e0   : > { %3940 = vmatpush3.msra.mxu1 %v5115_v8  ;;  %v712_v9 = vld [vmem:[#allocation10 + $0x1d8] sm:$0xff] }
 0x1e1   : > { %3944 = vmatprep.subr.mxu1 %v4659_v0 }
 0x230   : > { %v1118_v12 = vpop.permute.xlu1 %1117 }
 0x234   : > { %v1116_v14 = vpop.permute.xlu1 %1115 }
 0x281   : > { %v1023_v59 = vpop.f32.mrf.mxu1 }
 0x282   : > { %v1027_v60 = vmul.f32 0.17677669, %v1023_v59 }
 0x283   : > { %v3938_v61 = vpop.f32.mrf.mxu1 }
 0x284   : > { %v1029_v62 = vsel %vm1028_vm2, -1e+09, %v1027_v60 }
 0x285   : > { %v1031_v63 = vsel %vm1030_vm3, %v1029_v62, -inf }
 0x286   : > { %1032 = vmax.xlane.f32.xlu0 %v1031_v63 }
 0x30f   : > { %v1033_v1 = vpop.xlane.xlu0 %1032 }
 0x310   : > { %v1034_v2 = vsub.f32 %v1029_v62, %v1033_v1 }
 0x312   : > { %v1035_v3 = vmul.f32 1.442695, %v1034_v2 }
 0x314   : > { %4301 = vpow2.f32 %v1035_v3 }
 0x321   : > { %v4302_v4 = vpop.eup %4301 }
 0x322   : > { %v1037_v5 = vsel %vm1030_vm3, %v4302_v4, 0.0 }
 0x323   : > { %1038 = vadd.xlane.f32.xlu0 %v1037_v5  ;;  %v716_v5 = vld [vmem:[#allocation10 + $0x1f8] sm:$0xff] }
 0x324   : > { %3975 = vmatpush3.msra.mxu0 %v716_v5  ;;  %v5237_v5 = vld [vmem:[%s554_s14] sm:$0xff] }
 0x325   : > { %3976 = vmatprep.subr.mxu0 %v4659_v0 }
 0x326   : > { %3977 = vmatpush3.msra.mxu0 %v715_v6  ;;  %v1749_v6 = vld [vmem:[#allocation11 + $0x8] sm:$0xff] }
 0x327   : > { %3978 = vmatprep.subr.mxu0 %v4659_v0 }
 0x328   : > { %3979 = vmatpush3.msra.mxu0 %v714_v7  ;;  %v1748_v7 = vld [vmem:[#allocation11] sm:$0xff] }
 0x329   : > { %3980 = vmatprep.subr.mxu0 %v4659_v0 }
 0x3ac   : > { %v1039_v10 = vpop.xlane.xlu0 %1038 }
 0x3ad   : > { %4303 = vrcp.f32 %v1039_v10  ;;  %v711_v10 = vld [vmem:[#allocation10 + $0x1d0] sm:$0xff] }
 0x3ba   : > { %v4304_v11 = vpop.eup %4303 }
 0x3bb   : > { %v1041_v13 = vmul.f32 %v4304_v11, %v4302_v4  ;;  %v710_v11 = vld [vmem:[#allocation10 + $0x1c8] sm:$0xff] }
 0x3bd   : > { %3942 = vmatmul.mubr.msk.f32.vlgmr.msra.gmra.mxu1 %vm1030_vm3, %v1041_v13  ;;  %v708_v13 = vld [vmem:[#allocation10 + $0x1b8] sm:$0xff] }
 0x3be   : > { %3945 = vmatpush3.xpose.msk.msra.mxu1 %vm950_vm1, %v1118_v12  ;;  %3946 = vmatprep.mubr.msk.f32.mxu1 %vm4660_vm0, %v4659_v0  ;;  %v709_v12 = vld [vmem:[#allocation10 + $0x1c0] sm:$0xff] }
 0x3bf   : > { %3949 = vmatprep.subr.mxu1 %v4659_v0 }
 0x3c1   : > { %3947 = vmatmul.mubr.msk.f32.vlgmr.msra.gmra.mxu1 %vm950_vm1, %v1116_v14  ;;  %v707_v14 = vld [vmem:[#allocation10 + $0x1b0] sm:$0xff] }
 0x3c2   : > { %3951 = vmatprep.mubr.msk.f32.mxu1 %vm4660_vm0, %v4659_v0 }
 0x47d   : > { %v5127_v15 = vpop.f32.mrf.mxu1 }
 0x47f   : > { %v3943_v16 = vpop.f32.mrf.mxu1 }
 0x480   : > { %v706_v16 = vld [vmem:[#allocation10 + $0x1a8] sm:$0xff] }
 0x481   : > { %v1189_v17 = vpop.f32.mrf.mxu1 }
 0x482   : > { %v1193_v18 = vmul.f32 0.17677669, %v1189_v17  ;;  %v705_v17 = vld [vmem:[#allocation10 + $0x1a0] sm:$0xff] }
 0x483   : > { %v3948_v19 = vpop.f32.mrf.mxu1 }
 0x484   : > { %v1194_v20 = vsel %vm1028_vm2, -1e+09, %v1193_v18  ;;  %v704_v18 = vld [vmem:[#allocation10 + $0x198] sm:$0xff]  ;;  %v703_v19 = vld [vmem:[#allocation10 + $0x190] sm:$0xff] }
 0x485   : > { %v1195_v21 = vsel %vm1030_vm3, %v1194_v20, -inf }
 0x486   : > { %1196 = vmax.xlane.f32.xlu0 %v1195_v21  ;;  %v701_v21 = vld [vmem:[#allocation10 + $0x180] sm:$0xff] }
 0x49c   : > { %1207 = vrot.lane.b32.xlu0 %v5115_v8, %s4661_s23 }
 0x4a0   : > { %1285 = vrot.lane.b32.xlu0 %v5069_v38, %s4662_s8 }
 0x4a4   : > { %1283 = vrot.lane.b32.xlu0 %v5071_v39, %s4662_s8 }
 0x50f   : > { %v1197_v22 = vpop.xlane.xlu0 %1196 }
 0x510   : > { %v1198_v23 = vsub.f32 %v1194_v20, %v1197_v22  ;;  %v702_v20 = vld [vmem:[#allocation10 + $0x188] sm:$0xff] }
 0x512   : > { %v1199_v24 = vmul.f32 1.442695, %v1198_v23 }
 0x513   : > { %v1208_v25 = vpop.permute.xlu0 %1207 }
 0x514   : > { %4305 = vpow2.f32 %v1199_v24  ;;  %3950 = vmatpush3.msra.mxu1 %v1208_v25 }
 0x515   : > { %3954 = vmatprep.subr.mxu1 %v4659_v0 }
 0x517   : > { %v1286_v30 = vpop.permute.xlu0 %1285 }
 0x51b   : > { %v1284_v32 = vpop.permute.xlu0 %1283 }
 0x521   : > { %v4306_v26 = vpop.eup %4305 }
 0x522   : > { %v1201_v27 = vsel %vm1030_vm3, %v4306_v26, 0.0 }
 0x523   : > { %1202 = vadd.xlane.f32.xlu1 %v1201_v27 }
 0x534   : > { %1374 = vrot.lane.b32.xlu1 %v5115_v8, %s4662_s8 }
 0x538   : > { %1452 = vrot.lane.b32.xlu1 %v5069_v38, %s4663_s18 }
 0x5ac   : > { %v1203_v28 = vpop.xlane.xlu1 %1202 }
 0x5ad   : > { %4307 = vrcp.f32 %v1203_v28 }
 0x5b0   : > { %v1375_v34 = vpop.permute.xlu1 %1374 }
 0x5b4   : > { %v1453_v48 = vpop.permute.xlu1 %1452 }
 0x5ba   : > { %v4308_v29 = vpop.eup %4307 }
 0x5bb   : > { %v1205_v31 = vmul.f32 %v4308_v29, %v4306_v26 }
 0x5bd   : > { %3952 = vmatmul.mubr.msk.f32.vlgmr.msra.gmra.mxu1 %vm1030_vm3, %v1205_v31 }
 0x5be   : > { %3955 = vmatpush3.xpose.msk.msra.mxu1 %vm950_vm1, %v1286_v30  ;;  %3956 = vmatprep.mubr.msk.f32.mxu1 %vm4660_vm0, %v4659_v0  ;;  %v3556_v30 = vld [vmem:[%s5479_s5 + $0x3] ss:$0 sm:$0xff] }
 0x5bf   : > { %3959 = vmatprep.subr.mxu1 %v4659_v0 }
 0x5c1   : > { %3957 = vmatmul.mubr.msk.f32.vlgmr.msra.gmra.mxu1 %vm950_vm1, %v1284_v32 }
 0x5c2   : > { %3960 = vmatpush3.msra.mxu1 %v1375_v34  ;;  %3961 = vmatprep.mubr.msk.f32.mxu1 %vm4660_vm0, %v4659_v0 }
 0x5c3   : > { %3964 = vmatprep.subr.mxu1 %v4659_v0 }
 0x67d   : > { %v1279_v35 = vpop.f32.mrf.mxu1 }
 0x67f   : > { %v3953_v36 = vpop.f32.mrf.mxu1 }
 0x681   : > { %v1357_v37 = vpop.f32.mrf.mxu1 }
 0x682   : > { %v1361_v38 = vmul.f32 0.17677669, %v1357_v37 }
 0x683   : > { %v3958_v40 = vpop.f32.mrf.mxu1 }
 0x684   : > { %v1362_v41 = vsel %vm1028_vm2, -1e+09, %v1361_v38  ;;  %v1780_v38 = vld [vmem:[#allocation11 + $0xf8] sm:$0xff]  ;;  %v1779_v40 = vld [vmem:[#allocation11 + $0xf0] sm:$0xff] }
 0x685   : > { %v1363_v42 = vsel %vm1030_vm3, %v1362_v41, -inf }
 0x686   : > { %1364 = vmax.xlane.f32.xlu0 %v1363_v42  ;;  %v1763_v42 = vld [vmem:[#allocation11 + $0x78] sm:$0xff] }
 0x70f   : > { %v1365_v43 = vpop.xlane.xlu0 %1364 }
 0x710   : > { %v1366_v44 = vsub.f32 %v1362_v41, %v1365_v43  ;;  %v1778_v41 = vld [vmem:[#allocation11 + $0xe8] sm:$0xff]  ;;  %v1777_v43 = vld [vmem:[#allocation11 + $0xe0] sm:$0xff] }
 0x712   : > { %v1367_v45 = vmul.f32 1.442695, %v1366_v44  ;;  %v1762_v44 = vld [vmem:[#allocation11 + $0x70] sm:$0xff] }
 0x714   : > { %4309 = vpow2.f32 %v1367_v45  ;;  %v1776_v45 = vld [vmem:[#allocation11 + $0xd8] sm:$0xff] }
 0x721   : > { %v4310_v46 = vpop.eup %4309 }
 0x722   : > { %v1369_v47 = vsel %vm1030_vm3, %v4310_v46, 0.0 }
 0x723   : > { %1370 = vadd.xlane.f32.xlu1 %v1369_v47  ;;  %v1775_v47 = vld [vmem:[#allocation11 + $0xd0] sm:$0xff] }
 0x734   : > { %1450 = vrot.lane.b32.xlu1 %v5071_v39, %s4663_s18 }
 0x7ac   : > { %v1371_v49 = vpop.xlane.xlu1 %1370 }
 0x7ad   : > { %4311 = vrcp.f32 %v1371_v49  ;;  %v1774_v49 = vld [vmem:[#allocation11 + $0xc8] sm:$0xff] }
 0x7b0   : > { %v1451_v52 = vpop.permute.xlu1 %1450 }
 0x7ba   : > { %v4312_v50 = vpop.eup %4311 }
 0x7bb   : > { %v1373_v51 = vmul.f32 %v4312_v50, %v4310_v46  ;;  %v1761_v46 = vld [vmem:[#allocation11 + $0x68] sm:$0xff]  ;;  %v1759_v50 = vld [vmem:[#allocation11 + $0x58] sm:$0xff] }
 0x7bd   : > { %3962 = vmatmul.mubr.msk.f32.vlgmr.msra.gmra.mxu1 %vm1030_vm3, %v1373_v51  ;;  %v1773_v51 = vld [vmem:[#allocation11 + $0xc0] sm:$0xff] }
 0x7be   : > { %3965 = vmatpush3.xpose.msk.msra.mxu1 %vm950_vm1, %v1453_v48  ;;  %3966 = vmatprep.mubr.msk.f32.mxu1 %vm4660_vm0, %v4659_v0  ;;  %v1760_v48 = vld [vmem:[#allocation11 + $0x60] sm:$0xff] }
 0x7bf   : > { %3969 = vmatprep.subr.mxu1 %v4659_v0 }
 0x7c1   : > { %3967 = vmatmul.mubr.msk.f32.vlgmr.msra.gmra.mxu1 %vm950_vm1, %v1451_v52  ;;  %v1758_v52 = vld [vmem:[#allocation11 + $0x50] sm:$0xff] }
 0x7c2   : > { %3971 = vmatprep.mubr.msk.f32.mxu1 %vm4660_vm0, %v4659_v0 }
 0x87d   : > { %v1446_v39 = vpop.f32.mrf.mxu1 }
 0x87f   : > { %v3963_v53 = vpop.f32.mrf.mxu1 }
 0x880   : > { %v1757_v53 = vld [vmem:[#allocation11 + $0x48] sm:$0xff] }
 0x881   : > { %v1524_v54 = vpop.f32.mrf.mxu1 }
 0x882   : > { %v1528_v55 = vmul.f32 0.17677669, %v1524_v54  ;;  %v1771_v54 = vld [vmem:[#allocation11 + $0xb0] sm:$0xff] }
 0x883   : > { %v3968_v56 = vpop.f32.mrf.mxu1 }
 0x884   : > { %v1529_v57 = vsel %vm1028_vm2, -1e+09, %v1528_v55  ;;  %v1756_v55 = vld [vmem:[#allocation11 + $0x40] sm:$0xff]  ;;  %v1770_v56 = vld [vmem:[#allocation11 + $0xa8] sm:$0xff] }
 0x885   : > { %v1530_v59 = vsel %vm1030_vm3, %v1529_v57, -inf }
 0x886   : > { %1531 = vmax.xlane.f32.xlu0 %v1530_v59  ;;  %v1769_v59 = vld [vmem:[#allocation11 + $0xa0] sm:$0xff] }
 0x89c   : > { %1541 = vrot.lane.b32.xlu0 %v5115_v8, %s4663_s18  ;;  %v713_v8 = vld [vmem:[#allocation10 + $0x1e0] sm:$0xff] }
 0x89d   : > { %3981 = vmatpush3.msra.mxu0 %v713_v8 }
 0x89e   : > { %3982 = vmatprep.subr.mxu0 %v4659_v0 }
 0x89f   : > { %3983 = vmatpush3.msra.mxu0 %v712_v9 }
 0x8a0   : > { %1618 = vrot.lane.b32.xlu0 %v1279_v35, %s4663_s18  ;;  %3984 = vmatprep.subr.mxu0 %v4659_v0 }
 0x8a1   : > { %3985 = vmatpush3.msra.mxu0 %v711_v10 }
 0x8a2   : > { %3986 = vmatprep.subr.mxu0 %v4659_v0 }
 0x8a3   : > { %3987 = vmatpush3.msra.mxu0 %v710_v11 }
 0x8a4   : > { %1622 = vrot.lane.b32.xlu0 %v1446_v39, %s4662_s8  ;;  %3988 = vmatprep.subr.mxu0 %v4659_v0  ;;  %v1772_v39 = vld [vmem:[#allocation11 + $0xb8] sm:$0xff] }
 0x8a5   : > { %3989 = vmatpush3.msra.mxu0 %v709_v12 }
 0x8a6   : > { %3990 = vmatprep.subr.mxu0 %v4659_v0 }
 0x8a7   : > { %3991 = vmatpush3.msra.mxu0 %v708_v13 }
 0x8a8   : > { %3992 = vmatprep.subr.mxu0 %v4659_v0 }
 0x8a9   : > { %3993 = vmatpush3.msra.mxu0 %v707_v14 }
 0x8aa   : > { %3994 = vmatprep.subr.mxu0 %v4659_v0 }
 0x8ab   : > { %3995 = vmatpush3.msra.mxu0 %v706_v16 }
 0x8ac   : > { %3996 = vmatprep.subr.mxu0 %v4659_v0 }
 0x8ad   : > { %3997 = vmatpush3.msra.mxu0 %v705_v17 }
 0x8ae   : > { %3998 = vmatprep.subr.mxu0 %v4659_v0 }
 0x8af   : > { %3999 = vmatpush3.msra.mxu0 %v704_v18  ;;  %v3557_v18 = vld [vmem:[%s5551_s6] ss:$0 sm:$0xff] }
 0x8b0   : > { %4000 = vmatprep.subr.mxu0 %v4659_v0 }
 0x8b1   : > { %4001 = vmatpush3.msra.mxu0 %v703_v19 }
 0x8b2   : > { %4002 = vmatprep.subr.mxu0 %v4659_v0 }
 0x8b3   : > { %4003 = vmatpush3.msra.mxu0 %v702_v20  ;;  %v3558_v20 = vld [vmem:[%s5552_s22] ss:$0 sm:$0xff] }
 0x8b4   : > { %4004 = vmatprep.subr.mxu0 %v4659_v0 }
 0x8b5   : > { %4005 = vmatpush3.msra.mxu0 %v701_v21 }
 0x8b6   : > { %4044 = vmatprep.subr.mxu0 %v4659_v0 }
 0x90f   : > { %v1532_v60 = vpop.xlane.xlu0 %1531 }
 0x910   : > { %v1533_v61 = vsub.f32 %v1529_v57, %v1532_v60  ;;  %v1755_v57 = vld [vmem:[#allocation11 + $0x38] sm:$0xff]  ;;  %v1754_v60 = vld [vmem:[#allocation11 + $0x30] sm:$0xff] }
 0x912   : > { %v1534_v62 = vmul.f32 1.442695, %v1533_v61  ;;  %v1768_v61 = vld [vmem:[#allocation11 + $0x98] sm:$0xff] }
 0x913   : > { %v1542_v63 = vpop.permute.xlu0 %1541 }
 0x914   : > { %4313 = vpow2.f32 %v1534_v62  ;;  %3970 = vmatpush3.msra.mxu1 %v1542_v63  ;;  %v1753_v62 = vld [vmem:[#allocation11 + $0x28] sm:$0xff]  ;;  %v1767_v63 = vld [vmem:[#allocation11 + $0x90] sm:$0xff] }
 0x915   : > { %4009 = vmatprep.subr.mxu1 %v4659_v0 }
 0x917   : > { %v1619_v24 = vpop.permute.xlu0 %1618 }
 0x918   : > { %v1629_v26 = vsel %vm950_vm1, %v5127_v15, %v1619_v24  ;;  %v1797_v24 = vld [vmem:[#allocation11 + $0x178] sm:$0xff] }
 0x91b   : > { %v1623_v25 = vpop.permute.xlu0 %1622 }
 0x91c   : > { %v1631_v27 = vsel %vm1630_vm4, %v1629_v26, %v1623_v25  ;;  %v1796_v25 = vld [vmem:[#allocation11 + $0x170] sm:$0xff]  ;;  %v1795_v26 = vld [vmem:[#allocation11 + $0x168] sm:$0xff] }
 0x921   : > { %v4314_v58 = vpop.eup %4313 }
 0x922   : > { %v1536_v1 = vsel %vm1030_vm3, %v4314_v58, 0.0 }
 0x923   : > { %1537 = vadd.xlane.f32.xlu1 %v1536_v1  ;;  %v1766_v1 = vld [vmem:[#allocation11 + $0x88] sm:$0xff] }
 0x9ac   : > { %v1538_v2 = vpop.xlane.xlu1 %1537 }
 0x9ad   : > { %4315 = vrcp.f32 %v1538_v2  ;;  %v1751_v2 = vld [vmem:[#allocation11 + $0x18] sm:$0xff] }
 0x9ba   : > { %v4316_v3 = vpop.eup %4315 }
 0x9bb   : > { %v1540_v4 = vmul.f32 %v4316_v3, %v4314_v58  ;;  %v1752_v58 = vld [vmem:[#allocation11 + $0x20] sm:$0xff] }
 0x9bc   : > { %v1765_v3 = vld [vmem:[#allocation11 + $0x80] sm:$0xff] }
 0x9bd   : > { %3972 = vmatmul.mubr.msk.f32.vlgmr.msra.gmra.mxu1 %vm1030_vm3, %v1540_v4  ;;  %v1750_v4 = vld [vmem:[#allocation11 + $0x10] sm:$0xff] }
 0x9be   : > { %4041 = vmatprep.mubr.msk.f32.mxu1 %vm4660_vm0, %v4659_v0  ;;  %4010 = vmatpush3.msra.mxu1 %v1763_v42 }
 0x9bf   : > { %4011 = vmatprep.subr.mxu1 %v4659_v0 }
 0x9c0   : > { %4012 = vmatpush3.msra.mxu1 %v1762_v44  ;;  %v3559_v44 = vld [vmem:[%s5553_s1] ss:$0 sm:$0xff] }
 0x9c1   : > { %4013 = vmatprep.subr.mxu1 %v4659_v0 }
 0x9c2   : > { %4014 = vmatpush3.msra.mxu1 %v1761_v46 }
 0x9c3   : > { %4015 = vmatprep.subr.mxu1 %v4659_v0 }
 0x9c4   : > { %4016 = vmatpush3.msra.mxu1 %v1760_v48  ;;  %v3563_v48 = vld [vmem:[%s5553_s1 + $0x2] ss:$0 sm:$0xff] }
 0x9c5   : > { %4017 = vmatprep.subr.mxu1 %v4659_v0 }
 0x9c6   : > { %4018 = vmatpush3.msra.mxu1 %v1759_v50 }
 0x9c7   : > { %4019 = vmatprep.subr.mxu1 %v4659_v0 }
 0x9c8   : > { %4020 = vmatpush3.msra.mxu1 %v1758_v52  ;;  %v2127_v52 = vlaneseq }
 0x9c9   : > { %4021 = vmatprep.subr.mxu1 %v4659_v0 }
 0x9ca   : > { %4022 = vmatpush3.msra.mxu1 %v1757_v53  ;;  %v5306_v53 = vshrl.u32 %v2127_v52, 7 }
 0x9cb   : > { %4023 = vmatprep.subr.mxu1 %v4659_v0 }
 0x9cc   : > { %4024 = vmatpush3.msra.mxu1 %v1756_v55  ;;  %v4664_v55 = vmov 0  }
 0x9cd   : > { %4025 = vmatprep.subr.mxu1 %v4659_v0 }
 0x9ce   : > { %4026 = vmatpush3.msra.mxu1 %v1755_v57 }
 0x9cf   : > { %4027 = vmatprep.subr.mxu1 %v4659_v0 }
 0x9d0   : > { %4028 = vmatpush3.msra.mxu1 %v1754_v60 }
 0x9d1   : > { %4029 = vmatprep.subr.mxu1 %v4659_v0 }
 0x9d2   : > { %4030 = vmatpush3.msra.mxu1 %v1753_v62 }
 0x9d3   : > { %4031 = vmatprep.subr.mxu1 %v4659_v0 }
 0x9d4   : > { %4032 = vmatpush3.msra.mxu1 %v1752_v58 }
 0x9d5   : > { %4033 = vmatprep.subr.mxu1 %v4659_v0 }
 0x9d6   : > { %4034 = vmatpush3.msra.mxu1 %v1751_v2 }
 0x9d7   : > { %4035 = vmatprep.subr.mxu1 %v4659_v0 }
 0x9d8   : > { %4036 = vmatpush3.msra.mxu1 %v1750_v4 }
 0x9d9   : > { %4037 = vmatprep.subr.mxu1 %v4659_v0 }
 0x9da   : > { %4038 = vmatpush3.msra.mxu1 %v1749_v6 }
 0x9db   : > { %4039 = vmatprep.subr.mxu1 %v4659_v0 }
 0x9dc   : > { %4040 = vmatpush3.msra.mxu1 %v1748_v7 }
 0x9dd   : > { %4079 = vmatprep.subr.mxu1 %v4659_v0 }
 0xa7d   : > { %v1613_v22 = vpop.f32.mrf.mxu1 }
 0xa7e   : > { %1626 = vrot.lane.b32.xlu0 %v1613_v22, %s4661_s23 }
 0xa7f   : > { %v3973_v23 = vpop.f32.mrf.mxu1 }
 0xaf0   : > { %v1627_v28 = vpop.permute.xlu0 %1626 }
 0xaf1   : > { %v1633_v29 = vsel %vm1632_vm5, %v1631_v27, %v1627_v28  ;;  %v1794_v27 = vld [vmem:[#allocation11 + $0x160] sm:$0xff]  ;;  %v1792_v28 = vld [vmem:[#allocation11 + $0x150] sm:$0xff] }
 0xaf2   : > { %4007 = vmatmul.mubr.f32.vlgmr.msra.gmra.mxu0 %v1633_v29  ;;  %v1791_v29 = vld [vmem:[#allocation11 + $0x148] sm:$0xff] }
 0xaf3   : > { %4076 = vmatprep.mubr.msk.f32.mxu0 %vm4660_vm0, %v4659_v0  ;;  %4045 = vmatpush3.msra.mxu0 %v1780_v38  ;;  %v1782_v38 = vld [vmem:[#allocation11 + $0x100] sm:$0xff] }
 0xaf4   : > { %4046 = vmatprep.subr.mxu0 %v4659_v0 }
 0xaf5   : > { %4047 = vmatpush3.msra.mxu0 %v1779_v40  ;;  %v3561_v40 = vld [vmem:[%s5553_s1 + $0x1] ss:$0 sm:$0xff] }
 0xaf6   : > { %4048 = vmatprep.subr.mxu0 %v4659_v0 }
 0xaf7   : > { %4049 = vmatpush3.msra.mxu0 %v1778_v41 }
 0xaf8   : > { %4050 = vmatprep.subr.mxu0 %v4659_v0 }
 0xaf9   : > { %4051 = vmatpush3.msra.mxu0 %v1777_v43 }
 0xafa   : > { %4052 = vmatprep.subr.mxu0 %v4659_v0 }
 0xafb   : > { %4053 = vmatpush3.msra.mxu0 %v1776_v45 }
 0xafc   : > { %4054 = vmatprep.subr.mxu0 %v4659_v0 }
 0xafd   : > { %4055 = vmatpush3.msra.mxu0 %v1775_v47 }
 0xafe   : > { %4056 = vmatprep.subr.mxu0 %v4659_v0 }
 0xaff   : > { %4057 = vmatpush3.msra.mxu0 %v1774_v49 }
 0xb00   : > { %4058 = vmatprep.subr.mxu0 %v4659_v0 }
 0xb01   : > { %4059 = vmatpush3.msra.mxu0 %v1773_v51 }
 0xb02   : > { %4060 = vmatprep.subr.mxu0 %v4659_v0 }
 0xb03   : > { %4061 = vmatpush3.msra.mxu0 %v1772_v39  ;;  %v649_v39 = vld [vmem:[%s571_s4] sm:$0x1]  ;;  %s645_s4 = scalar_lea.vmem [#allocation16], %s4983_s15 }
 0xb04   : > { %4062 = vmatprep.subr.mxu0 %v4659_v0  ;;  %vm2125_vm8 = vcmp.eq.f32.partialorder %v649_v39, 0.0  ;;  %s3344_s20 = sshll.u32 %s645_s4, 4  ;;  %s3345_s20 = int_to_ptr.vmem [resolvable:$true] %s3344_s20 }
 0xb05   : > { %4063 = vmatpush3.msra.mxu0 %v1771_v54  ;;  %v2129_v54 = vsub.s32 0, %v5306_v53  ;;  %s4561_s28 = scalar_lea.vmem %s3345_s20, 128 }
 0xb06   : > { %4064 = vmatprep.subr.mxu0 %v4659_v0  ;;  %p4562_p7 = scmp.ne.s32.totalorder %s3345_s20, %s4561_s28 }
 0xb07   : > { %4065 = vmatpush3.msra.mxu0 %v1770_v56  ;;  %v2126_v56 = vsel %vm2125_vm8, 1, %v4664_v55 }
 0xb08   : > { %4066 = vmatprep.subr.mxu0 %v4659_v0  ;;  %v5311_v57 = vrot.slane %v2126_v56, %v2129_v54  ;;  %p4563_p4 = pnand %p4562_p7, %p5558_p2 }
 0xb09   : > { %4067 = vmatpush3.msra.mxu0 %v1769_v59 }
 0xb0a   : > { %4068 = vmatprep.subr.mxu0 %v4659_v0  ;;  %vm2131_vm9 = vcmp.eq.s32.totalorder %v5311_v57, 1  ;;  %p4564_p6 = pneg %p4563_p4 }
 0xb0b   : > { %4069 = vmatpush3.msra.mxu0 %v1768_v61 }
 0xb0c   : > { %4070 = vmatprep.subr.mxu0 %v4659_v0 }
 0xb0d   : > { %4071 = vmatpush3.msra.mxu0 %v1767_v63 }
 0xb0e   : > { %4072 = vmatprep.subr.mxu0 %v4659_v0 }
 0xb0f   : > { %4073 = vmatpush3.msra.mxu0 %v1766_v1 }
 0xb10   : > { %4074 = vmatprep.subr.mxu0 %v4659_v0 }
 0xb11   : > { %4075 = vmatpush3.msra.mxu0 %v1765_v3 }
 0xb12   : > { %4077 = vmatmul.mubr.f32.vlgmr.msra.gmra.mxu0 %v5237_v5  ;;  %4154 = vmatprep.subr.mxu0 %v4659_v0 }
 0xb13   : > { %4186 = vmatprep.mubr.msk.f32.mxu0 %vm4660_vm0, %v4659_v0 }
 0xbb2   : > { %v1708_v31 = vpop.f32.mrf.mxu0 }
 0xbb3   : > { %v1709_v32 = vadd.f32 %v3556_v30, %v1708_v31  ;;  %v1790_v30 = vld [vmem:[#allocation11 + $0x140] sm:$0xff]  ;;  %v1789_v31 = vld [vmem:[#allocation11 + $0x138] sm:$0xff] }
 0xbb4   : > { %v4008_v34 = vpop.f32.mrf.mxu0 }
 0xbb5   : > { %1714 = vadd.xlane.f32.xlu1 %v1709_v32  ;;  %v1787_v34 = vld [vmem:[#allocation11 + $0x128] sm:$0xff] }
 0xbd2   : > { %v1966_v41 = vpop.f32.mrf.mxu0 }
 0xbd3   : > { %v5283_v42 = vadd.f32 %v3561_v40, %v1966_v41 }
 0xbd4   : > { %v4078_v43 = vpop.f32.mrf.mxu0 }
 0xc3e   : > { %v1715_v35 = vpop.xlane.xlu1 %1714 }
 0xc3f   : > { %v1717_v36 = vmul.f32 0.0078125, %v1715_v35  ;;  %v1786_v35 = vld [vmem:[#allocation11 + $0x120] sm:$0xff] }
 0xc41   : > { %v5205_v15 = vsub.f32 %v1709_v32, %v1717_v36  ;;  %v1788_v32 = vld [vmem:[#allocation11 + $0x130] sm:$0xff]  ;;  %v1785_v36 = vld [vmem:[#allocation11 + $0x118] sm:$0xff] }
 0xc43   : > { %v1719_v37 = vmul.f32 %v5205_v15, %v5205_v15 }
 0xc45   : > { %1720 = vadd.xlane.f32.xlu0 %v1719_v37  ;;  %v1783_v37 = vld [vmem:[#allocation11 + $0x108] sm:$0xff] }
 0xcce   : > { %v1721_v8 = vpop.xlane.xlu0 %1720 }
 0xccf   : > { %v1722_v9 = vmul.f32 0.007874016, %v1721_v8 }
 0xcd1   : > { %4317 = vrsqrt.f32 %v1722_v9  ;;  %vm1725_vm6 = vcmp.eq.f32.partialorder %v1722_v9, inf  ;;  %v1728_v12 = vand.u32 2147483648, %v1722_v9  ;;  %vm1727_vm7 = vcmp.eq.f32.partialorder %v1722_v9, 0.0 }
 0xcde   : > { %v4318_v10 = vpop.eup %4317 }
 0xcdf   : > { %v1724_v11 = vmul.f32 %v4318_v10, %v1722_v9 }
 0xce1   : > { %v1726_v13 = vsel %vm1725_vm6, %v1722_v9, %v1724_v11 }
 0xce2   : > { %v1729_v14 = vsel %vm1727_vm7, %v1728_v12, %v1726_v13 }
 0xce3   : > { %v1730_v16 = vadd.f32 1e-06, %v1729_v14 }
 0xce5   : > { %4319 = vrcp.f32 %v1730_v16 }
 0xcf2   : > { %v4320_v17 = vpop.eup %4319 }
 0xcf3   : > { %v1732_v19 = vmul.f32 %v4320_v17, %v5205_v15  ;;  %v1784_v15 = vld [vmem:[#allocation11 + $0x110] sm:$0xff] }
 0xcf5   : > { %v1739_v21 = vmul.f32 %v3557_v18, %v1732_v19 }
 0xcf7   : > { %v1746_v22 = vadd.f32 %v3558_v20, %v1739_v21 }
 0xcf9   : > { %v5256_v23 = vadd.f32 %v1746_v22, %v5051_v33  ;;  %v1793_v33 = vld [vmem:[#allocation11 + $0x158] sm:$0xff] }
 0xcfb   : > { %4042 = vmatmul.mubr.f32.vlgmr.msra.gmra.mxu1 %v5256_v23 }
 0xcfc   : > { %4080 = vmatpush3.msra.mxu1 %v1797_v24  ;;  %4111 = vmatprep.mubr.msk.f32.mxu1 %vm4660_vm0, %v4659_v0 }
 0xcfd   : > { %4081 = vmatprep.subr.mxu1 %v4659_v0 }
 0xcfe   : > { %4082 = vmatpush3.msra.mxu1 %v1796_v25 }
 0xcff   : > { %4083 = vmatprep.subr.mxu1 %v4659_v0 }
 0xd00   : > { %4084 = vmatpush3.msra.mxu1 %v1795_v26 }
 0xd01   : > { %4085 = vmatprep.subr.mxu1 %v4659_v0 }
 0xd02   : > { %4086 = vmatpush3.msra.mxu1 %v1794_v27 }
 0xd03   : > { %4087 = vmatprep.subr.mxu1 %v4659_v0 }
 0xd04   : > { %4088 = vmatpush3.msra.mxu1 %v1793_v33 }
 0xd05   : > { %4089 = vmatprep.subr.mxu1 %v4659_v0 }
 0xd06   : > { %4090 = vmatpush3.msra.mxu1 %v1792_v28 }
 0xd07   : > { %4091 = vmatprep.subr.mxu1 %v4659_v0 }
 0xd08   : > { %4092 = vmatpush3.msra.mxu1 %v1791_v29 }
 0xd09   : > { %4093 = vmatprep.subr.mxu1 %v4659_v0 }
 0xd0a   : > { %4094 = vmatpush3.msra.mxu1 %v1790_v30 }
 0xd0b   : > { %4095 = vmatprep.subr.mxu1 %v4659_v0 }
 0xd0c   : > { %4096 = vmatpush3.msra.mxu1 %v1789_v31 }
 0xd0d   : > { %4097 = vmatprep.subr.mxu1 %v4659_v0 }
 0xd0e   : > { %4098 = vmatpush3.msra.mxu1 %v1788_v32 }
 0xd0f   : > { %4099 = vmatprep.subr.mxu1 %v4659_v0 }
 0xd10   : > { %4100 = vmatpush3.msra.mxu1 %v1787_v34 }
 0xd11   : > { %4101 = vmatprep.subr.mxu1 %v4659_v0 }
 0xd12   : > { %4102 = vmatpush3.msra.mxu1 %v1786_v35 }
 0xd13   : > { %4103 = vmatprep.subr.mxu1 %v4659_v0 }
 0xd14   : > { %4104 = vmatpush3.msra.mxu1 %v1785_v36 }
 0xd15   : > { %4105 = vmatprep.subr.mxu1 %v4659_v0 }
 0xd16   : > { %4106 = vmatpush3.msra.mxu1 %v1784_v15 }
 0xd17   : > { %4107 = vmatprep.subr.mxu1 %v4659_v0 }
 0xd18   : > { %4108 = vmatpush3.msra.mxu1 %v1783_v37 }
 0xd19   : > { %4109 = vmatprep.subr.mxu1 %v4659_v0 }
 0xd1a   : > { %4110 = vmatpush3.msra.mxu1 %v1782_v38 }
 0xd1b   : > { %4112 = vmatmul.mubr.f32.vlgmr.msra.gmra.mxu1 %v5237_v5  ;;  %4114 = vmatprep.subr.mxu1 %v4659_v0 }
 0xd1c   : > { %4116 = vmatprep.mubr.msk.f32.mxu1 %vm4660_vm0, %v4659_v0  ;;  %4115 = vmatpush3.xpose.msk.msra.mxu1 %vm950_vm1, %v5283_v42 }
 0xd1d   : > { %4119 = vmatprep.subr.mxu1 %v4659_v0 }
 0xdbb   : > { %v1888_v45 = vpop.f32.mrf.mxu1 }
 0xdbc   : > { %v5291_v46 = vadd.f32 %v3559_v44, %v1888_v45 }
 0xdbd   : > { %v4043_v47 = vpop.f32.mrf.mxu1 }
 0xdbe   : > { %4117 = vmatmul.mubr.msk.f32.vlgmr.msra.gmra.mxu1 %vm950_vm1, %v5291_v46 }
 0xdbf   : > { %4121 = vmatprep.mubr.msk.f32.mxu1 %vm4660_vm0, %v4659_v0 }
 0xddb   : > { %v2044_v49 = vpop.f32.mrf.mxu1 }
 0xddc   : > { %v5300_v50 = vadd.f32 %v3563_v48, %v2044_v49 }
 0xddd   : > { %v4113_v51 = vpop.f32.mrf.mxu1 }
 0xdde   : > { %4120 = vmatpush3.msra.mxu1 %v5300_v50 }
 0xddf   : > { %4124 = vmatprep.subr.mxu1 %v4659_v0 }
 0xe7e   : > { %v2120_v59 = vpop.f32.mrf.mxu1 }
 0xe7f   : > { %v2124_v60 = vmul.f32 0.17677669, %v2120_v59 }
 0xe80   : > { %v4118_v61 = vpop.f32.mrf.mxu1 }
 0xe81   : > { %v2132_v62 = vsel %vm2131_vm9, -1e+09, %v2124_v60 }
 0xe82   : > { %v2133_v63 = vsel %vm1030_vm3, %v2132_v62, -inf }
 0xe83   : > { %2134 = vmax.xlane.f32.xlu1 %v2133_v63 }
 0xe94   : > { %2219 = vrot.lane.b32.xlu1 %v5283_v42, %s4661_s23 }
 0xf0c   : > { %v2135_v58 = vpop.xlane.xlu1 %2134 }
 0xf0d   : > { %v2136_v1 = vsub.f32 %v2132_v62, %v2135_v58 }
 0xf0f   : > { %v2137_v2 = vmul.f32 1.442695, %v2136_v1 }
 0xf10   : > { %v2220_v5 = vpop.permute.xlu1 %2219 }
 0xf11   : > { %4321 = vpow2.f32 %v2137_v2 }
 0xf1e   : > { %v4322_v3 = vpop.eup %4321 }
 0xf1f   : > { %v2139_v4 = vsel %vm1030_vm3, %v4322_v3, 0.0 }
 0xf20   : > { %2140 = vadd.xlane.f32.xlu1 %v2139_v4  ;;  %v1812_v4 = vld [vmem:[#allocation11 + $0x1e8] sm:$0xff] }
 0xf31   : > { %2217 = vrot.lane.b32.xlu1 %v5291_v46, %s4661_s23 }
 0xfa9   : > { %v2141_v6 = vpop.xlane.xlu1 %2140 }
 0xfaa   : > { %4323 = vrcp.f32 %v2141_v6  ;;  %v1810_v6 = vld [vmem:[#allocation11 + $0x1d8] sm:$0xff] }
 0xfad   : > { %v2218_v9 = vpop.permute.xlu1 %2217 }
 0xfb7   : > { %v4324_v7 = vpop.eup %4323 }
 0xfb8   : > { %v2143_v8 = vmul.f32 %v4324_v7, %v4322_v3  ;;  %v1813_v3 = vld [vmem:[#allocation11 + $0x1f0] sm:$0xff] }
 0xfb9   : > { %v1809_v7 = vld [vmem:[#allocation11 + $0x1d0] sm:$0xff] }
 0xfba   : > { %4122 = vmatmul.mubr.msk.f32.vlgmr.msra.gmra.mxu1 %vm1030_vm3, %v2143_v8  ;;  %v1808_v8 = vld [vmem:[#allocation11 + $0x1c8] sm:$0xff] }
 0xfbb   : > { %4125 = vmatpush3.xpose.msk.msra.mxu1 %vm950_vm1, %v2220_v5  ;;  %4126 = vmatprep.mubr.msk.f32.mxu1 %vm4660_vm0, %v4659_v0  ;;  %v1811_v5 = vld [vmem:[#allocation11 + $0x1e0] sm:$0xff] }
 0xfbc   : > { %4129 = vmatprep.subr.mxu1 %v4659_v0 }
 0xfbe   : > { %4127 = vmatmul.mubr.msk.f32.vlgmr.msra.gmra.mxu1 %vm950_vm1, %v2218_v9  ;;  %v1807_v9 = vld [vmem:[#allocation11 + $0x1c0] sm:$0xff] }
 0xfbf   : > { %4131 = vmatprep.mubr.msk.f32.mxu1 %vm4660_vm0, %v4659_v0 }
0x107a   : > { %v5330_v10 = vpop.f32.mrf.mxu1 }
0x107c   : > { %v4123_v11 = vpop.f32.mrf.mxu1 }
0x107d   : > { %v1806_v11 = vld [vmem:[#allocation11 + $0x1b8] sm:$0xff] }
0x107e   : > { %v2291_v12 = vpop.f32.mrf.mxu1 }
0x107f   : > { %v2295_v13 = vmul.f32 0.17677669, %v2291_v12  ;;  %v1805_v12 = vld [vmem:[#allocation11 + $0x1b0] sm:$0xff] }
0x1080   : > { %v4128_v14 = vpop.f32.mrf.mxu1 }
0x1081   : > { %v2296_v16 = vsel %vm2131_vm9, -1e+09, %v2295_v13  ;;  %v1804_v13 = vld [vmem:[#allocation11 + $0x1a8] sm:$0xff]  ;;  %v1803_v14 = vld [vmem:[#allocation11 + $0x1a0] sm:$0xff] }
0x1082   : > { %v2297_v17 = vsel %vm1030_vm3, %v2296_v16, -inf }
0x1083   : > { %2298 = vmax.xlane.f32.xlu0 %v2297_v17  ;;  %v1801_v17 = vld [vmem:[#allocation11 + $0x190] sm:$0xff] }
0x1099   : > { %2309 = vrot.lane.b32.xlu0 %v5300_v50, %s4661_s23 }
0x109d   : > { %2387 = vrot.lane.b32.xlu0 %v5283_v42, %s4662_s8 }
0x10a1   : > { %2385 = vrot.lane.b32.xlu0 %v5291_v46, %s4662_s8 }
0x110c   : > { %v2299_v18 = vpop.xlane.xlu0 %2298 }
0x110d   : > { %v2300_v19 = vsub.f32 %v2296_v16, %v2299_v18  ;;  %v1802_v16 = vld [vmem:[#allocation11 + $0x198] sm:$0xff]  ;;  %v1800_v18 = vld [vmem:[#allocation11 + $0x188] sm:$0xff] }
0x110f   : > { %v2301_v20 = vmul.f32 1.442695, %v2300_v19  ;;  %v1799_v19 = vld [vmem:[#allocation11 + $0x180] sm:$0xff] }
0x1110   : > { %v2310_v21 = vpop.permute.xlu0 %2309 }
0x1111   : > { %4325 = vpow2.f32 %v2301_v20  ;;  %4130 = vmatpush3.msra.mxu1 %v2310_v21 }
0x1112   : > { %4134 = vmatprep.subr.mxu1 %v4659_v0 }
0x1114   : > { %v2388_v27 = vpop.permute.xlu0 %2387 }
0x1118   : > { %v2386_v28 = vpop.permute.xlu0 %2385 }
0x111e   : > { %v4326_v22 = vpop.eup %4325 }
0x111f   : > { %v2303_v24 = vsel %vm1030_vm3, %v4326_v22, 0.0 }
0x1120   : > { %2304 = vadd.xlane.f32.xlu1 %v2303_v24 }
0x1131   : > { %2476 = vrot.lane.b32.xlu1 %v5300_v50, %s4662_s8 }
0x1135   : > { %2554 = vrot.lane.b32.xlu1 %v5283_v42, %s4663_s18 }
0x11a9   : > { %v2305_v25 = vpop.xlane.xlu1 %2304 }
0x11aa   : > { %4327 = vrcp.f32 %v2305_v25 }
0x11ad   : > { %v2477_v29 = vpop.permute.xlu1 %2476 }
0x11b1   : > { %v2555_v43 = vpop.permute.xlu1 %2554 }
0x11b7   : > { %v4328_v26 = vpop.eup %4327 }
0x11b8   : > { %v2307_v33 = vmul.f32 %v4328_v26, %v4326_v22 }
0x11ba   : > { %4132 = vmatmul.mubr.msk.f32.vlgmr.msra.gmra.mxu1 %vm1030_vm3, %v2307_v33 }
0x11bb   : > { %4135 = vmatpush3.xpose.msk.msra.mxu1 %vm950_vm1, %v2388_v27  ;;  %4136 = vmatprep.mubr.msk.f32.mxu1 %vm4660_vm0, %v4659_v0 }
0x11bc   : > { %4139 = vmatprep.subr.mxu1 %v4659_v0 }
0x11be   : > { %4137 = vmatmul.mubr.msk.f32.vlgmr.msra.gmra.mxu1 %vm950_vm1, %v2386_v28  ;;  %v3577_v28 = vld [vmem:[%s5553_s1 + $0x3] ss:$0 sm:$0xff] }
0x11bf   : > { %4140 = vmatpush3.msra.mxu1 %v2477_v29  ;;  %4141 = vmatprep.mubr.msk.f32.mxu1 %vm4660_vm0, %v4659_v0 }
0x11c0   : > { %4144 = vmatprep.subr.mxu1 %v4659_v0 }
0x127a   : > { %v2381_v30 = vpop.f32.mrf.mxu1 }
0x127c   : > { %v4133_v31 = vpop.f32.mrf.mxu1 }
0x127e   : > { %v2459_v32 = vpop.f32.mrf.mxu1 }
0x127f   : > { %v2463_v34 = vmul.f32 0.17677669, %v2459_v32 }
0x1280   : > { %v4138_v35 = vpop.f32.mrf.mxu1 }
0x1281   : > { %v2464_v36 = vsel %vm2131_vm9, -1e+09, %v2463_v34 }
0x1282   : > { %v2465_v15 = vsel %vm1030_vm3, %v2464_v36, -inf }
0x1283   : > { %2466 = vmax.xlane.f32.xlu0 %v2465_v15  ;;  %v2912_v15 = vld [vmem:[#allocation13 + $0x1f8] sm:$0xff] }
0x130c   : > { %v2467_v37 = vpop.xlane.xlu0 %2466 }
0x130d   : > { %v2468_v38 = vsub.f32 %v2464_v36, %v2467_v37  ;;  %v2910_v36 = vld [vmem:[#allocation13 + $0x1e8] sm:$0xff]  ;;  %v2911_v37 = vld [vmem:[#allocation13 + $0x1f0] sm:$0xff] }
0x130f   : > { %v2469_v40 = vmul.f32 1.442695, %v2468_v38  ;;  %v2906_v38 = vld [vmem:[#allocation13 + $0x1c8] sm:$0xff] }
0x1311   : > { %4329 = vpow2.f32 %v2469_v40  ;;  %v2908_v40 = vld [vmem:[#allocation13 + $0x1d8] sm:$0xff] }
0x131e   : > { %v4330_v41 = vpop.eup %4329 }
0x131f   : > { %v2471_v42 = vsel %vm1030_vm3, %v4330_v41, 0.0 }
0x1320   : > { %2472 = vadd.xlane.f32.xlu1 %v2471_v42  ;;  %v2907_v42 = vld [vmem:[#allocation13 + $0x1d0] sm:$0xff] }
0x1331   : > { %2552 = vrot.lane.b32.xlu1 %v5291_v46, %s4663_s18 }
0x13a9   : > { %v2473_v44 = vpop.xlane.xlu1 %2472 }
0x13aa   : > { %4331 = vrcp.f32 %v2473_v44  ;;  %v2904_v44 = vld [vmem:[#allocation13 + $0x1b8] sm:$0xff] }
0x13ad   : > { %v2553_v48 = vpop.permute.xlu1 %2552 }
0x13b7   : > { %v4332_v45 = vpop.eup %4331 }
0x13b8   : > { %v2475_v47 = vmul.f32 %v4332_v45, %v4330_v41  ;;  %v2905_v41 = vld [vmem:[#allocation13 + $0x1c0] sm:$0xff] }
0x13b9   : > { %v2901_v45 = vld [vmem:[#allocation13 + $0x1a0] sm:$0xff] }
0x13ba   : > { %4142 = vmatmul.mubr.msk.f32.vlgmr.msra.gmra.mxu1 %vm1030_vm3, %v2475_v47  ;;  %v2903_v47 = vld [vmem:[#allocation13 + $0x1b0] sm:$0xff] }
0x13bb   : > { %4145 = vmatpush3.xpose.msk.msra.mxu1 %vm950_vm1, %v2555_v43  ;;  %4146 = vmatprep.mubr.msk.f32.mxu1 %vm4660_vm0, %v4659_v0  ;;  %v2902_v43 = vld [vmem:[#allocation13 + $0x1a8] sm:$0xff] }
0x13bc   : > { %4149 = vmatprep.subr.mxu1 %v4659_v0 }
0x13be   : > { %4147 = vmatmul.mubr.msk.f32.vlgmr.msra.gmra.mxu1 %vm950_vm1, %v2553_v48  ;;  %v2898_v48 = vld [vmem:[#allocation13 + $0x188] sm:$0xff] }
0x13bf   : > { %4151 = vmatprep.mubr.msk.f32.mxu1 %vm4660_vm0, %v4659_v0 }
0x147a   : > { %v2548_v46 = vpop.f32.mrf.mxu1 }
0x147c   : > { %v4143_v49 = vpop.f32.mrf.mxu1 }
0x147d   : > { %v2897_v49 = vld [vmem:[#allocation13 + $0x180] sm:$0xff] }
0x147e   : > { %v2626_v51 = vpop.f32.mrf.mxu1 }
0x147f   : > { %v2630_v52 = vmul.f32 0.17677669, %v2626_v51  ;;  %v2899_v51 = vld [vmem:[#allocation13 + $0x190] sm:$0xff] }
0x1480   : > { %v4148_v39 = vpop.f32.mrf.mxu1 }
0x1481   : > { %v2631_v55 = vsel %vm2131_vm9, -1e+09, %v2630_v52  ;;  %v2894_v52 = vld [vmem:[#allocation13 + $0x168] sm:$0xff]  ;;  %v2896_v39 = vld [vmem:[#allocation13 + $0x178] sm:$0xff] }
0x1482   : > { %v2632_v56 = vsel %vm1030_vm3, %v2631_v55, -inf }
0x1483   : > { %2633 = vmax.xlane.f32.xlu0 %v2632_v56  ;;  %v2895_v56 = vld [vmem:[#allocation13 + $0x170] sm:$0xff] }
0x1499   : > { %2643 = vrot.lane.b32.xlu0 %v5300_v50, %s4663_s18  ;;  %v1814_v50 = vld [vmem:[#allocation11 + $0x1f8] sm:$0xff] }
0x149a   : > { %4155 = vmatpush3.msra.mxu0 %v1814_v50  ;;  %v2884_v50 = vld [vmem:[#allocation13 + $0x118] sm:$0xff] }
0x149b   : > { %4156 = vmatprep.subr.mxu0 %v4659_v0 }
0x149c   : > { %4157 = vmatpush3.msra.mxu0 %v1813_v3  ;;  %v2881_v3 = vld [vmem:[#allocation13 + $0x100] sm:$0xff] }
0x149d   : > { %2720 = vrot.lane.b32.xlu0 %v2381_v30, %s4663_s18  ;;  %4158 = vmatprep.subr.mxu0 %v4659_v0 }
0x149e   : > { %4159 = vmatpush3.msra.mxu0 %v1812_v4  ;;  %v2883_v4 = vld [vmem:[#allocation13 + $0x110] sm:$0xff] }
0x149f   : > { %4160 = vmatprep.subr.mxu0 %v4659_v0 }
0x14a0   : > { %4161 = vmatpush3.msra.mxu0 %v1811_v5  ;;  %v2878_v5 = vld [vmem:[#allocation13 + $0xe8] sm:$0xff] }
0x14a1   : > { %2724 = vrot.lane.b32.xlu0 %v2548_v46, %s4662_s8  ;;  %4162 = vmatprep.subr.mxu0 %v4659_v0  ;;  %v2900_v46 = vld [vmem:[#allocation13 + $0x198] sm:$0xff]  ;;  %s5557_s8 = sld [smem:[#allocation39_spill]] }
0x14a2   : > { %4163 = vmatpush3.msra.mxu0 %v1810_v6  ;;  %v2880_v6 = vld [vmem:[#allocation13 + $0xf8] sm:$0xff] }
0x14a3   : > { %4164 = vmatprep.subr.mxu0 %v4659_v0 }
0x14a4   : > { %4165 = vmatpush3.msra.mxu0 %v1809_v7  ;;  %v2877_v7 = vld [vmem:[#allocation13 + $0xe0] sm:$0xff] }
0x14a5   : > { %4166 = vmatprep.subr.mxu0 %v4659_v0 }
0x14a6   : > { %4167 = vmatpush3.msra.mxu0 %v1808_v8  ;;  %v2879_v8 = vld [vmem:[#allocation13 + $0xf0] sm:$0xff] }
0x14a7   : > { %4168 = vmatprep.subr.mxu0 %v4659_v0  ;;  %s3342_s18 = scalar_lea.hbm %s5557_s8, %s3588_s12 }
0x14a8   : > { %4169 = vmatpush3.msra.mxu0 %v1807_v9  ;;  %v2874_v9 = vld [vmem:[#allocation13 + $0xc8] sm:$0xff] }
0x14a9   : > { %4170 = vmatprep.subr.mxu0 %v4659_v0 }
0x14aa   : > { %4171 = vmatpush3.msra.mxu0 %v1806_v11  ;;  %v2876_v11 = vld [vmem:[#allocation13 + $0xd8] sm:$0xff] }
0x14ab   : > { %4172 = vmatprep.subr.mxu0 %v4659_v0 }
0x14ac   : > { %4173 = vmatpush3.msra.mxu0 %v1805_v12  ;;  %v2873_v12 = vld [vmem:[#allocation13 + $0xc0] sm:$0xff] }
0x14ad   : > { %4174 = vmatprep.subr.mxu0 %v4659_v0 }
0x14ae   : > { %4175 = vmatpush3.msra.mxu0 %v1804_v13  ;;  %v2875_v13 = vld [vmem:[#allocation13 + $0xd0] sm:$0xff] }
0x14af   : > { %4176 = vmatprep.subr.mxu0 %v4659_v0 }
0x14b0   : > { %4177 = vmatpush3.msra.mxu0 %v1803_v14  ;;  %v2870_v14 = vld [vmem:[#allocation13 + $0xa8] sm:$0xff] }
0x14b1   : > { %4178 = vmatprep.subr.mxu0 %v4659_v0 }
0x14b2   : > { %4179 = vmatpush3.msra.mxu0 %v1802_v16  ;;  %v2872_v16 = vld [vmem:[#allocation13 + $0xb8] sm:$0xff] }
0x14b3   : > { %4180 = vmatprep.subr.mxu0 %v4659_v0 }
0x14b4   : > { %4181 = vmatpush3.msra.mxu0 %v1801_v17  ;;  %v2869_v17 = vld [vmem:[#allocation13 + $0xa0] sm:$0xff] }
0x14b5   : > { %4182 = vmatprep.subr.mxu0 %v4659_v0 }
0x14b6   : > { %4183 = vmatpush3.msra.mxu0 %v1800_v18  ;;  %v2871_v18 = vld [vmem:[#allocation13 + $0xb0] sm:$0xff] }
0x14b7   : > { %4184 = vmatprep.subr.mxu0 %v4659_v0 }
0x14b8   : > { %4185 = vmatpush3.msra.mxu0 %v1799_v19  ;;  %v2866_v19 = vld [vmem:[#allocation13 + $0x88] sm:$0xff] }
0x14b9   : > { %3006 = vmatprep.subr.mxu0 %v2912_v15  ;;  %v2852_v15 = vld [vmem:[#allocation13 + $0x18] sm:$0xff] }
0x150c   : > { %v2634_v59 = vpop.xlane.xlu0 %2633 }
0x150d   : > { %v2635_v60 = vsub.f32 %v2631_v55, %v2634_v59  ;;  %v2893_v55 = vld [vmem:[#allocation13 + $0x160] sm:$0xff]  ;;  %v2890_v59 = vld [vmem:[#allocation13 + $0x148] sm:$0xff] }
0x150f   : > { %v2636_v61 = vmul.f32 1.442695, %v2635_v60  ;;  %v2892_v60 = vld [vmem:[#allocation13 + $0x158] sm:$0xff] }
0x1510   : > { %v2644_v62 = vpop.permute.xlu0 %2643 }
0x1511   : > { %4333 = vpow2.f32 %v2636_v61  ;;  %4150 = vmatpush3.msra.mxu1 %v2644_v62  ;;  %v2889_v61 = vld [vmem:[#allocation13 + $0x140] sm:$0xff]  ;;  %v2891_v62 = vld [vmem:[#allocation13 + $0x150] sm:$0xff] }
0x1512   : > { %2935 = vmatprep.subr.mxu1 %v2910_v36  ;;  %v2850_v36 = vld [vmem:[#allocation13 + $0x8] sm:$0xff] }
0x1514   : > { %v2721_v22 = vpop.permute.xlu0 %2720 }
0x1515   : > { %v2731_v25 = vsel %vm950_vm1, %v5330_v10, %v2721_v22  ;;  %v2867_v22 = vld [vmem:[#allocation13 + $0x90] sm:$0xff] }
0x1518   : > { %v2725_v24 = vpop.permute.xlu0 %2724 }
0x1519   : > { %v2732_v26 = vsel %vm1630_vm4, %v2731_v25, %v2725_v24  ;;  %v2862_v24 = vld [vmem:[#allocation13 + $0x68] sm:$0xff]  ;;  %v2864_v25 = vld [vmem:[#allocation13 + $0x78] sm:$0xff] }
0x151e   : > { %v4334_v63 = vpop.eup %4333 }
0x151f   : > { %v2638_v57 = vsel %vm1030_vm3, %v4334_v63, 0.0 }
0x1520   : > { %2639 = vadd.xlane.f32.xlu1 %v2638_v57  ;;  %v2888_v57 = vld [vmem:[#allocation13 + $0x138] sm:$0xff] }
0x15a9   : > { %v2640_v58 = vpop.xlane.xlu1 %2639 }
0x15aa   : > { %4335 = vrcp.f32 %v2640_v58  ;;  %v2885_v58 = vld [vmem:[#allocation13 + $0x120] sm:$0xff] }
0x15b7   : > { %v4336_v1 = vpop.eup %4335 }
0x15b8   : > { %v2642_v2 = vmul.f32 %v4336_v1, %v4334_v63  ;;  %v2886_v63 = vld [vmem:[#allocation13 + $0x128] sm:$0xff]  ;;  %v2887_v1 = vld [vmem:[#allocation13 + $0x130] sm:$0xff] }
0x15ba   : > { %4152 = vmatmul.mubr.msk.f32.vlgmr.msra.gmra.mxu1 %vm1030_vm3, %v2642_v2  ;;  %v2882_v2 = vld [vmem:[#allocation13 + $0x108] sm:$0xff] }
0x15bb   : > { %2999 = vmatprep.mubr.f32.mxu1 %v4659_v0 }
0x167a   : > { %v2715_v20 = vpop.f32.mrf.mxu1 }
0x167b   : > { %2728 = vrot.lane.b32.xlu0 %v2715_v20, %s4661_s23  ;;  %v2868_v20 = vld [vmem:[#allocation13 + $0x98] sm:$0xff] }
0x167c   : > { %v4153_v21 = vpop.f32.mrf.mxu1 }
0x167d   : > { %v2865_v21 = vld [vmem:[#allocation13 + $0x80] sm:$0xff] }
0x16ed   : > { %v2729_v27 = vpop.permute.xlu0 %2728 }
0x16ee   : > { %v2733_v33 = vsel %vm1632_vm5, %v2732_v26, %v2729_v27  ;;  %v2861_v26 = vld [vmem:[#allocation13 + $0x60] sm:$0xff]  ;;  %v2863_v27 = vld [vmem:[#allocation13 + $0x70] sm:$0xff] }
0x16ef   : > { %4187 = vmatmul.mubr.f32.vlgmr.msra.gmra.mxu0 %v2733_v33  ;;  %v2858_v33 = vld [vmem:[#allocation13 + $0x48] sm:$0xff] }
0x16f0   : > { %3070 = vmatprep.mubr.f32.mxu0 %v4659_v0  ;;  %v2909_v0 = vld [vmem:[#allocation13 + $0x1e0] sm:$0xff]  ;;  %3007 = vmatpush1.msra.mxu0 %v2911_v37  ;;  %v2851_v37 = vld [vmem:[#allocation13 + $0x10] sm:$0xff] }
0x16f1   : > { %2936 = vmatpush1.msra.mxu1 %v2909_v0  ;;  %3008 = vmatprep.subr.mxu0 %v2908_v40  ;;  %v2849_v0 = vld [vmem:[#allocation13] sm:$0xff]  ;;  %v3144_v40 = vld [vmem:[#allocation14 + $0x1f8] sm:$0xff] }
0x16f2   : > { %2937 = vmatprep.subr.mxu1 %v2906_v38  ;;  %3009 = vmatpush1.msra.mxu0 %v2907_v42  ;;  %v3112_v38 = vld [vmem:[#allocation14 + $0xf8] sm:$0xff] }
0x16f3   : > { %2938 = vmatpush1.msra.mxu1 %v2905_v41  ;;  %3010 = vmatprep.subr.mxu0 %v2904_v44 }
0x16f4   : > { %2939 = vmatprep.subr.mxu1 %v2902_v43  ;;  %3011 = vmatpush1.msra.mxu0 %v2903_v47 }
0x16f5   : > { %2940 = vmatpush1.msra.mxu1 %v2901_v45  ;;  %3012 = vmatprep.subr.mxu0 %v2900_v46 }
0x16f6   : > { %2941 = vmatprep.subr.mxu1 %v2898_v48  ;;  %3013 = vmatpush1.msra.mxu0 %v2899_v51  ;;  %v3580_v51 = vld [vmem:[%s5551_s6 + $0x1] ss:$0 sm:$0xff] }
0x16f7   : > { %2942 = vmatpush1.msra.mxu1 %v2897_v49  ;;  %3014 = vmatprep.subr.mxu0 %v2896_v39  ;;  %v3581_v39 = vld [vmem:[%s5552_s22 + $0x1] ss:$0 sm:$0xff] }
0x16f8   : > { %2943 = vmatprep.subr.mxu1 %v2894_v52  ;;  %3015 = vmatpush1.msra.mxu0 %v2895_v56 }
0x16f9   : > { %2944 = vmatpush1.msra.mxu1 %v2893_v55  ;;  %3016 = vmatprep.subr.mxu0 %v2892_v60  ;;  %v3096_v60 = vld [vmem:[#allocation14 + $0x78] sm:$0xff] }
0x16fa   : > { %2945 = vmatprep.subr.mxu1 %v2890_v59  ;;  %3017 = vmatpush1.msra.mxu0 %v2891_v62  ;;  %v3111_v62 = vld [vmem:[#allocation14 + $0xf0] sm:$0xff] }
0x16fb   : > { %2946 = vmatpush1.msra.mxu1 %v2889_v61  ;;  %3018 = vmatprep.subr.mxu0 %v2888_v57  ;;  %v3128_v61 = vld [vmem:[#allocation14 + $0x178] sm:$0xff]  ;;  %v3095_v57 = vld [vmem:[#allocation14 + $0x70] sm:$0xff] }
0x16fc   : > { %2947 = vmatprep.subr.mxu1 %v2886_v63  ;;  %3019 = vmatpush1.msra.mxu0 %v2887_v1  ;;  %v3143_v63 = vld [vmem:[#allocation14 + $0x1f0] sm:$0xff]  ;;  %v3142_v1 = vld [vmem:[#allocation14 + $0x1e8] sm:$0xff] }
0x16fd   : > { %2948 = vmatpush1.msra.mxu1 %v2885_v58  ;;  %3020 = vmatprep.subr.mxu0 %v2884_v50  ;;  %v3127_v58 = vld [vmem:[#allocation14 + $0x170] sm:$0xff]  ;;  %v3126_v50 = vld [vmem:[#allocation14 + $0x168] sm:$0xff] }
0x16fe   : > { %2949 = vmatprep.subr.mxu1 %v2882_v2  ;;  %3021 = vmatpush1.msra.mxu0 %v2883_v4  ;;  %v3094_v2 = vld [vmem:[#allocation14 + $0x68] sm:$0xff]  ;;  %v3093_v4 = vld [vmem:[#allocation14 + $0x60] sm:$0xff] }
0x16ff   : > { %2950 = vmatpush1.msra.mxu1 %v2881_v3  ;;  %3022 = vmatprep.subr.mxu0 %v2880_v6  ;;  %v3141_v3 = vld [vmem:[#allocation14 + $0x1e0] sm:$0xff]  ;;  %v3108_v6 = vld [vmem:[#allocation14 + $0xd8] sm:$0xff] }
0x1700   : > { %2951 = vmatprep.subr.mxu1 %v2878_v5  ;;  %3023 = vmatpush1.msra.mxu0 %v2879_v8  ;;  %v3125_v5 = vld [vmem:[#allocation14 + $0x160] sm:$0xff]  ;;  %v3092_v8 = vld [vmem:[#allocation14 + $0x58] sm:$0xff] }
0x1701   : > { %2952 = vmatpush1.msra.mxu1 %v2877_v7  ;;  %3024 = vmatprep.subr.mxu0 %v2876_v11  ;;  %v3140_v7 = vld [vmem:[#allocation14 + $0x1d8] sm:$0xff]  ;;  %v3107_v11 = vld [vmem:[#allocation14 + $0xd0] sm:$0xff] }
0x1702   : > { %2953 = vmatprep.subr.mxu1 %v2874_v9  ;;  %3025 = vmatpush1.msra.mxu0 %v2875_v13  ;;  %v3124_v9 = vld [vmem:[#allocation14 + $0x158] sm:$0xff]  ;;  %v3091_v13 = vld [vmem:[#allocation14 + $0x50] sm:$0xff] }
0x1703   : > { %2954 = vmatpush1.msra.mxu1 %v2873_v12  ;;  %3026 = vmatprep.subr.mxu0 %v2872_v16  ;;  %v3139_v12 = vld [vmem:[#allocation14 + $0x1d0] sm:$0xff]  ;;  %v3106_v16 = vld [vmem:[#allocation14 + $0xc8] sm:$0xff] }
0x1704   : > { %2955 = vmatprep.subr.mxu1 %v2870_v14  ;;  %3027 = vmatpush1.msra.mxu0 %v2871_v18  ;;  %v3123_v14 = vld [vmem:[#allocation14 + $0x150] sm:$0xff]  ;;  %v3090_v18 = vld [vmem:[#allocation14 + $0x48] sm:$0xff] }
0x1705   : > { %2956 = vmatpush1.msra.mxu1 %v2869_v17  ;;  %3028 = vmatprep.subr.mxu0 %v2868_v20  ;;  %v3138_v17 = vld [vmem:[#allocation14 + $0x1c8] sm:$0xff]  ;;  %v3105_v20 = vld [vmem:[#allocation14 + $0xc0] sm:$0xff] }
0x1706   : > { %2957 = vmatprep.subr.mxu1 %v2866_v19  ;;  %3029 = vmatpush1.msra.mxu0 %v2867_v22  ;;  %v3122_v19 = vld [vmem:[#allocation14 + $0x148] sm:$0xff]  ;;  %v3089_v22 = vld [vmem:[#allocation14 + $0x40] sm:$0xff] }
0x1707   : > { %2958 = vmatpush1.msra.mxu1 %v2865_v21  ;;  %3030 = vmatprep.subr.mxu0 %v2864_v25  ;;  %v3137_v21 = vld [vmem:[#allocation14 + $0x1c0] sm:$0xff]  ;;  %v3104_v25 = vld [vmem:[#allocation14 + $0xb8] sm:$0xff] }
0x1708   : > { %2959 = vmatprep.subr.mxu1 %v2862_v24  ;;  %3031 = vmatpush1.msra.mxu0 %v2863_v27  ;;  %v3121_v24 = vld [vmem:[#allocation14 + $0x140] sm:$0xff]  ;;  %v3088_v27 = vld [vmem:[#allocation14 + $0x38] sm:$0xff] }
0x1709   : > { %2960 = vmatpush1.msra.mxu1 %v2861_v26  ;;  %v3136_v26 = vld [vmem:[#allocation14 + $0x1b8] sm:$0xff] }
0x170a   : > { %2961 = vmatprep.subr.mxu1 %v2858_v33  ;;  %v3120_v33 = vld [vmem:[#allocation14 + $0x138] sm:$0xff] }
0x17af   : > { %v2808_v29 = vpop.f32.mrf.mxu0 }
0x17b0   : > { %v2809_v30 = vadd.f32 %v3577_v28, %v2808_v29  ;;  %v2860_v28 = vld [vmem:[#allocation13 + $0x58] sm:$0xff]  ;;  %v2857_v29 = vld [vmem:[#allocation13 + $0x40] sm:$0xff] }
0x17b1   : > { %v4188_v31 = vpop.f32.mrf.mxu0  ;;  %3032 = vmatprep.subr.mxu0 %v2860_v28  ;;  %2962 = vmatpush1.msra.mxu1 %v2857_v29  ;;  %v3103_v28 = vld [vmem:[#allocation14 + $0xb0] sm:$0xff] }
0x17b2   : > { %2816 = vadd.xlane.f32.xlu1 %v2809_v30  ;;  %v2854_v31 = vld [vmem:[#allocation13 + $0x28] sm:$0xff]  ;;  %v3135_v29 = vld [vmem:[#allocation14 + $0x1b0] sm:$0xff] }
0x17b3   : > { %2963 = vmatprep.subr.mxu1 %v2854_v31  ;;  %v3119_v31 = vld [vmem:[#allocation14 + $0x130] sm:$0xff] }
0x183b   : > { %v2817_v32 = vpop.xlane.xlu1 %2816 }
0x183c   : > { %v2818_v34 = vmul.f32 0.0078125, %v2817_v32  ;;  %v2856_v32 = vld [vmem:[#allocation13 + $0x38] sm:$0xff] }
0x183e   : > { %v5404_v35 = vsub.f32 %v2809_v30, %v2818_v34  ;;  %v2859_v30 = vld [vmem:[#allocation13 + $0x50] sm:$0xff]  ;;  %v2853_v34 = vld [vmem:[#allocation13 + $0x20] sm:$0xff] }
0x183f   : > { %3033 = vmatpush1.msra.mxu0 %v2859_v30  ;;  %2964 = vmatpush1.msra.mxu1 %v2853_v34  ;;  %v3087_v30 = vld [vmem:[#allocation14 + $0x30] sm:$0xff]  ;;  %v3134_v34 = vld [vmem:[#allocation14 + $0x1a8] sm:$0xff] }
0x1840   : > { %v2820_v10 = vmul.f32 %v5404_v35, %v5404_v35  ;;  %3034 = vmatprep.subr.mxu0 %v2856_v32  ;;  %2965 = vmatprep.subr.mxu1 %v2850_v36  ;;  %v3102_v32 = vld [vmem:[#allocation14 + $0xa8] sm:$0xff] }
0x1841   : > { %2966 = vmatpush1.msra.mxu1 %v2849_v0  ;;  %v3118_v36 = vld [vmem:[#allocation14 + $0x128] sm:$0xff]  ;;  %v3133_v0 = vld [vmem:[#allocation14 + $0x1a0] sm:$0xff] }
0x1842   : > { %2821 = vadd.xlane.f32.xlu0 %v2820_v10  ;;  %v2855_v10 = vld [vmem:[#allocation13 + $0x30] sm:$0xff]  ;;  %3759 = vmatprep.subr.mxu1 %v3112_v38  ;;  %v3117_v38 = vld [vmem:[#allocation14 + $0x120] sm:$0xff] }
0x1843   : > { %3035 = vmatpush1.msra.mxu0 %v2855_v10  ;;  %v3086_v10 = vld [vmem:[#allocation14 + $0x28] sm:$0xff] }
0x1844   : > { %3036 = vmatprep.subr.mxu0 %v2852_v15  ;;  %v3101_v15 = vld [vmem:[#allocation14 + $0xa0] sm:$0xff] }
0x1845   : > { %3037 = vmatpush1.msra.mxu0 %v2851_v37  ;;  %v3085_v37 = vld [vmem:[#allocation14 + $0x20] sm:$0xff] }
0x1846   : > { %3794 = vmatprep.subr.mxu0 %v3144_v40  ;;  %v3100_v40 = vld [vmem:[#allocation14 + $0x98] sm:$0xff] }
0x18cb   : > { %v2822_v41 = vpop.xlane.xlu0 %2821 }
0x18cc   : > { %v2823_v42 = vmul.f32 0.007874016, %v2822_v41  ;;  %v3132_v41 = vld [vmem:[#allocation14 + $0x198] sm:$0xff] }
0x18ce   : > { %4337 = vrsqrt.f32 %v2823_v42  ;;  %vm2826_vm10 = vcmp.eq.f32.partialorder %v2823_v42, inf  ;;  %v2829_v45 = vand.u32 2147483648, %v2823_v42  ;;  %vm2828_vm11 = vcmp.eq.f32.partialorder %v2823_v42, 0.0 }
0x18db   : > { %v4338_v43 = vpop.eup %4337 }
0x18dc   : > { %v2825_v44 = vmul.f32 %v4338_v43, %v2823_v42  ;;  %v3116_v43 = vld [vmem:[#allocation14 + $0x118] sm:$0xff] }
0x18de   : > { %v2827_v47 = vsel %vm2826_vm10, %v2823_v42, %v2825_v44  ;;  %v3084_v42 = vld [vmem:[#allocation14 + $0x18] sm:$0xff]  ;;  %v3099_v44 = vld [vmem:[#allocation14 + $0x90] sm:$0xff] }
0x18df   : > { %v2830_v48 = vsel %vm2828_vm11, %v2829_v45, %v2827_v47  ;;  %v3131_v45 = vld [vmem:[#allocation14 + $0x190] sm:$0xff] }
0x18e0   : > { %v2831_v46 = vadd.f32 1e-06, %v2830_v48  ;;  %v3083_v47 = vld [vmem:[#allocation14 + $0x10] sm:$0xff] }
0x18e1   : > { %v3115_v48 = vld [vmem:[#allocation14 + $0x110] sm:$0xff] }
0x18e2   : > { %4339 = vrcp.f32 %v2831_v46  ;;  %v3098_v46 = vld [vmem:[#allocation14 + $0x88] sm:$0xff] }
0x18ef   : > { %v4340_v49 = vpop.eup %4339 }
0x18f0   : > { %v2833_v52 = vmul.f32 %v4340_v49, %v5404_v35  ;;  %v3110_v35 = vld [vmem:[#allocation14 + $0xe8] sm:$0xff] }
0x18f1   : > { %v3130_v49 = vld [vmem:[#allocation14 + $0x188] sm:$0xff] }
0x18f2   : > { %v2840_v55 = vmul.f32 %v3580_v51, %v2833_v52  ;;  %v3082_v51 = vld [vmem:[#allocation14 + $0x8] sm:$0xff] }
0x18f3   : > { %v3114_v52 = vld [vmem:[#allocation14 + $0x108] sm:$0xff] }
0x18f4   : > { %v2847_v56 = vadd.f32 %v3581_v39, %v2840_v55  ;;  %v3097_v39 = vld [vmem:[#allocation14 + $0x80] sm:$0xff] }
0x18f5   : > { %v3129_v55 = vld [vmem:[#allocation14 + $0x180] sm:$0xff] }
0x18f6   : > { %v5416_v59 = vadd.f32 %v2847_v56, %v5256_v23  ;;  %v3109_v23 = vld [vmem:[#allocation14 + $0xe0] sm:$0xff] }
0x18f7   : > { %v3081_v56 = vld [vmem:[#allocation14] sm:$0xff] }
0x18f8   : > { %3000 = vmatmul.mubr.f32.vlgmr.msra.gmra.mxu1 %v5416_v59  ;;  %3071 = vmatmul.mubr.f32.vlgmr.msra.gmra.mxu0 %v5416_v59 }
0x18f9   : > { %3760 = vmatpush3.msra.mxu1 %v3096_v60  ;;  %3795 = vmatpush3.msra.mxu0 %v3128_v61  ;;  %v3113_v60 = vld [vmem:[#allocation14 + $0x100] sm:$0xff]  ;;  %v2925_v61 = vsub.s32 2, %v5306_v53 }
0x18fa   : > { %3761 = vmatprep.subr.mxu1 %v3111_v62  ;;  %3796 = vmatprep.subr.mxu0 %v3143_v63  ;;  %v2913_v62 = vld [vmem:[%s5554_s26] sm:$0xf]  ;;  %v2921_v63 = vsub.s32 1, %v5306_v53  ;;  %s4665_s26 = smov [#allocation16]  }
0x18fb   : > { %3762 = vmatpush3.msra.mxu1 %v3095_v57  ;;  %3797 = vmatpush3.msra.mxu0 %v3127_v58  ;;  %v2929_v57 = vsub.s32 3, %v5306_v53  ;;  %v2918_v58 = vrot.slane %v2913_v62, %v2129_v54  ;;  %s4565_s25 = sshll.u32 %s4665_s26, 4  ;;  %s4566_s25 = int_to_ptr.vmem [resolvable:$false] %s4565_s25 }
0x18fc   : > { %3763 = vmatprep.subr.mxu1 %v3110_v35  ;;  %3798 = vmatprep.subr.mxu0 %v3142_v1  ;;  %v2926_v35 = vrot.slane %v2913_v62, %v2925_v61  ;;  %v2922_v1 = vrot.slane %v2913_v62, %v2921_v63  ;;  %s4567_s17 = scalar_lea.vmem %s4566_s25, 256  ;;  %p4568_p8 = scmp.lt.s32.totalorder %s3345_s20, %s4566_s25 }
0x18fd   : > { %3764 = vmatpush3.msra.mxu1 %v3094_v2  ;;  %3799 = vmatpush3.msra.mxu0 %v3126_v50  ;;  %v2930_v2 = vrot.slane %v2913_v62, %v2929_v57  ;;  %p4569_p11 = scmp.lt.s32.totalorder %s4567_s17, %s4561_s28 }
0x18fe   : > { %3765 = vmatprep.subr.mxu1 %v3109_v23  ;;  %3800 = vmatprep.subr.mxu0 %v3141_v3 }
0x18ff   : > { %3766 = vmatpush3.msra.mxu1 %v3093_v4  ;;  %3801 = vmatpush3.msra.mxu0 %v3125_v5  ;;  %p4570_p0 = por %p4569_p11, %p4568_p8 }
0x1900   : > { %3767 = vmatprep.subr.mxu1 %v3108_v6  ;;  %3802 = vmatprep.subr.mxu0 %v3140_v7 }
0x1901   : > { %3768 = vmatpush3.msra.mxu1 %v3092_v8  ;;  %3803 = vmatpush3.msra.mxu0 %v3124_v9  ;;  %p4571_p13 = pnand %p4570_p0, %p4564_p6 }
0x1902   : > { %3769 = vmatprep.subr.mxu1 %v3107_v11  ;;  %3804 = vmatprep.subr.mxu0 %v3139_v12 }
0x1903   : > { %3770 = vmatpush3.msra.mxu1 %v3091_v13  ;;  %3805 = vmatpush3.msra.mxu0 %v3123_v14  ;;  %v3582_v14 = vld [vmem:[%s5555_s21] ss:$0 sm:$0xff] }
0x1904   : > { %3771 = vmatprep.subr.mxu1 %v3106_v16  ;;  %3806 = vmatprep.subr.mxu0 %v3138_v17 }
0x1905   : > { %3772 = vmatpush3.msra.mxu1 %v3090_v18  ;;  %3807 = vmatpush3.msra.mxu0 %v3122_v19 }
0x1906   : > { %3773 = vmatprep.subr.mxu1 %v3105_v20  ;;  %3808 = vmatprep.subr.mxu0 %v3137_v21 }
0x1907   : > { %3774 = vmatpush3.msra.mxu1 %v3089_v22  ;;  %3809 = vmatpush3.msra.mxu0 %v3121_v24 }
0x1908   : > { %3775 = vmatprep.subr.mxu1 %v3104_v25  ;;  %3810 = vmatprep.subr.mxu0 %v3136_v26 }
0x1909   : > { %3776 = vmatpush3.msra.mxu1 %v3088_v27  ;;  %3811 = vmatpush3.msra.mxu0 %v3120_v33 }
0x190a   : > { %3777 = vmatprep.subr.mxu1 %v3103_v28  ;;  %3812 = vmatprep.subr.mxu0 %v3135_v29 }
0x190b   : > { %3778 = vmatpush3.msra.mxu1 %v3087_v30  ;;  %3813 = vmatpush3.msra.mxu0 %v3119_v31 }
0x190c   : > { %3779 = vmatprep.subr.mxu1 %v3102_v32  ;;  %3814 = vmatprep.subr.mxu0 %v3134_v34 }
0x190d   : > { %3780 = vmatpush3.msra.mxu1 %v3086_v10  ;;  %3815 = vmatpush3.msra.mxu0 %v3118_v36  ;;  %v3585_v36 = vld [vmem:[%s5551_s6 + $0x2] ss:$0 sm:$0xff] }
0x190e   : > { %3781 = vmatprep.subr.mxu1 %v3101_v15  ;;  %3816 = vmatprep.subr.mxu0 %v3133_v0  ;;  %v3586_v0 = vld [vmem:[%s5552_s22 + $0x2] ss:$0 sm:$0xff] }
0x190f   : > { %3782 = vmatpush3.msra.mxu1 %v3085_v37  ;;  %3817 = vmatpush3.msra.mxu0 %v3117_v38 }
0x1910   : > { %3783 = vmatprep.subr.mxu1 %v3100_v40  ;;  %3818 = vmatprep.subr.mxu0 %v3132_v41 }
0x1911   : > { %3784 = vmatpush3.msra.mxu1 %v3084_v42  ;;  %3819 = vmatpush3.msra.mxu0 %v3116_v43 }
0x1912   : > { %3785 = vmatprep.subr.mxu1 %v3099_v44  ;;  %3820 = vmatprep.subr.mxu0 %v3131_v45 }
0x1913   : > { %3786 = vmatpush3.msra.mxu1 %v3083_v47  ;;  %3821 = vmatpush3.msra.mxu0 %v3115_v48 }
0x1914   : > { %3787 = vmatprep.subr.mxu1 %v3098_v46  ;;  %3822 = vmatprep.subr.mxu0 %v3130_v49 }
0x1915   : > { %3788 = vmatpush3.msra.mxu1 %v3082_v51  ;;  %3823 = vmatpush3.msra.mxu0 %v3114_v52 }
0x1916   : > { %3789 = vmatprep.subr.mxu1 %v3097_v39  ;;  %3824 = vmatprep.subr.mxu0 %v3129_v55 }
0x1917   : > { %3790 = vmatpush3.msra.mxu1 %v3081_v56  ;;  %3825 = vmatpush3.msra.mxu0 %v3113_v60 }
0x19b8   : > { %v3001_v50 = vpop.f32.mrf.mxu1  ;;  %v3072_v23 = vpop.f32.mrf.mxu0 }
0x19b9   : > { %v3002_v3 = vadd.f32 %v3001_v50, %v2918_v58  ;;  %v3073_v4 = vadd.f32 %v3072_v23, %v2926_v35 }
0x19ba   : > { %v3003_v5 = vpop.f32.mrf.mxu1  ;;  %v3074_v6 = vpop.f32.mrf.mxu0 }
0x19bb   : > { %v3004_v7 = vadd.f32 %v3003_v5, %v2922_v1  ;;  %v3075_v8 = vadd.f32 %v3074_v6, %v2930_v2  ;;  %v3077_v12 = vmax.f32 %v3002_v3, 0.0  ;;  %v3079_v13 = vmax.f32 %v3073_v4, 0.0 }
0x19bd   : > { %v3078_v9 = vmax.f32 %v3004_v7, 0.0  ;;  %v3080_v11 = vmax.f32 %v3075_v8, 0.0 }
0x19bf   : > { %3216 = vmatprep.mubr.f32.mxu1 %v3078_v9  ;;  %3286 = vmatprep.mubr.f32.mxu0 %v3080_v11 }
0x19c0   : > { %3217 = vmatmul.mubr.f32.vlgmr.msra.gmra.mxu1 %v3077_v12  ;;  %3287 = vmatmul.mubr.f32.vlgmr.msra.gmra.mxu0 %v3079_v13 }
0x1a80   : > { %v3791_v53 = vpop.f32.mrf.mxu1  ;;  %v3826_v54 = vpop.f32.mrf.mxu0 }
0x1a82   : > { %v3792_v16 = vpop.f32.mrf.mxu1  ;;  %v3827_v17 = vpop.f32.mrf.mxu0 }
0x1a83   : > { %v3793_v18 = vadd.f32 %v3792_v16, %v3791_v53  ;;  %v3828_v20 = vadd.f32 %v3827_v17, %v3826_v54 }
0x1a85   : > { %v3219_v19 = vadd.f32 %v3793_v18, %v3582_v14 }
0x1a87   : > { %v3289_v21 = vadd.f32 %v3828_v20, %v3219_v19 }
0x1a89   : > { %3296 = vadd.xlane.f32.xlu1 %v3289_v21 }
0x1b12   : > { %v3297_v22 = vpop.xlane.xlu1 %3296 }
0x1b13   : > { %v3298_v24 = vmul.f32 0.0078125, %v3297_v22 }
0x1b15   : > { %v3299_v25 = vsub.f32 %v3289_v21, %v3298_v24 }
0x1b17   : > { %v3300_v26 = vmul.f32 %v3299_v25, %v3299_v25 }
0x1b19   : > { %3301 = vadd.xlane.f32.xlu1 %v3300_v26 }
0x1ba2   : > { %v3302_v27 = vpop.xlane.xlu1 %3301 }
0x1ba3   : > { %v3303_v33 = vmul.f32 0.007874016, %v3302_v27 }
0x1ba5   : > { %4341 = vrsqrt.f32 %v3303_v33  ;;  %vm3306_vm12 = vcmp.eq.f32.partialorder %v3303_v33, inf  ;;  %v3309_v30 = vand.u32 2147483648, %v3303_v33  ;;  %vm3308_vm13 = vcmp.eq.f32.partialorder %v3303_v33, 0.0 }
0x1bb2   : > { %v4342_v28 = vpop.eup %4341 }
0x1bb3   : > { %v3305_v29 = vmul.f32 %v4342_v28, %v3303_v33 }
0x1bb5   : > { %v3307_v31 = vsel %vm3306_vm12, %v3303_v33, %v3305_v29 }
0x1bb6   : > { %v3310_v32 = vsel %vm3308_vm13, %v3309_v30, %v3307_v31 }
0x1bb7   : > { %v3311_v34 = vadd.f32 1e-06, %v3310_v32 }
0x1bb9   : > { %4343 = vrcp.f32 %v3311_v34 }
0x1bc6   : > { %v4344_v10 = vpop.eup %4343 }
0x1bc7   : > { %v3313_v15 = vmul.f32 %v4344_v10, %v3299_v25 }
0x1bc9   : > { %v3320_v37 = vmul.f32 %v3585_v36, %v3313_v15 }
0x1bcb   : > { %v3327_v38 = vadd.f32 %v3586_v0, %v3320_v37 }
0x1bcd   : > { %v3328_v40 = vadd.f32 %v3327_v38, %v5416_v59 }
0x1bcf   : > { %3329 = vst [vmem:[%s645_s4] sm:$0xff] %v3328_v40 }
0x1bd0   : > { %4574 = shalt.err (!%p4571_p13)
}
0x1bd1   : > { %s4575_s15 = scalar_lea.hbm %s3342_s18, 128  ;;  %s4579_s21 = scalar_lea.hbm %s5557_s8, 256 }
0x1bd2   : > { %p4576_p9 = scmp.ne.s32.totalorder %s3342_s18, %s4575_s15  ;;  %p4580_p10 = scmp.lt.s32.totalorder %s3342_s18, %s5557_s8 }
0x1bd3   : > { %p4581_p5 = scmp.lt.s32.totalorder %s4579_s21, %s4575_s15 }
0x1bd4   : > { %p4577_p1 = pnand %p4576_p9, %p5558_p2 }
0x1bd5   : > { %p4582_p3 = por %p4581_p5, %p4580_p10 }
0x1bd6   : > { %p4578_p12 = pneg %p4577_p1 }
0x1bd8   : > { %p4583_p7 = pnand %p4582_p3, %p4578_p12 }
0x1bda   : > { %4586 = shalt.err (!%p4583_p7)
}
0x1bdb   : > { %4213 = dma.vmem_to_hbm [thread:$0]  (%p5558_p2), %s3345_s20, 128, %s3342_s18, %s3331_s27  }
0x1bdc PF: > { %s5559_s9 = sld [smem:[#allocation24_spill]]  ;;  %p5562_p6 = scmp.ge.s32.totalorder %s4645_s16, 2 }
0x1bdd   : > { %s5560_s7 = sld [smem:[#allocation26_spill]] }
0x1be2   : > { %s3356_s12 = sand.u32 1, %s5559_s9  }
0x1be3   : > { %p5561_p4 = scmp.ne.s32.totalorder %s5560_s7, 0  ;;  %s3357_s4 = scalar_lea.sflag [#allocation4], %s3356_s12 }
0x1be5   : > { %p4242_p8 = pnand %p5562_p6, %p5561_p4 }
0x1be7   : > { %p4243_p11 = pneg %p4242_p8 }
0x1be9   : > { %4628 = dma.done.wait (%p4243_p11), %s3357_s4, 128  }
0x1bea   : > { %4630 = vsyncadd (%p4243_p11), %s3357_s4, 4294967168  ;;  %s5563_s16 = sld [smem:[#allocation27_spill]]  ;;  %s5566_s29 = smov %s4637_s30 }
0x1beb   : > { %s5564_s23 = sld [smem:[#allocation25_spill]] }
0x1bec   : > { %s5565_s15 = sld [smem:[#allocation29_spill]] }
0x1bf0   : > { %p35_p0 = scmp.ge.s32.totalorder %s5563_s16, 4  }
0x1bf1   : > { %s5567_s30 = smov %s5564_s23 }
0x1bf2   :  { %37 = sbr.rel (!%p35_p0) target bundleno = 22 (0x16), region = 190 }
0x1bf7   :  { %3362 = vsyncpa [#allocation3], 1 }
0x1bf8   :  { %3364 = vsyncpa [#allocation3 + $0x1], 1 }
0x1bf9   :  { %3365 = vsyncpa [#allocation6], 1 }
0x1bfa   :  { %3367 = vsyncpa [#allocation6 + $0x1], 1 }
0x1bfb   :  { %3368 = vsyncpa [#allocation9], 1 }
0x1bfc   :  { %3370 = vsyncpa [#allocation9 + $0x1], 1 }
0x1bfd   :  { %3371 = vsyncpa [#allocation12], 1 }
0x1bfe   :  { %3372 = vsyncpa [#allocation15], 1 }
0x1bff   :  { %3373 = vsyncpa [#allocation4], 1 }
0x1c00   :  { %3375 = vsyncpa [#allocation4 + $0x1], 1 }

</bundles_post_ra>
